<compile_context>
chip_gen: v7x
topology: tpu7x:2x2x1
jax: 0.10.0
libtpu: 0.0.40
codegen_flags: <defaults>
</compile_context>

<pallas_src>
import functools

import numpy as np
import jax
import jax.numpy as jnp
from jax.experimental import pallas as pl
from jax.experimental.pallas import tpu as pltpu


def _round_up(a, m):
    return ((a + m - 1) // m) * m


def _dot_bf16x3(a, w_hi, w_lo):
    """3-pass bf16 matmul with f32 accumulation (Precision.HIGH-equivalent).

    a (f32) is split into hi/lo bf16 parts; the weights come pre-split.  The
    dropped a_lo@w_lo term is ~2^-18 relative, far inside the 1e-2 tolerance even
    after the 6 chained spectral products.
    """
    a_hi = a.astype(jnp.bfloat16)
    a_lo = (a - a_hi.astype(jnp.float32)).astype(jnp.bfloat16)
    out = jnp.dot(a_hi, w_hi, preferred_element_type=jnp.float32)
    out = out + jnp.dot(a_lo, w_hi, preferred_element_type=jnp.float32)
    out = out + jnp.dot(a_hi, w_lo, preferred_element_type=jnp.float32)
    return out


def _formula_kernel(attn_ref, x_ref, ctx_ref, fh_ref, fl_ref, gh_ref, gl_ref,
                    o_ref, *, num_terms, examples_len, context_len):
    # attn_ref: (T, P+1) f32, SMEM   softmax'ed term weights (batch-invariant)
    # x_ref   : (b_blk, Ex*D) f32    example panels; panel p = lanes [p*D,(p+1)*D)
    # ctx_ref : (b_blk, Cx*D) f32    context panels, same layout
    # fh/fl   : (D, 2D)  bf16        forward DFT  [F_re | F_im], hi/lo split
    # gh/gl   : (2D, D)  bf16        inverse DFT  [[F_re],[F_im]]/d, hi/lo split
    # o_ref   : (b_blk, D) f32       lane- and sublane-dense output block
    D = o_ref.shape[-1]
    n_real = examples_len + context_len          # panels carried in x/ctx
    fh, fl = fh_ref[...], fl_ref[...]

    # Load every real panel once (lane-aligned static slices), reuse across terms.
    panels = [x_ref[:, p * D:(p + 1) * D] for p in range(examples_len)]
    panels += [ctx_ref[:, c * D:(c + 1) * D] for c in range(context_len)]

    def term_spec(t):
        # wcomb: softmax-weighted panel combination, fused in-kernel (VPU FMAs
        # with SMEM scalar weights) so no (T, B, D) HBM intermediate exists.
        acc = attn_ref[t, 0] * panels[0]
        for p in range(1, n_real):
            acc = acc + attn_ref[t, p] * panels[p]
        s = _dot_bf16x3(acc, fh, fl)                         # (b_blk, 2D)
        # identity panel = per-block delta -> spectrum (Re=1, Im=0): scalar add.
        return s[:, :D] + attn_ref[t, n_real], s[:, D:]

    def cmul(a, b):  # block_binding2 == complex product of block spectra
        ar, ai = a
        br, bi = b
        return ar * br - ai * bi, ar * bi + ai * br

    def tree_bind(lo, hi):
        # bind_seq(...): conv is associative/commutative, so a balanced pairwise
        # tree matches the left fold with a shorter dependency chain.
        items = [term_spec(t) for t in range(lo, hi)]
        while len(items) > 1:
            nxt = [cmul(items[i], items[i + 1])
                   for i in range(0, len(items) - 1, 2)]
            if len(items) % 2:
                nxt.append(items[-1])
            items = nxt
        return items[0]

    half = num_terms // 2
    nr, ni = tree_bind(0, half)              # numerator   = bind_seq(terms[:T//2])
    dr, di = tree_bind(half, num_terms)      # denominator = bind_seq(terms[T//2:])

    # block_unbinding2(n, d) == multiply by the complex conjugate of d's spectrum
    rr = nr * dr + ni * di
    ri = ni * dr - nr * di

    # blockwise inverse DFT (real part), single fused K=2D matmul (3 bf16 passes)
    out = _dot_bf16x3(jnp.concatenate([rr, ri], axis=-1), gh_ref[...], gl_ref[...])
    o_ref[...] = out.astype(o_ref.dtype)


@functools.partial(jax.jit, static_argnames=("k",))
def iravenx_formula_forward(x, ctx, term_weights, k):
    """x: (B, examples_len, D), ctx: (B, context_len, D), term_weights: (T, P+1)."""
    B, Ex, D = x.shape
    Cx = ctx.shape[1]
    d = D // k
    T = term_weights.shape[0]

    # batch-invariant softmax of the per-term panel weights (tiny; stays in XLA)
    attn = jax.nn.softmax(term_weights.astype(jnp.float32), axis=-1)   # (T, P+1)

    # (B, P, D) -> (B, P*D) is a free row-major reshape; panel p becomes a
    # 128-aligned lane slice inside the kernel (no strided sublane gathers).
    x2 = x.astype(jnp.float32).reshape(B, Ex * D)
    c2 = ctx.astype(jnp.float32).reshape(B, Cx * D)

    # Fused block-diagonal (I_k ⊗ DFT_d) matrices, built once at trace time and
    # split hi/lo (bf16) for the manual 3-pass matmuls.
    idx = np.arange(d)
    ang = 2.0 * np.pi * np.outer(idx, idx) / d
    C, S = np.cos(ang), np.sin(ang)
    F_re = np.kron(np.eye(k), C)                        # x @ F_re = Re(DFT)
    F_im = np.kron(np.eye(k), -S)                       # x @ F_im = Im(DFT)
    Ffwd = jnp.asarray(np.concatenate([F_re, F_im], axis=1), jnp.float32)       # (D, 2D)
    Finv = jnp.asarray(np.concatenate([F_re, F_im], axis=0) / d, jnp.float32)   # (2D, D)

    def split(w):
        hi = w.astype(jnp.bfloat16)
        lo = (w - hi.astype(jnp.float32)).astype(jnp.bfloat16)
        return hi, lo

    fh, fl = split(Ffwd)
    gh, gl = split(Finv)

    # Batch blocking: dense sublanes (multiple of 8), cap 256 (review: 256-512),
    # and keep >=2 grid steps once the batch is non-trivial so both v7x cores work.
    Bp = _round_up(B, 8)
    if Bp >= 16:
        b_blk = min(256, _round_up(Bp // 2, 8))
    else:
        b_blk = Bp
    Bp = _round_up(Bp, b_blk)
    if Bp != B:
        x2 = jnp.pad(x2, ((0, Bp - B), (0, 0)))
        c2 = jnp.pad(c2, ((0, Bp - B), (0, 0)))

    kernel = functools.partial(_formula_kernel, num_terms=T,
                               examples_len=Ex, context_len=Cx)

    out = pl.pallas_call(
        kernel,
        out_shape=jax.ShapeDtypeStruct((Bp, D), jnp.float32),
        grid_spec=pltpu.PrefetchScalarGridSpec(
            num_scalar_prefetch=0,
            grid=(Bp // b_blk,),
            in_specs=[
                pl.BlockSpec(memory_space=pltpu.MemorySpace.SMEM),   # attn (T, P+1)
                pl.BlockSpec((b_blk, Ex * D), lambda g: (g, 0)),     # example panels
                pl.BlockSpec((b_blk, Cx * D), lambda g: (g, 0)),     # context panels
                pl.BlockSpec((D, 2 * D), lambda g: (0, 0)),          # Ffwd hi
                pl.BlockSpec((D, 2 * D), lambda g: (0, 0)),          # Ffwd lo
                pl.BlockSpec((2 * D, D), lambda g: (0, 0)),          # Finv hi
                pl.BlockSpec((2 * D, D), lambda g: (0, 0)),          # Finv lo
            ],
            out_specs=pl.BlockSpec((b_blk, D), lambda g: (g, 0)),
        ),
        compiler_params=pltpu.CompilerParams(
            dimension_semantics=("parallel",),
            vmem_limit_bytes=32 * 1024 * 1024),
    )(attn, x2, c2, fh, fl, gh, gl)

    return out[:B]


def reference_forward(x, ctx, term_weights, k):
    """Pure numpy (float64) reference using *direct* circular convolution."""
    x = np.asarray(x, np.float64)
    ctx = np.asarray(ctx, np.float64)
    w = np.asarray(term_weights, np.float64)
    B = x.shape[0]
    xc = np.concatenate([x, ctx], axis=1)
    P, D = xc.shape[1], xc.shape[2]
    d = D // k
    xr = xc.reshape(B, P, k, d)
    ident = np.zeros((B, 1, k, d))
    ident[:, :, :, 0] = 1.0
    xf = np.concatenate([xr, ident], axis=1).reshape(B, P + 1, D)

    e = np.exp(w - w.max(axis=-1, keepdims=True))
    attn = e / e.sum(axis=-1, keepdims=True)                # (T, P+1)
    T = attn.shape[0]
    terms = np.einsum('tp,bpd->btd', attn, xf).reshape(B, T, k, d)

    def conv(a, b):      # block_binding2 : blockwise circular convolution
        out = np.zeros_like(a)
        for j in range(d):
            for m in range(d):
                out[..., j] += a[..., m] * b[..., (j - m) % d]
        return out

    def corr(a, b):      # block_unbinding2 : blockwise circular correlation
        out = np.zeros_like(a)
        for j in range(d):
            for m in range(d):
                out[..., j] += a[..., (j + m) % d] * b[..., m]
        return out

    half = T // 2
    n = terms[:, 0]
    for t in range(1, half):
        n = conv(n, terms[:, t])
    dn = terms[:, half]
    for t in range(half + 1, T):
        dn = conv(dn, terms[:, t])
    return corr(n, dn).reshape(B, k * d)


if __name__ == "__main__":
    B, examples_len, context_len, k, d = 2, 8, 4, 4, 32
    D = k * d
    num_terms = 12
    num_panels = examples_len + context_len + 1             # 13

    key = jax.random.PRNGKey(0)
    kx, kc, kw = jax.random.split(key, 3)
    x = jax.random.normal(kx, (B, examples_len, D), jnp.float32)
    ctx = jax.random.normal(kc, (B, context_len, D), jnp.float32)
    # nn.Parameter(torch.randn(num_panels)) per term, stacked:
    term_weights = jax.random.normal(kw, (num_terms, num_panels), jnp.float32)

    out = iravenx_formula_forward(x, ctx, term_weights, k)
    out = jax.block_until_ready(out)

    ref = reference_forward(x, ctx, term_weights, k)
    assert out.shape == (B, D)
    rel_err = np.max(np.abs(np.asarray(out, np.float64) - ref)) / (np.max(np.abs(ref)) + 1e-9)
    assert rel_err < 1e-2, f"mismatch vs reference: rel max err {rel_err}"

    print("KERNEL_OK")
</pallas_src>

<mosaic_0001>
module attributes {stable_mosaic.version = 11 : i64} {
  func.func @_formula_kernel(%arg0: i32, %arg1: memref<12x13xf32, #tpu.memory_space<smem>>, %arg2: memref<8x1024xf32, #tpu.memory_space<vmem>>, %arg3: memref<8x512xf32, #tpu.memory_space<vmem>>, %arg4: memref<128x256xbf16, #tpu.memory_space<vmem>>, %arg5: memref<128x256xbf16, #tpu.memory_space<vmem>>, %arg6: memref<256x128xbf16, #tpu.memory_space<vmem>>, %arg7: memref<256x128xbf16, #tpu.memory_space<vmem>>, %arg8: memref<8x128xf32, #tpu.memory_space<vmem>>) attributes {dimension_semantics = [#tpu.dimension_semantics<parallel>], iteration_bounds = array<i64: 1>, scalar_prefetch = 0 : i64, scratch_operands = 0 : i64, tpu.core_type = #tpu.core_type<tc>, window_params = [{transform_indices = @transform_0, window_bounds = array<i64: 12, 13>}, {transform_indices = @transform_1, window_bounds = array<i64: 8, 1024>}, {transform_indices = @transform_2, window_bounds = array<i64: 8, 512>}, {pipeline_mode = #tpu.pipeline_mode<synchronous>, transform_indices = @transform_3, window_bounds = array<i64: 128, 256>}, {pipeline_mode = #tpu.pipeline_mode<synchronous>, transform_indices = @transform_4, window_bounds = array<i64: 128, 256>}, {pipeline_mode = #tpu.pipeline_mode<synchronous>, transform_indices = @transform_5, window_bounds = array<i64: 256, 128>}, {pipeline_mode = #tpu.pipeline_mode<synchronous>, transform_indices = @transform_6, window_bounds = array<i64: 256, 128>}, {transform_indices = @transform_7, window_bounds = array<i64: 8, 128>}]} {
    %c0 = arith.constant 0 : index
    %c0_0 = arith.constant 0 : index
    %0 = vector.load %arg4[%c0, %c0_0] : memref<128x256xbf16, #tpu.memory_space<vmem>>, vector<128x256xbf16>
    %c0_1 = arith.constant 0 : index
    %c0_2 = arith.constant 0 : index
    %1 = vector.load %arg5[%c0_1, %c0_2] : memref<128x256xbf16, #tpu.memory_space<vmem>>, vector<128x256xbf16>
    %c0_3 = arith.constant 0 : index
    %c0_4 = arith.constant 0 : index
    %2 = vector.load %arg2[%c0_3, %c0_4] : memref<8x1024xf32, #tpu.memory_space<vmem>>, vector<8x128xf32>
    %c0_5 = arith.constant 0 : index
    %c128 = arith.constant 128 : index
    %3 = vector.load %arg2[%c0_5, %c128] : memref<8x1024xf32, #tpu.memory_space<vmem>>, vector<8x128xf32>
    %c0_6 = arith.constant 0 : index
    %c256 = arith.constant 256 : index
    %4 = vector.load %arg2[%c0_6, %c256] : memref<8x1024xf32, #tpu.memory_space<vmem>>, vector<8x128xf32>
    %c0_7 = arith.constant 0 : index
    %c384 = arith.constant 384 : index
    %5 = vector.load %arg2[%c0_7, %c384] : memref<8x1024xf32, #tpu.memory_space<vmem>>, vector<8x128xf32>
    %c0_8 = arith.constant 0 : index
    %c512 = arith.constant 512 : index
    %6 = vector.load %arg2[%c0_8, %c512] : memref<8x1024xf32, #tpu.memory_space<vmem>>, vector<8x128xf32>
    %c0_9 = arith.constant 0 : index
    %c640 = arith.constant 640 : index
    %7 = vector.load %arg2[%c0_9, %c640] : memref<8x1024xf32, #tpu.memory_space<vmem>>, vector<8x128xf32>
    %c0_10 = arith.constant 0 : index
    %c768 = arith.constant 768 : index
    %8 = vector.load %arg2[%c0_10, %c768] : memref<8x1024xf32, #tpu.memory_space<vmem>>, vector<8x128xf32>
    %c0_11 = arith.constant 0 : index
    %c896 = arith.constant 896 : index
    %9 = vector.load %arg2[%c0_11, %c896] : memref<8x1024xf32, #tpu.memory_space<vmem>>, vector<8x128xf32>
    %c0_12 = arith.constant 0 : index
    %c0_13 = arith.constant 0 : index
    %10 = vector.load %arg3[%c0_12, %c0_13] : memref<8x512xf32, #tpu.memory_space<vmem>>, vector<8x128xf32>
    %c0_14 = arith.constant 0 : index
    %c128_15 = arith.constant 128 : index
    %11 = vector.load %arg3[%c0_14, %c128_15] : memref<8x512xf32, #tpu.memory_space<vmem>>, vector<8x128xf32>
    %c0_16 = arith.constant 0 : index
    %c256_17 = arith.constant 256 : index
    %12 = vector.load %arg3[%c0_16, %c256_17] : memref<8x512xf32, #tpu.memory_space<vmem>>, vector<8x128xf32>
    %c0_18 = arith.constant 0 : index
    %c384_19 = arith.constant 384 : index
    %13 = vector.load %arg3[%c0_18, %c384_19] : memref<8x512xf32, #tpu.memory_space<vmem>>, vector<8x128xf32>
    %c0_20 = arith.constant 0 : index
    %c0_21 = arith.constant 0 : index
    %14 = memref.load %arg1[%c0_20, %c0_21] : memref<12x13xf32, #tpu.memory_space<smem>>
    %15 = vector.broadcast %14 : f32 to vector<8x128xf32>
    %16 = arith.mulf %15, %2 : vector<8x128xf32>
    %c0_22 = arith.constant 0 : index
    %c1 = arith.constant 1 : index
    %17 = memref.load %arg1[%c0_22, %c1] : memref<12x13xf32, #tpu.memory_space<smem>>
    %18 = vector.broadcast %17 : f32 to vector<8x128xf32>
    %19 = arith.mulf %18, %3 : vector<8x128xf32>
    %20 = arith.addf %16, %19 : vector<8x128xf32>
    %c0_23 = arith.constant 0 : index
    %c2 = arith.constant 2 : index
    %21 = memref.load %arg1[%c0_23, %c2] : memref<12x13xf32, #tpu.memory_space<smem>>
    %22 = vector.broadcast %21 : f32 to vector<8x128xf32>
    %23 = arith.mulf %22, %4 : vector<8x128xf32>
    %24 = arith.addf %20, %23 : vector<8x128xf32>
    %c0_24 = arith.constant 0 : index
    %c3 = arith.constant 3 : index
    %25 = memref.load %arg1[%c0_24, %c3] : memref<12x13xf32, #tpu.memory_space<smem>>
    %26 = vector.broadcast %25 : f32 to vector<8x128xf32>
    %27 = arith.mulf %26, %5 : vector<8x128xf32>
    %28 = arith.addf %24, %27 : vector<8x128xf32>
    %c0_25 = arith.constant 0 : index
    %c4 = arith.constant 4 : index
    %29 = memref.load %arg1[%c0_25, %c4] : memref<12x13xf32, #tpu.memory_space<smem>>
    %30 = vector.broadcast %29 : f32 to vector<8x128xf32>
    %31 = arith.mulf %30, %6 : vector<8x128xf32>
    %32 = arith.addf %28, %31 : vector<8x128xf32>
    %c0_26 = arith.constant 0 : index
    %c5 = arith.constant 5 : index
    %33 = memref.load %arg1[%c0_26, %c5] : memref<12x13xf32, #tpu.memory_space<smem>>
    %34 = vector.broadcast %33 : f32 to vector<8x128xf32>
    %35 = arith.mulf %34, %7 : vector<8x128xf32>
    %36 = arith.addf %32, %35 : vector<8x128xf32>
    %c0_27 = arith.constant 0 : index
    %c6 = arith.constant 6 : index
    %37 = memref.load %arg1[%c0_27, %c6] : memref<12x13xf32, #tpu.memory_space<smem>>
    %38 = vector.broadcast %37 : f32 to vector<8x128xf32>
    %39 = arith.mulf %38, %8 : vector<8x128xf32>
    %40 = arith.addf %36, %39 : vector<8x128xf32>
    %c0_28 = arith.constant 0 : index
    %c7 = arith.constant 7 : index
    %41 = memref.load %arg1[%c0_28, %c7] : memref<12x13xf32, #tpu.memory_space<smem>>
    %42 = vector.broadcast %41 : f32 to vector<8x128xf32>
    %43 = arith.mulf %42, %9 : vector<8x128xf32>
    %44 = arith.addf %40, %43 : vector<8x128xf32>
    %c0_29 = arith.constant 0 : index
    %c8 = arith.constant 8 : index
    %45 = memref.load %arg1[%c0_29, %c8] : memref<12x13xf32, #tpu.memory_space<smem>>
    %46 = vector.broadcast %45 : f32 to vector<8x128xf32>
    %47 = arith.mulf %46, %10 : vector<8x128xf32>
    %48 = arith.addf %44, %47 : vector<8x128xf32>
    %c0_30 = arith.constant 0 : index
    %c9 = arith.constant 9 : index
    %49 = memref.load %arg1[%c0_30, %c9] : memref<12x13xf32, #tpu.memory_space<smem>>
    %50 = vector.broadcast %49 : f32 to vector<8x128xf32>
    %51 = arith.mulf %50, %11 : vector<8x128xf32>
    %52 = arith.addf %48, %51 : vector<8x128xf32>
    %c0_31 = arith.constant 0 : index
    %c10 = arith.constant 10 : index
    %53 = memref.load %arg1[%c0_31, %c10] : memref<12x13xf32, #tpu.memory_space<smem>>
    %54 = vector.broadcast %53 : f32 to vector<8x128xf32>
    %55 = arith.mulf %54, %12 : vector<8x128xf32>
    %56 = arith.addf %52, %55 : vector<8x128xf32>
    %c0_32 = arith.constant 0 : index
    %c11 = arith.constant 11 : index
    %57 = memref.load %arg1[%c0_32, %c11] : memref<12x13xf32, #tpu.memory_space<smem>>
    %58 = vector.broadcast %57 : f32 to vector<8x128xf32>
    %59 = arith.mulf %58, %13 : vector<8x128xf32>
    %60 = arith.addf %56, %59 : vector<8x128xf32>
    %61 = arith.truncf %60 : vector<8x128xf32> to vector<8x128xbf16>
    %62 = arith.extf %61 : vector<8x128xbf16> to vector<8x128xf32>
    %63 = arith.subf %60, %62 : vector<8x128xf32>
    %64 = arith.truncf %63 : vector<8x128xf32> to vector<8x128xbf16>
    %cst = arith.constant dense<0.000000e+00> : vector<8x256xf32>
    %65 = tpu.matmul %61, %0, %cst {dimension_numbers = #tpu.dot_dimension_numbers<[1], [0], [0], [1], [0, 0, 1, 1], [], []>} : vector<8x128xbf16>, vector<128x256xbf16>, vector<8x256xf32> -> vector<8x256xf32>
    %cst_33 = arith.constant dense<0.000000e+00> : vector<8x256xf32>
    %66 = tpu.matmul %64, %0, %cst_33 {dimension_numbers = #tpu.dot_dimension_numbers<[1], [0], [0], [1], [0, 0, 1, 1], [], []>} : vector<8x128xbf16>, vector<128x256xbf16>, vector<8x256xf32> -> vector<8x256xf32>
    %67 = arith.addf %65, %66 : vector<8x256xf32>
    %cst_34 = arith.constant dense<0.000000e+00> : vector<8x256xf32>
    %68 = tpu.matmul %61, %1, %cst_34 {dimension_numbers = #tpu.dot_dimension_numbers<[1], [0], [0], [1], [0, 0, 1, 1], [], []>} : vector<8x128xbf16>, vector<128x256xbf16>, vector<8x256xf32> -> vector<8x256xf32>
    %69 = arith.addf %67, %68 : vector<8x256xf32>
    %70 = vector.extract_strided_slice %69 {offsets = [0, 0], sizes = [8, 128], strides = [1, 1]} : vector<8x256xf32> to vector<8x128xf32>
    %c0_35 = arith.constant 0 : index
    %c12 = arith.constant 12 : index
    %71 = memref.load %arg1[%c0_35, %c12] : memref<12x13xf32, #tpu.memory_space<smem>>
    %72 = vector.broadcast %71 : f32 to vector<8x128xf32>
    %73 = arith.addf %70, %72 : vector<8x128xf32>
    %74 = vector.extract_strided_slice %69 {offsets = [0, 128], sizes = [8, 128], strides = [1, 1]} : vector<8x256xf32> to vector<8x128xf32>
    %c1_36 = arith.constant 1 : index
    %c0_37 = arith.constant 0 : index
    %75 = memref.load %arg1[%c1_36, %c0_37] : memref<12x13xf32, #tpu.memory_space<smem>>
    %76 = vector.broadcast %75 : f32 to vector<8x128xf32>
    %77 = arith.mulf %76, %2 : vector<8x128xf32>
    %c1_38 = arith.constant 1 : index
    %c1_39 = arith.constant 1 : index
    %78 = memref.load %arg1[%c1_38, %c1_39] : memref<12x13xf32, #tpu.memory_space<smem>>
    %79 = vector.broadcast %78 : f32 to vector<8x128xf32>
    %80 = arith.mulf %79, %3 : vector<8x128xf32>
    %81 = arith.addf %77, %80 : vector<8x128xf32>
    %c1_40 = arith.constant 1 : index
    %c2_41 = arith.constant 2 : index
    %82 = memref.load %arg1[%c1_40, %c2_41] : memref<12x13xf32, #tpu.memory_space<smem>>
    %83 = vector.broadcast %82 : f32 to vector<8x128xf32>
    %84 = arith.mulf %83, %4 : vector<8x128xf32>
    %85 = arith.addf %81, %84 : vector<8x128xf32>
    %c1_42 = arith.constant 1 : index
    %c3_43 = arith.constant 3 : index
    %86 = memref.load %arg1[%c1_42, %c3_43] : memref<12x13xf32, #tpu.memory_space<smem>>
    %87 = vector.broadcast %86 : f32 to vector<8x128xf32>
    %88 = arith.mulf %87, %5 : vector<8x128xf32>
    %89 = arith.addf %85, %88 : vector<8x128xf32>
    %c1_44 = arith.constant 1 : index
    %c4_45 = arith.constant 4 : index
    %90 = memref.load %arg1[%c1_44, %c4_45] : memref<12x13xf32, #tpu.memory_space<smem>>
    %91 = vector.broadcast %90 : f32 to vector<8x128xf32>
    %92 = arith.mulf %91, %6 : vector<8x128xf32>
    %93 = arith.addf %89, %92 : vector<8x128xf32>
    %c1_46 = arith.constant 1 : index
    %c5_47 = arith.constant 5 : index
    %94 = memref.load %arg1[%c1_46, %c5_47] : memref<12x13xf32, #tpu.memory_space<smem>>
    %95 = vector.broadcast %94 : f32 to vector<8x128xf32>
    %96 = arith.mulf %95, %7 : vector<8x128xf32>
    %97 = arith.addf %93, %96 : vector<8x128xf32>
    %c1_48 = arith.constant 1 : index
    %c6_49 = arith.constant 6 : index
    %98 = memref.load %arg1[%c1_48, %c6_49] : memref<12x13xf32, #tpu.memory_space<smem>>
    %99 = vector.broadcast %98 : f32 to vector<8x128xf32>
    %100 = arith.mulf %99, %8 : vector<8x128xf32>
    %101 = arith.addf %97, %100 : vector<8x128xf32>
    %c1_50 = arith.constant 1 : index
    %c7_51 = arith.constant 7 : index
    %102 = memref.load %arg1[%c1_50, %c7_51] : memref<12x13xf32, #tpu.memory_space<smem>>
    %103 = vector.broadcast %102 : f32 to vector<8x128xf32>
    %104 = arith.mulf %103, %9 : vector<8x128xf32>
    %105 = arith.addf %101, %104 : vector<8x128xf32>
    %c1_52 = arith.constant 1 : index
    %c8_53 = arith.constant 8 : index
    %106 = memref.load %arg1[%c1_52, %c8_53] : memref<12x13xf32, #tpu.memory_space<smem>>
    %107 = vector.broadcast %106 : f32 to vector<8x128xf32>
    %108 = arith.mulf %107, %10 : vector<8x128xf32>
    %109 = arith.addf %105, %108 : vector<8x128xf32>
    %c1_54 = arith.constant 1 : index
    %c9_55 = arith.constant 9 : index
    %110 = memref.load %arg1[%c1_54, %c9_55] : memref<12x13xf32, #tpu.memory_space<smem>>
    %111 = vector.broadcast %110 : f32 to vector<8x128xf32>
    %112 = arith.mulf %111, %11 : vector<8x128xf32>
    %113 = arith.addf %109, %112 : vector<8x128xf32>
    %c1_56 = arith.constant 1 : index
    %c10_57 = arith.constant 10 : index
    %114 = memref.load %arg1[%c1_56, %c10_57] : memref<12x13xf32, #tpu.memory_space<smem>>
    %115 = vector.broadcast %114 : f32 to vector<8x128xf32>
    %116 = arith.mulf %115, %12 : vector<8x128xf32>
    %117 = arith.addf %113, %116 : vector<8x128xf32>
    %c1_58 = arith.constant 1 : index
    %c11_59 = arith.constant 11 : index
    %118 = memref.load %arg1[%c1_58, %c11_59] : memref<12x13xf32, #tpu.memory_space<smem>>
    %119 = vector.broadcast %118 : f32 to vector<8x128xf32>
    %120 = arith.mulf %119, %13 : vector<8x128xf32>
    %121 = arith.addf %117, %120 : vector<8x128xf32>
    %122 = arith.truncf %121 : vector<8x128xf32> to vector<8x128xbf16>
    %123 = arith.extf %122 : vector<8x128xbf16> to vector<8x128xf32>
    %124 = arith.subf %121, %123 : vector<8x128xf32>
    %125 = arith.truncf %124 : vector<8x128xf32> to vector<8x128xbf16>
    %cst_60 = arith.constant dense<0.000000e+00> : vector<8x256xf32>
    %126 = tpu.matmul %122, %0, %cst_60 {dimension_numbers = #tpu.dot_dimension_numbers<[1], [0], [0], [1], [0, 0, 1, 1], [], []>} : vector<8x128xbf16>, vector<128x256xbf16>, vector<8x256xf32> -> vector<8x256xf32>
    %cst_61 = arith.constant dense<0.000000e+00> : vector<8x256xf32>
    %127 = tpu.matmul %125, %0, %cst_61 {dimension_numbers = #tpu.dot_dimension_numbers<[1], [0], [0], [1], [0, 0, 1, 1], [], []>} : vector<8x128xbf16>, vector<128x256xbf16>, vector<8x256xf32> -> vector<8x256xf32>
    %128 = arith.addf %126, %127 : vector<8x256xf32>
    %cst_62 = arith.constant dense<0.000000e+00> : vector<8x256xf32>
    %129 = tpu.matmul %122, %1, %cst_62 {dimension_numbers = #tpu.dot_dimension_numbers<[1], [0], [0], [1], [0, 0, 1, 1], [], []>} : vector<8x128xbf16>, vector<128x256xbf16>, vector<8x256xf32> -> vector<8x256xf32>
    %130 = arith.addf %128, %129 : vector<8x256xf32>
    %131 = vector.extract_strided_slice %130 {offsets = [0, 0], sizes = [8, 128], strides = [1, 1]} : vector<8x256xf32> to vector<8x128xf32>
    %c1_63 = arith.constant 1 : index
    %c12_64 = arith.constant 12 : index
    %132 = memref.load %arg1[%c1_63, %c12_64] : memref<12x13xf32, #tpu.memory_space<smem>>
    %133 = vector.broadcast %132 : f32 to vector<8x128xf32>
    %134 = arith.addf %131, %133 : vector<8x128xf32>
    %135 = vector.extract_strided_slice %130 {offsets = [0, 128], sizes = [8, 128], strides = [1, 1]} : vector<8x256xf32> to vector<8x128xf32>
    %c2_65 = arith.constant 2 : index
    %c0_66 = arith.constant 0 : index
    %136 = memref.load %arg1[%c2_65, %c0_66] : memref<12x13xf32, #tpu.memory_space<smem>>
    %137 = vector.broadcast %136 : f32 to vector<8x128xf32>
    %138 = arith.mulf %137, %2 : vector<8x128xf32>
    %c2_67 = arith.constant 2 : index
    %c1_68 = arith.constant 1 : index
    %139 = memref.load %arg1[%c2_67, %c1_68] : memref<12x13xf32, #tpu.memory_space<smem>>
    %140 = vector.broadcast %139 : f32 to vector<8x128xf32>
    %141 = arith.mulf %140, %3 : vector<8x128xf32>
    %142 = arith.addf %138, %141 : vector<8x128xf32>
    %c2_69 = arith.constant 2 : index
    %c2_70 = arith.constant 2 : index
    %143 = memref.load %arg1[%c2_69, %c2_70] : memref<12x13xf32, #tpu.memory_space<smem>>
    %144 = vector.broadcast %143 : f32 to vector<8x128xf32>
    %145 = arith.mulf %144, %4 : vector<8x128xf32>
    %146 = arith.addf %142, %145 : vector<8x128xf32>
    %c2_71 = arith.constant 2 : index
    %c3_72 = arith.constant 3 : index
    %147 = memref.load %arg1[%c2_71, %c3_72] : memref<12x13xf32, #tpu.memory_space<smem>>
    %148 = vector.broadcast %147 : f32 to vector<8x128xf32>
    %149 = arith.mulf %148, %5 : vector<8x128xf32>
    %150 = arith.addf %146, %149 : vector<8x128xf32>
    %c2_73 = arith.constant 2 : index
    %c4_74 = arith.constant 4 : index
    %151 = memref.load %arg1[%c2_73, %c4_74] : memref<12x13xf32, #tpu.memory_space<smem>>
    %152 = vector.broadcast %151 : f32 to vector<8x128xf32>
    %153 = arith.mulf %152, %6 : vector<8x128xf32>
    %154 = arith.addf %150, %153 : vector<8x128xf32>
    %c2_75 = arith.constant 2 : index
    %c5_76 = arith.constant 5 : index
    %155 = memref.load %arg1[%c2_75, %c5_76] : memref<12x13xf32, #tpu.memory_space<smem>>
    %156 = vector.broadcast %155 : f32 to vector<8x128xf32>
    %157 = arith.mulf %156, %7 : vector<8x128xf32>
    %158 = arith.addf %154, %157 : vector<8x128xf32>
    %c2_77 = arith.constant 2 : index
    %c6_78 = arith.constant 6 : index
    %159 = memref.load %arg1[%c2_77, %c6_78] : memref<12x13xf32, #tpu.memory_space<smem>>
    %160 = vector.broadcast %159 : f32 to vector<8x128xf32>
    %161 = arith.mulf %160, %8 : vector<8x128xf32>
    %162 = arith.addf %158, %161 : vector<8x128xf32>
    %c2_79 = arith.constant 2 : index
    %c7_80 = arith.constant 7 : index
    %163 = memref.load %arg1[%c2_79, %c7_80] : memref<12x13xf32, #tpu.memory_space<smem>>
    %164 = vector.broadcast %163 : f32 to vector<8x128xf32>
    %165 = arith.mulf %164, %9 : vector<8x128xf32>
    %166 = arith.addf %162, %165 : vector<8x128xf32>
    %c2_81 = arith.constant 2 : index
    %c8_82 = arith.constant 8 : index
    %167 = memref.load %arg1[%c2_81, %c8_82] : memref<12x13xf32, #tpu.memory_space<smem>>
    %168 = vector.broadcast %167 : f32 to vector<8x128xf32>
    %169 = arith.mulf %168, %10 : vector<8x128xf32>
    %170 = arith.addf %166, %169 : vector<8x128xf32>
    %c2_83 = arith.constant 2 : index
    %c9_84 = arith.constant 9 : index
    %171 = memref.load %arg1[%c2_83, %c9_84] : memref<12x13xf32, #tpu.memory_space<smem>>
    %172 = vector.broadcast %171 : f32 to vector<8x128xf32>
    %173 = arith.mulf %172, %11 : vector<8x128xf32>
    %174 = arith.addf %170, %173 : vector<8x128xf32>
    %c2_85 = arith.constant 2 : index
    %c10_86 = arith.constant 10 : index
    %175 = memref.load %arg1[%c2_85, %c10_86] : memref<12x13xf32, #tpu.memory_space<smem>>
    %176 = vector.broadcast %175 : f32 to vector<8x128xf32>
    %177 = arith.mulf %176, %12 : vector<8x128xf32>
    %178 = arith.addf %174, %177 : vector<8x128xf32>
    %c2_87 = arith.constant 2 : index
    %c11_88 = arith.constant 11 : index
    %179 = memref.load %arg1[%c2_87, %c11_88] : memref<12x13xf32, #tpu.memory_space<smem>>
    %180 = vector.broadcast %179 : f32 to vector<8x128xf32>
    %181 = arith.mulf %180, %13 : vector<8x128xf32>
    %182 = arith.addf %178, %181 : vector<8x128xf32>
    %183 = arith.truncf %182 : vector<8x128xf32> to vector<8x128xbf16>
    %184 = arith.extf %183 : vector<8x128xbf16> to vector<8x128xf32>
    %185 = arith.subf %182, %184 : vector<8x128xf32>
    %186 = arith.truncf %185 : vector<8x128xf32> to vector<8x128xbf16>
    %cst_89 = arith.constant dense<0.000000e+00> : vector<8x256xf32>
    %187 = tpu.matmul %183, %0, %cst_89 {dimension_numbers = #tpu.dot_dimension_numbers<[1], [0], [0], [1], [0, 0, 1, 1], [], []>} : vector<8x128xbf16>, vector<128x256xbf16>, vector<8x256xf32> -> vector<8x256xf32>
    %cst_90 = arith.constant dense<0.000000e+00> : vector<8x256xf32>
    %188 = tpu.matmul %186, %0, %cst_90 {dimension_numbers = #tpu.dot_dimension_numbers<[1], [0], [0], [1], [0, 0, 1, 1], [], []>} : vector<8x128xbf16>, vector<128x256xbf16>, vector<8x256xf32> -> vector<8x256xf32>
    %189 = arith.addf %187, %188 : vector<8x256xf32>
    %cst_91 = arith.constant dense<0.000000e+00> : vector<8x256xf32>
    %190 = tpu.matmul %183, %1, %cst_91 {dimension_numbers = #tpu.dot_dimension_numbers<[1], [0], [0], [1], [0, 0, 1, 1], [], []>} : vector<8x128xbf16>, vector<128x256xbf16>, vector<8x256xf32> -> vector<8x256xf32>
    %191 = arith.addf %189, %190 : vector<8x256xf32>
    %192 = vector.extract_strided_slice %191 {offsets = [0, 0], sizes = [8, 128], strides = [1, 1]} : vector<8x256xf32> to vector<8x128xf32>
    %c2_92 = arith.constant 2 : index
    %c12_93 = arith.constant 12 : index
    %193 = memref.load %arg1[%c2_92, %c12_93] : memref<12x13xf32, #tpu.memory_space<smem>>
    %194 = vector.broadcast %193 : f32 to vector<8x128xf32>
    %195 = arith.addf %192, %194 : vector<8x128xf32>
    %196 = vector.extract_strided_slice %191 {offsets = [0, 128], sizes = [8, 128], strides = [1, 1]} : vector<8x256xf32> to vector<8x128xf32>
    %c3_94 = arith.constant 3 : index
    %c0_95 = arith.constant 0 : index
    %197 = memref.load %arg1[%c3_94, %c0_95] : memref<12x13xf32, #tpu.memory_space<smem>>
    %198 = vector.broadcast %197 : f32 to vector<8x128xf32>
    %199 = arith.mulf %198, %2 : vector<8x128xf32>
    %c3_96 = arith.constant 3 : index
    %c1_97 = arith.constant 1 : index
    %200 = memref.load %arg1[%c3_96, %c1_97] : memref<12x13xf32, #tpu.memory_space<smem>>
    %201 = vector.broadcast %200 : f32 to vector<8x128xf32>
    %202 = arith.mulf %201, %3 : vector<8x128xf32>
    %203 = arith.addf %199, %202 : vector<8x128xf32>
    %c3_98 = arith.constant 3 : index
    %c2_99 = arith.constant 2 : index
    %204 = memref.load %arg1[%c3_98, %c2_99] : memref<12x13xf32, #tpu.memory_space<smem>>
    %205 = vector.broadcast %204 : f32 to vector<8x128xf32>
    %206 = arith.mulf %205, %4 : vector<8x128xf32>
    %207 = arith.addf %203, %206 : vector<8x128xf32>
    %c3_100 = arith.constant 3 : index
    %c3_101 = arith.constant 3 : index
    %208 = memref.load %arg1[%c3_100, %c3_101] : memref<12x13xf32, #tpu.memory_space<smem>>
    %209 = vector.broadcast %208 : f32 to vector<8x128xf32>
    %210 = arith.mulf %209, %5 : vector<8x128xf32>
    %211 = arith.addf %207, %210 : vector<8x128xf32>
    %c3_102 = arith.constant 3 : index
    %c4_103 = arith.constant 4 : index
    %212 = memref.load %arg1[%c3_102, %c4_103] : memref<12x13xf32, #tpu.memory_space<smem>>
    %213 = vector.broadcast %212 : f32 to vector<8x128xf32>
    %214 = arith.mulf %213, %6 : vector<8x128xf32>
    %215 = arith.addf %211, %214 : vector<8x128xf32>
    %c3_104 = arith.constant 3 : index
    %c5_105 = arith.constant 5 : index
    %216 = memref.load %arg1[%c3_104, %c5_105] : memref<12x13xf32, #tpu.memory_space<smem>>
    %217 = vector.broadcast %216 : f32 to vector<8x128xf32>
    %218 = arith.mulf %217, %7 : vector<8x128xf32>
    %219 = arith.addf %215, %218 : vector<8x128xf32>
    %c3_106 = arith.constant 3 : index
    %c6_107 = arith.constant 6 : index
    %220 = memref.load %arg1[%c3_106, %c6_107] : memref<12x13xf32, #tpu.memory_space<smem>>
    %221 = vector.broadcast %220 : f32 to vector<8x128xf32>
    %222 = arith.mulf %221, %8 : vector<8x128xf32>
    %223 = arith.addf %219, %222 : vector<8x128xf32>
    %c3_108 = arith.constant 3 : index
    %c7_109 = arith.constant 7 : index
    %224 = memref.load %arg1[%c3_108, %c7_109] : memref<12x13xf32, #tpu.memory_space<smem>>
    %225 = vector.broadcast %224 : f32 to vector<8x128xf32>
    %226 = arith.mulf %225, %9 : vector<8x128xf32>
    %227 = arith.addf %223, %226 : vector<8x128xf32>
    %c3_110 = arith.constant 3 : index
    %c8_111 = arith.constant 8 : index
    %228 = memref.load %arg1[%c3_110, %c8_111] : memref<12x13xf32, #tpu.memory_space<smem>>
    %229 = vector.broadcast %228 : f32 to vector<8x128xf32>
    %230 = arith.mulf %229, %10 : vector<8x128xf32>
    %231 = arith.addf %227, %230 : vector<8x128xf32>
    %c3_112 = arith.constant 3 : index
    %c9_113 = arith.constant 9 : index
    %232 = memref.load %arg1[%c3_112, %c9_113] : memref<12x13xf32, #tpu.memory_space<smem>>
    %233 = vector.broadcast %232 : f32 to vector<8x128xf32>
    %234 = arith.mulf %233, %11 : vector<8x128xf32>
    %235 = arith.addf %231, %234 : vector<8x128xf32>
    %c3_114 = arith.constant 3 : index
    %c10_115 = arith.constant 10 : index
    %236 = memref.load %arg1[%c3_114, %c10_115] : memref<12x13xf32, #tpu.memory_space<smem>>
    %237 = vector.broadcast %236 : f32 to vector<8x128xf32>
    %238 = arith.mulf %237, %12 : vector<8x128xf32>
    %239 = arith.addf %235, %238 : vector<8x128xf32>
    %c3_116 = arith.constant 3 : index
    %c11_117 = arith.constant 11 : index
    %240 = memref.load %arg1[%c3_116, %c11_117] : memref<12x13xf32, #tpu.memory_space<smem>>
    %241 = vector.broadcast %240 : f32 to vector<8x128xf32>
    %242 = arith.mulf %241, %13 : vector<8x128xf32>
    %243 = arith.addf %239, %242 : vector<8x128xf32>
    %244 = arith.truncf %243 : vector<8x128xf32> to vector<8x128xbf16>
    %245 = arith.extf %244 : vector<8x128xbf16> to vector<8x128xf32>
    %246 = arith.subf %243, %245 : vector<8x128xf32>
    %247 = arith.truncf %246 : vector<8x128xf32> to vector<8x128xbf16>
    %cst_118 = arith.constant dense<0.000000e+00> : vector<8x256xf32>
    %248 = tpu.matmul %244, %0, %cst_118 {dimension_numbers = #tpu.dot_dimension_numbers<[1], [0], [0], [1], [0, 0, 1, 1], [], []>} : vector<8x128xbf16>, vector<128x256xbf16>, vector<8x256xf32> -> vector<8x256xf32>
    %cst_119 = arith.constant dense<0.000000e+00> : vector<8x256xf32>
    %249 = tpu.matmul %247, %0, %cst_119 {dimension_numbers = #tpu.dot_dimension_numbers<[1], [0], [0], [1], [0, 0, 1, 1], [], []>} : vector<8x128xbf16>, vector<128x256xbf16>, vector<8x256xf32> -> vector<8x256xf32>
    %250 = arith.addf %248, %249 : vector<8x256xf32>
    %cst_120 = arith.constant dense<0.000000e+00> : vector<8x256xf32>
    %251 = tpu.matmul %244, %1, %cst_120 {dimension_numbers = #tpu.dot_dimension_numbers<[1], [0], [0], [1], [0, 0, 1, 1], [], []>} : vector<8x128xbf16>, vector<128x256xbf16>, vector<8x256xf32> -> vector<8x256xf32>
    %252 = arith.addf %250, %251 : vector<8x256xf32>
    %253 = vector.extract_strided_slice %252 {offsets = [0, 0], sizes = [8, 128], strides = [1, 1]} : vector<8x256xf32> to vector<8x128xf32>
    %c3_121 = arith.constant 3 : index
    %c12_122 = arith.constant 12 : index
    %254 = memref.load %arg1[%c3_121, %c12_122] : memref<12x13xf32, #tpu.memory_space<smem>>
    %255 = vector.broadcast %254 : f32 to vector<8x128xf32>
    %256 = arith.addf %253, %255 : vector<8x128xf32>
    %257 = vector.extract_strided_slice %252 {offsets = [0, 128], sizes = [8, 128], strides = [1, 1]} : vector<8x256xf32> to vector<8x128xf32>
    %c4_123 = arith.constant 4 : index
    %c0_124 = arith.constant 0 : index
    %258 = memref.load %arg1[%c4_123, %c0_124] : memref<12x13xf32, #tpu.memory_space<smem>>
    %259 = vector.broadcast %258 : f32 to vector<8x128xf32>
    %260 = arith.mulf %259, %2 : vector<8x128xf32>
    %c4_125 = arith.constant 4 : index
    %c1_126 = arith.constant 1 : index
    %261 = memref.load %arg1[%c4_125, %c1_126] : memref<12x13xf32, #tpu.memory_space<smem>>
    %262 = vector.broadcast %261 : f32 to vector<8x128xf32>
    %263 = arith.mulf %262, %3 : vector<8x128xf32>
    %264 = arith.addf %260, %263 : vector<8x128xf32>
    %c4_127 = arith.constant 4 : index
    %c2_128 = arith.constant 2 : index
    %265 = memref.load %arg1[%c4_127, %c2_128] : memref<12x13xf32, #tpu.memory_space<smem>>
    %266 = vector.broadcast %265 : f32 to vector<8x128xf32>
    %267 = arith.mulf %266, %4 : vector<8x128xf32>
    %268 = arith.addf %264, %267 : vector<8x128xf32>
    %c4_129 = arith.constant 4 : index
    %c3_130 = arith.constant 3 : index
    %269 = memref.load %arg1[%c4_129, %c3_130] : memref<12x13xf32, #tpu.memory_space<smem>>
    %270 = vector.broadcast %269 : f32 to vector<8x128xf32>
    %271 = arith.mulf %270, %5 : vector<8x128xf32>
    %272 = arith.addf %268, %271 : vector<8x128xf32>
    %c4_131 = arith.constant 4 : index
    %c4_132 = arith.constant 4 : index
    %273 = memref.load %arg1[%c4_131, %c4_132] : memref<12x13xf32, #tpu.memory_space<smem>>
    %274 = vector.broadcast %273 : f32 to vector<8x128xf32>
    %275 = arith.mulf %274, %6 : vector<8x128xf32>
    %276 = arith.addf %272, %275 : vector<8x128xf32>
    %c4_133 = arith.constant 4 : index
    %c5_134 = arith.constant 5 : index
    %277 = memref.load %arg1[%c4_133, %c5_134] : memref<12x13xf32, #tpu.memory_space<smem>>
    %278 = vector.broadcast %277 : f32 to vector<8x128xf32>
    %279 = arith.mulf %278, %7 : vector<8x128xf32>
    %280 = arith.addf %276, %279 : vector<8x128xf32>
    %c4_135 = arith.constant 4 : index
    %c6_136 = arith.constant 6 : index
    %281 = memref.load %arg1[%c4_135, %c6_136] : memref<12x13xf32, #tpu.memory_space<smem>>
    %282 = vector.broadcast %281 : f32 to vector<8x128xf32>
    %283 = arith.mulf %282, %8 : vector<8x128xf32>
    %284 = arith.addf %280, %283 : vector<8x128xf32>
    %c4_137 = arith.constant 4 : index
    %c7_138 = arith.constant 7 : index
    %285 = memref.load %arg1[%c4_137, %c7_138] : memref<12x13xf32, #tpu.memory_space<smem>>
    %286 = vector.broadcast %285 : f32 to vector<8x128xf32>
    %287 = arith.mulf %286, %9 : vector<8x128xf32>
    %288 = arith.addf %284, %287 : vector<8x128xf32>
    %c4_139 = arith.constant 4 : index
    %c8_140 = arith.constant 8 : index
    %289 = memref.load %arg1[%c4_139, %c8_140] : memref<12x13xf32, #tpu.memory_space<smem>>
    %290 = vector.broadcast %289 : f32 to vector<8x128xf32>
    %291 = arith.mulf %290, %10 : vector<8x128xf32>
    %292 = arith.addf %288, %291 : vector<8x128xf32>
    %c4_141 = arith.constant 4 : index
    %c9_142 = arith.constant 9 : index
    %293 = memref.load %arg1[%c4_141, %c9_142] : memref<12x13xf32, #tpu.memory_space<smem>>
    %294 = vector.broadcast %293 : f32 to vector<8x128xf32>
    %295 = arith.mulf %294, %11 : vector<8x128xf32>
    %296 = arith.addf %292, %295 : vector<8x128xf32>
    %c4_143 = arith.constant 4 : index
    %c10_144 = arith.constant 10 : index
    %297 = memref.load %arg1[%c4_143, %c10_144] : memref<12x13xf32, #tpu.memory_space<smem>>
    %298 = vector.broadcast %297 : f32 to vector<8x128xf32>
    %299 = arith.mulf %298, %12 : vector<8x128xf32>
    %300 = arith.addf %296, %299 : vector<8x128xf32>
    %c4_145 = arith.constant 4 : index
    %c11_146 = arith.constant 11 : index
    %301 = memref.load %arg1[%c4_145, %c11_146] : memref<12x13xf32, #tpu.memory_space<smem>>
    %302 = vector.broadcast %301 : f32 to vector<8x128xf32>
    %303 = arith.mulf %302, %13 : vector<8x128xf32>
    %304 = arith.addf %300, %303 : vector<8x128xf32>
    %305 = arith.truncf %304 : vector<8x128xf32> to vector<8x128xbf16>
    %306 = arith.extf %305 : vector<8x128xbf16> to vector<8x128xf32>
    %307 = arith.subf %304, %306 : vector<8x128xf32>
    %308 = arith.truncf %307 : vector<8x128xf32> to vector<8x128xbf16>
    %cst_147 = arith.constant dense<0.000000e+00> : vector<8x256xf32>
    %309 = tpu.matmul %305, %0, %cst_147 {dimension_numbers = #tpu.dot_dimension_numbers<[1], [0], [0], [1], [0, 0, 1, 1], [], []>} : vector<8x128xbf16>, vector<128x256xbf16>, vector<8x256xf32> -> vector<8x256xf32>
    %cst_148 = arith.constant dense<0.000000e+00> : vector<8x256xf32>
    %310 = tpu.matmul %308, %0, %cst_148 {dimension_numbers = #tpu.dot_dimension_numbers<[1], [0], [0], [1], [0, 0, 1, 1], [], []>} : vector<8x128xbf16>, vector<128x256xbf16>, vector<8x256xf32> -> vector<8x256xf32>
    %311 = arith.addf %309, %310 : vector<8x256xf32>
    %cst_149 = arith.constant dense<0.000000e+00> : vector<8x256xf32>
    %312 = tpu.matmul %305, %1, %cst_149 {dimension_numbers = #tpu.dot_dimension_numbers<[1], [0], [0], [1], [0, 0, 1, 1], [], []>} : vector<8x128xbf16>, vector<128x256xbf16>, vector<8x256xf32> -> vector<8x256xf32>
    %313 = arith.addf %311, %312 : vector<8x256xf32>
    %314 = vector.extract_strided_slice %313 {offsets = [0, 0], sizes = [8, 128], strides = [1, 1]} : vector<8x256xf32> to vector<8x128xf32>
    %c4_150 = arith.constant 4 : index
    %c12_151 = arith.constant 12 : index
    %315 = memref.load %arg1[%c4_150, %c12_151] : memref<12x13xf32, #tpu.memory_space<smem>>
    %316 = vector.broadcast %315 : f32 to vector<8x128xf32>
    %317 = arith.addf %314, %316 : vector<8x128xf32>
    %318 = vector.extract_strided_slice %313 {offsets = [0, 128], sizes = [8, 128], strides = [1, 1]} : vector<8x256xf32> to vector<8x128xf32>
    %c5_152 = arith.constant 5 : index
    %c0_153 = arith.constant 0 : index
    %319 = memref.load %arg1[%c5_152, %c0_153] : memref<12x13xf32, #tpu.memory_space<smem>>
    %320 = vector.broadcast %319 : f32 to vector<8x128xf32>
    %321 = arith.mulf %320, %2 : vector<8x128xf32>
    %c5_154 = arith.constant 5 : index
    %c1_155 = arith.constant 1 : index
    %322 = memref.load %arg1[%c5_154, %c1_155] : memref<12x13xf32, #tpu.memory_space<smem>>
    %323 = vector.broadcast %322 : f32 to vector<8x128xf32>
    %324 = arith.mulf %323, %3 : vector<8x128xf32>
    %325 = arith.addf %321, %324 : vector<8x128xf32>
    %c5_156 = arith.constant 5 : index
    %c2_157 = arith.constant 2 : index
    %326 = memref.load %arg1[%c5_156, %c2_157] : memref<12x13xf32, #tpu.memory_space<smem>>
    %327 = vector.broadcast %326 : f32 to vector<8x128xf32>
    %328 = arith.mulf %327, %4 : vector<8x128xf32>
    %329 = arith.addf %325, %328 : vector<8x128xf32>
    %c5_158 = arith.constant 5 : index
    %c3_159 = arith.constant 3 : index
    %330 = memref.load %arg1[%c5_158, %c3_159] : memref<12x13xf32, #tpu.memory_space<smem>>
    %331 = vector.broadcast %330 : f32 to vector<8x128xf32>
    %332 = arith.mulf %331, %5 : vector<8x128xf32>
    %333 = arith.addf %329, %332 : vector<8x128xf32>
    %c5_160 = arith.constant 5 : index
    %c4_161 = arith.constant 4 : index
    %334 = memref.load %arg1[%c5_160, %c4_161] : memref<12x13xf32, #tpu.memory_space<smem>>
    %335 = vector.broadcast %334 : f32 to vector<8x128xf32>
    %336 = arith.mulf %335, %6 : vector<8x128xf32>
    %337 = arith.addf %333, %336 : vector<8x128xf32>
    %c5_162 = arith.constant 5 : index
    %c5_163 = arith.constant 5 : index
    %338 = memref.load %arg1[%c5_162, %c5_163] : memref<12x13xf32, #tpu.memory_space<smem>>
    %339 = vector.broadcast %338 : f32 to vector<8x128xf32>
    %340 = arith.mulf %339, %7 : vector<8x128xf32>
    %341 = arith.addf %337, %340 : vector<8x128xf32>
    %c5_164 = arith.constant 5 : index
    %c6_165 = arith.constant 6 : index
    %342 = memref.load %arg1[%c5_164, %c6_165] : memref<12x13xf32, #tpu.memory_space<smem>>
    %343 = vector.broadcast %342 : f32 to vector<8x128xf32>
    %344 = arith.mulf %343, %8 : vector<8x128xf32>
    %345 = arith.addf %341, %344 : vector<8x128xf32>
    %c5_166 = arith.constant 5 : index
    %c7_167 = arith.constant 7 : index
    %346 = memref.load %arg1[%c5_166, %c7_167] : memref<12x13xf32, #tpu.memory_space<smem>>
    %347 = vector.broadcast %346 : f32 to vector<8x128xf32>
    %348 = arith.mulf %347, %9 : vector<8x128xf32>
    %349 = arith.addf %345, %348 : vector<8x128xf32>
    %c5_168 = arith.constant 5 : index
    %c8_169 = arith.constant 8 : index
    %350 = memref.load %arg1[%c5_168, %c8_169] : memref<12x13xf32, #tpu.memory_space<smem>>
    %351 = vector.broadcast %350 : f32 to vector<8x128xf32>
    %352 = arith.mulf %351, %10 : vector<8x128xf32>
    %353 = arith.addf %349, %352 : vector<8x128xf32>
    %c5_170 = arith.constant 5 : index
    %c9_171 = arith.constant 9 : index
    %354 = memref.load %arg1[%c5_170, %c9_171] : memref<12x13xf32, #tpu.memory_space<smem>>
    %355 = vector.broadcast %354 : f32 to vector<8x128xf32>
    %356 = arith.mulf %355, %11 : vector<8x128xf32>
    %357 = arith.addf %353, %356 : vector<8x128xf32>
    %c5_172 = arith.constant 5 : index
    %c10_173 = arith.constant 10 : index
    %358 = memref.load %arg1[%c5_172, %c10_173] : memref<12x13xf32, #tpu.memory_space<smem>>
    %359 = vector.broadcast %358 : f32 to vector<8x128xf32>
    %360 = arith.mulf %359, %12 : vector<8x128xf32>
    %361 = arith.addf %357, %360 : vector<8x128xf32>
    %c5_174 = arith.constant 5 : index
    %c11_175 = arith.constant 11 : index
    %362 = memref.load %arg1[%c5_174, %c11_175] : memref<12x13xf32, #tpu.memory_space<smem>>
    %363 = vector.broadcast %362 : f32 to vector<8x128xf32>
    %364 = arith.mulf %363, %13 : vector<8x128xf32>
    %365 = arith.addf %361, %364 : vector<8x128xf32>
    %366 = arith.truncf %365 : vector<8x128xf32> to vector<8x128xbf16>
    %367 = arith.extf %366 : vector<8x128xbf16> to vector<8x128xf32>
    %368 = arith.subf %365, %367 : vector<8x128xf32>
    %369 = arith.truncf %368 : vector<8x128xf32> to vector<8x128xbf16>
    %cst_176 = arith.constant dense<0.000000e+00> : vector<8x256xf32>
    %370 = tpu.matmul %366, %0, %cst_176 {dimension_numbers = #tpu.dot_dimension_numbers<[1], [0], [0], [1], [0, 0, 1, 1], [], []>} : vector<8x128xbf16>, vector<128x256xbf16>, vector<8x256xf32> -> vector<8x256xf32>
    %cst_177 = arith.constant dense<0.000000e+00> : vector<8x256xf32>
    %371 = tpu.matmul %369, %0, %cst_177 {dimension_numbers = #tpu.dot_dimension_numbers<[1], [0], [0], [1], [0, 0, 1, 1], [], []>} : vector<8x128xbf16>, vector<128x256xbf16>, vector<8x256xf32> -> vector<8x256xf32>
    %372 = arith.addf %370, %371 : vector<8x256xf32>
    %cst_178 = arith.constant dense<0.000000e+00> : vector<8x256xf32>
    %373 = tpu.matmul %366, %1, %cst_178 {dimension_numbers = #tpu.dot_dimension_numbers<[1], [0], [0], [1], [0, 0, 1, 1], [], []>} : vector<8x128xbf16>, vector<128x256xbf16>, vector<8x256xf32> -> vector<8x256xf32>
    %374 = arith.addf %372, %373 : vector<8x256xf32>
    %375 = vector.extract_strided_slice %374 {offsets = [0, 0], sizes = [8, 128], strides = [1, 1]} : vector<8x256xf32> to vector<8x128xf32>
    %c5_179 = arith.constant 5 : index
    %c12_180 = arith.constant 12 : index
    %376 = memref.load %arg1[%c5_179, %c12_180] : memref<12x13xf32, #tpu.memory_space<smem>>
    %377 = vector.broadcast %376 : f32 to vector<8x128xf32>
    %378 = arith.addf %375, %377 : vector<8x128xf32>
    %379 = vector.extract_strided_slice %374 {offsets = [0, 128], sizes = [8, 128], strides = [1, 1]} : vector<8x256xf32> to vector<8x128xf32>
    %380 = arith.mulf %73, %134 : vector<8x128xf32>
    %381 = arith.mulf %74, %135 : vector<8x128xf32>
    %382 = arith.subf %380, %381 : vector<8x128xf32>
    %383 = arith.mulf %73, %135 : vector<8x128xf32>
    %384 = arith.mulf %74, %134 : vector<8x128xf32>
    %385 = arith.addf %383, %384 : vector<8x128xf32>
    %386 = arith.mulf %195, %256 : vector<8x128xf32>
    %387 = arith.mulf %196, %257 : vector<8x128xf32>
    %388 = arith.subf %386, %387 : vector<8x128xf32>
    %389 = arith.mulf %195, %257 : vector<8x128xf32>
    %390 = arith.mulf %196, %256 : vector<8x128xf32>
    %391 = arith.addf %389, %390 : vector<8x128xf32>
    %392 = arith.mulf %317, %378 : vector<8x128xf32>
    %393 = arith.mulf %318, %379 : vector<8x128xf32>
    %394 = arith.subf %392, %393 : vector<8x128xf32>
    %395 = arith.mulf %317, %379 : vector<8x128xf32>
    %396 = arith.mulf %318, %378 : vector<8x128xf32>
    %397 = arith.addf %395, %396 : vector<8x128xf32>
    %398 = arith.mulf %382, %388 : vector<8x128xf32>
    %399 = arith.mulf %385, %391 : vector<8x128xf32>
    %400 = arith.subf %398, %399 : vector<8x128xf32>
    %401 = arith.mulf %382, %391 : vector<8x128xf32>
    %402 = arith.mulf %385, %388 : vector<8x128xf32>
    %403 = arith.addf %401, %402 : vector<8x128xf32>
    %404 = arith.mulf %400, %394 : vector<8x128xf32>
    %405 = arith.mulf %403, %397 : vector<8x128xf32>
    %406 = arith.subf %404, %405 : vector<8x128xf32>
    %407 = arith.mulf %400, %397 : vector<8x128xf32>
    %408 = arith.mulf %403, %394 : vector<8x128xf32>
    %409 = arith.addf %407, %408 : vector<8x128xf32>
    %c6_181 = arith.constant 6 : index
    %c0_182 = arith.constant 0 : index
    %410 = memref.load %arg1[%c6_181, %c0_182] : memref<12x13xf32, #tpu.memory_space<smem>>
    %411 = vector.broadcast %410 : f32 to vector<8x128xf32>
    %412 = arith.mulf %411, %2 : vector<8x128xf32>
    %c6_183 = arith.constant 6 : index
    %c1_184 = arith.constant 1 : index
    %413 = memref.load %arg1[%c6_183, %c1_184] : memref<12x13xf32, #tpu.memory_space<smem>>
    %414 = vector.broadcast %413 : f32 to vector<8x128xf32>
    %415 = arith.mulf %414, %3 : vector<8x128xf32>
    %416 = arith.addf %412, %415 : vector<8x128xf32>
    %c6_185 = arith.constant 6 : index
    %c2_186 = arith.constant 2 : index
    %417 = memref.load %arg1[%c6_185, %c2_186] : memref<12x13xf32, #tpu.memory_space<smem>>
    %418 = vector.broadcast %417 : f32 to vector<8x128xf32>
    %419 = arith.mulf %418, %4 : vector<8x128xf32>
    %420 = arith.addf %416, %419 : vector<8x128xf32>
    %c6_187 = arith.constant 6 : index
    %c3_188 = arith.constant 3 : index
    %421 = memref.load %arg1[%c6_187, %c3_188] : memref<12x13xf32, #tpu.memory_space<smem>>
    %422 = vector.broadcast %421 : f32 to vector<8x128xf32>
    %423 = arith.mulf %422, %5 : vector<8x128xf32>
    %424 = arith.addf %420, %423 : vector<8x128xf32>
    %c6_189 = arith.constant 6 : index
    %c4_190 = arith.constant 4 : index
    %425 = memref.load %arg1[%c6_189, %c4_190] : memref<12x13xf32, #tpu.memory_space<smem>>
    %426 = vector.broadcast %425 : f32 to vector<8x128xf32>
    %427 = arith.mulf %426, %6 : vector<8x128xf32>
    %428 = arith.addf %424, %427 : vector<8x128xf32>
    %c6_191 = arith.constant 6 : index
    %c5_192 = arith.constant 5 : index
    %429 = memref.load %arg1[%c6_191, %c5_192] : memref<12x13xf32, #tpu.memory_space<smem>>
    %430 = vector.broadcast %429 : f32 to vector<8x128xf32>
    %431 = arith.mulf %430, %7 : vector<8x128xf32>
    %432 = arith.addf %428, %431 : vector<8x128xf32>
    %c6_193 = arith.constant 6 : index
    %c6_194 = arith.constant 6 : index
    %433 = memref.load %arg1[%c6_193, %c6_194] : memref<12x13xf32, #tpu.memory_space<smem>>
    %434 = vector.broadcast %433 : f32 to vector<8x128xf32>
    %435 = arith.mulf %434, %8 : vector<8x128xf32>
    %436 = arith.addf %432, %435 : vector<8x128xf32>
    %c6_195 = arith.constant 6 : index
    %c7_196 = arith.constant 7 : index
    %437 = memref.load %arg1[%c6_195, %c7_196] : memref<12x13xf32, #tpu.memory_space<smem>>
    %438 = vector.broadcast %437 : f32 to vector<8x128xf32>
    %439 = arith.mulf %438, %9 : vector<8x128xf32>
    %440 = arith.addf %436, %439 : vector<8x128xf32>
    %c6_197 = arith.constant 6 : index
    %c8_198 = arith.constant 8 : index
    %441 = memref.load %arg1[%c6_197, %c8_198] : memref<12x13xf32, #tpu.memory_space<smem>>
    %442 = vector.broadcast %441 : f32 to vector<8x128xf32>
    %443 = arith.mulf %442, %10 : vector<8x128xf32>
    %444 = arith.addf %440, %443 : vector<8x128xf32>
    %c6_199 = arith.constant 6 : index
    %c9_200 = arith.constant 9 : index
    %445 = memref.load %arg1[%c6_199, %c9_200] : memref<12x13xf32, #tpu.memory_space<smem>>
    %446 = vector.broadcast %445 : f32 to vector<8x128xf32>
    %447 = arith.mulf %446, %11 : vector<8x128xf32>
    %448 = arith.addf %444, %447 : vector<8x128xf32>
    %c6_201 = arith.constant 6 : index
    %c10_202 = arith.constant 10 : index
    %449 = memref.load %arg1[%c6_201, %c10_202] : memref<12x13xf32, #tpu.memory_space<smem>>
    %450 = vector.broadcast %449 : f32 to vector<8x128xf32>
    %451 = arith.mulf %450, %12 : vector<8x128xf32>
    %452 = arith.addf %448, %451 : vector<8x128xf32>
    %c6_203 = arith.constant 6 : index
    %c11_204 = arith.constant 11 : index
    %453 = memref.load %arg1[%c6_203, %c11_204] : memref<12x13xf32, #tpu.memory_space<smem>>
    %454 = vector.broadcast %453 : f32 to vector<8x128xf32>
    %455 = arith.mulf %454, %13 : vector<8x128xf32>
    %456 = arith.addf %452, %455 : vector<8x128xf32>
    %457 = arith.truncf %456 : vector<8x128xf32> to vector<8x128xbf16>
    %458 = arith.extf %457 : vector<8x128xbf16> to vector<8x128xf32>
    %459 = arith.subf %456, %458 : vector<8x128xf32>
    %460 = arith.truncf %459 : vector<8x128xf32> to vector<8x128xbf16>
    %cst_205 = arith.constant dense<0.000000e+00> : vector<8x256xf32>
    %461 = tpu.matmul %457, %0, %cst_205 {dimension_numbers = #tpu.dot_dimension_numbers<[1], [0], [0], [1], [0, 0, 1, 1], [], []>} : vector<8x128xbf16>, vector<128x256xbf16>, vector<8x256xf32> -> vector<8x256xf32>
    %cst_206 = arith.constant dense<0.000000e+00> : vector<8x256xf32>
    %462 = tpu.matmul %460, %0, %cst_206 {dimension_numbers = #tpu.dot_dimension_numbers<[1], [0], [0], [1], [0, 0, 1, 1], [], []>} : vector<8x128xbf16>, vector<128x256xbf16>, vector<8x256xf32> -> vector<8x256xf32>
    %463 = arith.addf %461, %462 : vector<8x256xf32>
    %cst_207 = arith.constant dense<0.000000e+00> : vector<8x256xf32>
    %464 = tpu.matmul %457, %1, %cst_207 {dimension_numbers = #tpu.dot_dimension_numbers<[1], [0], [0], [1], [0, 0, 1, 1], [], []>} : vector<8x128xbf16>, vector<128x256xbf16>, vector<8x256xf32> -> vector<8x256xf32>
    %465 = arith.addf %463, %464 : vector<8x256xf32>
    %466 = vector.extract_strided_slice %465 {offsets = [0, 0], sizes = [8, 128], strides = [1, 1]} : vector<8x256xf32> to vector<8x128xf32>
    %c6_208 = arith.constant 6 : index
    %c12_209 = arith.constant 12 : index
    %467 = memref.load %arg1[%c6_208, %c12_209] : memref<12x13xf32, #tpu.memory_space<smem>>
    %468 = vector.broadcast %467 : f32 to vector<8x128xf32>
    %469 = arith.addf %466, %468 : vector<8x128xf32>
    %470 = vector.extract_strided_slice %465 {offsets = [0, 128], sizes = [8, 128], strides = [1, 1]} : vector<8x256xf32> to vector<8x128xf32>
    %c7_210 = arith.constant 7 : index
    %c0_211 = arith.constant 0 : index
    %471 = memref.load %arg1[%c7_210, %c0_211] : memref<12x13xf32, #tpu.memory_space<smem>>
    %472 = vector.broadcast %471 : f32 to vector<8x128xf32>
    %473 = arith.mulf %472, %2 : vector<8x128xf32>
    %c7_212 = arith.constant 7 : index
    %c1_213 = arith.constant 1 : index
    %474 = memref.load %arg1[%c7_212, %c1_213] : memref<12x13xf32, #tpu.memory_space<smem>>
    %475 = vector.broadcast %474 : f32 to vector<8x128xf32>
    %476 = arith.mulf %475, %3 : vector<8x128xf32>
    %477 = arith.addf %473, %476 : vector<8x128xf32>
    %c7_214 = arith.constant 7 : index
    %c2_215 = arith.constant 2 : index
    %478 = memref.load %arg1[%c7_214, %c2_215] : memref<12x13xf32, #tpu.memory_space<smem>>
    %479 = vector.broadcast %478 : f32 to vector<8x128xf32>
    %480 = arith.mulf %479, %4 : vector<8x128xf32>
    %481 = arith.addf %477, %480 : vector<8x128xf32>
    %c7_216 = arith.constant 7 : index
    %c3_217 = arith.constant 3 : index
    %482 = memref.load %arg1[%c7_216, %c3_217] : memref<12x13xf32, #tpu.memory_space<smem>>
    %483 = vector.broadcast %482 : f32 to vector<8x128xf32>
    %484 = arith.mulf %483, %5 : vector<8x128xf32>
    %485 = arith.addf %481, %484 : vector<8x128xf32>
    %c7_218 = arith.constant 7 : index
    %c4_219 = arith.constant 4 : index
    %486 = memref.load %arg1[%c7_218, %c4_219] : memref<12x13xf32, #tpu.memory_space<smem>>
    %487 = vector.broadcast %486 : f32 to vector<8x128xf32>
    %488 = arith.mulf %487, %6 : vector<8x128xf32>
    %489 = arith.addf %485, %488 : vector<8x128xf32>
    %c7_220 = arith.constant 7 : index
    %c5_221 = arith.constant 5 : index
    %490 = memref.load %arg1[%c7_220, %c5_221] : memref<12x13xf32, #tpu.memory_space<smem>>
    %491 = vector.broadcast %490 : f32 to vector<8x128xf32>
    %492 = arith.mulf %491, %7 : vector<8x128xf32>
    %493 = arith.addf %489, %492 : vector<8x128xf32>
    %c7_222 = arith.constant 7 : index
    %c6_223 = arith.constant 6 : index
    %494 = memref.load %arg1[%c7_222, %c6_223] : memref<12x13xf32, #tpu.memory_space<smem>>
    %495 = vector.broadcast %494 : f32 to vector<8x128xf32>
    %496 = arith.mulf %495, %8 : vector<8x128xf32>
    %497 = arith.addf %493, %496 : vector<8x128xf32>
    %c7_224 = arith.constant 7 : index
    %c7_225 = arith.constant 7 : index
    %498 = memref.load %arg1[%c7_224, %c7_225] : memref<12x13xf32, #tpu.memory_space<smem>>
    %499 = vector.broadcast %498 : f32 to vector<8x128xf32>
    %500 = arith.mulf %499, %9 : vector<8x128xf32>
    %501 = arith.addf %497, %500 : vector<8x128xf32>
    %c7_226 = arith.constant 7 : index
    %c8_227 = arith.constant 8 : index
    %502 = memref.load %arg1[%c7_226, %c8_227] : memref<12x13xf32, #tpu.memory_space<smem>>
    %503 = vector.broadcast %502 : f32 to vector<8x128xf32>
    %504 = arith.mulf %503, %10 : vector<8x128xf32>
    %505 = arith.addf %501, %504 : vector<8x128xf32>
    %c7_228 = arith.constant 7 : index
    %c9_229 = arith.constant 9 : index
    %506 = memref.load %arg1[%c7_228, %c9_229] : memref<12x13xf32, #tpu.memory_space<smem>>
    %507 = vector.broadcast %506 : f32 to vector<8x128xf32>
    %508 = arith.mulf %507, %11 : vector<8x128xf32>
    %509 = arith.addf %505, %508 : vector<8x128xf32>
    %c7_230 = arith.constant 7 : index
    %c10_231 = arith.constant 10 : index
    %510 = memref.load %arg1[%c7_230, %c10_231] : memref<12x13xf32, #tpu.memory_space<smem>>
    %511 = vector.broadcast %510 : f32 to vector<8x128xf32>
    %512 = arith.mulf %511, %12 : vector<8x128xf32>
    %513 = arith.addf %509, %512 : vector<8x128xf32>
    %c7_232 = arith.constant 7 : index
    %c11_233 = arith.constant 11 : index
    %514 = memref.load %arg1[%c7_232, %c11_233] : memref<12x13xf32, #tpu.memory_space<smem>>
    %515 = vector.broadcast %514 : f32 to vector<8x128xf32>
    %516 = arith.mulf %515, %13 : vector<8x128xf32>
    %517 = arith.addf %513, %516 : vector<8x128xf32>
    %518 = arith.truncf %517 : vector<8x128xf32> to vector<8x128xbf16>
    %519 = arith.extf %518 : vector<8x128xbf16> to vector<8x128xf32>
    %520 = arith.subf %517, %519 : vector<8x128xf32>
    %521 = arith.truncf %520 : vector<8x128xf32> to vector<8x128xbf16>
    %cst_234 = arith.constant dense<0.000000e+00> : vector<8x256xf32>
    %522 = tpu.matmul %518, %0, %cst_234 {dimension_numbers = #tpu.dot_dimension_numbers<[1], [0], [0], [1], [0, 0, 1, 1], [], []>} : vector<8x128xbf16>, vector<128x256xbf16>, vector<8x256xf32> -> vector<8x256xf32>
    %cst_235 = arith.constant dense<0.000000e+00> : vector<8x256xf32>
    %523 = tpu.matmul %521, %0, %cst_235 {dimension_numbers = #tpu.dot_dimension_numbers<[1], [0], [0], [1], [0, 0, 1, 1], [], []>} : vector<8x128xbf16>, vector<128x256xbf16>, vector<8x256xf32> -> vector<8x256xf32>
    %524 = arith.addf %522, %523 : vector<8x256xf32>
    %cst_236 = arith.constant dense<0.000000e+00> : vector<8x256xf32>
    %525 = tpu.matmul %518, %1, %cst_236 {dimension_numbers = #tpu.dot_dimension_numbers<[1], [0], [0], [1], [0, 0, 1, 1], [], []>} : vector<8x128xbf16>, vector<128x256xbf16>, vector<8x256xf32> -> vector<8x256xf32>
    %526 = arith.addf %524, %525 : vector<8x256xf32>
    %527 = vector.extract_strided_slice %526 {offsets = [0, 0], sizes = [8, 128], strides = [1, 1]} : vector<8x256xf32> to vector<8x128xf32>
    %c7_237 = arith.constant 7 : index
    %c12_238 = arith.constant 12 : index
    %528 = memref.load %arg1[%c7_237, %c12_238] : memref<12x13xf32, #tpu.memory_space<smem>>
    %529 = vector.broadcast %528 : f32 to vector<8x128xf32>
    %530 = arith.addf %527, %529 : vector<8x128xf32>
    %531 = vector.extract_strided_slice %526 {offsets = [0, 128], sizes = [8, 128], strides = [1, 1]} : vector<8x256xf32> to vector<8x128xf32>
    %c8_239 = arith.constant 8 : index
    %c0_240 = arith.constant 0 : index
    %532 = memref.load %arg1[%c8_239, %c0_240] : memref<12x13xf32, #tpu.memory_space<smem>>
    %533 = vector.broadcast %532 : f32 to vector<8x128xf32>
    %534 = arith.mulf %533, %2 : vector<8x128xf32>
    %c8_241 = arith.constant 8 : index
    %c1_242 = arith.constant 1 : index
    %535 = memref.load %arg1[%c8_241, %c1_242] : memref<12x13xf32, #tpu.memory_space<smem>>
    %536 = vector.broadcast %535 : f32 to vector<8x128xf32>
    %537 = arith.mulf %536, %3 : vector<8x128xf32>
    %538 = arith.addf %534, %537 : vector<8x128xf32>
    %c8_243 = arith.constant 8 : index
    %c2_244 = arith.constant 2 : index
    %539 = memref.load %arg1[%c8_243, %c2_244] : memref<12x13xf32, #tpu.memory_space<smem>>
    %540 = vector.broadcast %539 : f32 to vector<8x128xf32>
    %541 = arith.mulf %540, %4 : vector<8x128xf32>
    %542 = arith.addf %538, %541 : vector<8x128xf32>
    %c8_245 = arith.constant 8 : index
    %c3_246 = arith.constant 3 : index
    %543 = memref.load %arg1[%c8_245, %c3_246] : memref<12x13xf32, #tpu.memory_space<smem>>
    %544 = vector.broadcast %543 : f32 to vector<8x128xf32>
    %545 = arith.mulf %544, %5 : vector<8x128xf32>
    %546 = arith.addf %542, %545 : vector<8x128xf32>
    %c8_247 = arith.constant 8 : index
    %c4_248 = arith.constant 4 : index
    %547 = memref.load %arg1[%c8_247, %c4_248] : memref<12x13xf32, #tpu.memory_space<smem>>
    %548 = vector.broadcast %547 : f32 to vector<8x128xf32>
    %549 = arith.mulf %548, %6 : vector<8x128xf32>
    %550 = arith.addf %546, %549 : vector<8x128xf32>
    %c8_249 = arith.constant 8 : index
    %c5_250 = arith.constant 5 : index
    %551 = memref.load %arg1[%c8_249, %c5_250] : memref<12x13xf32, #tpu.memory_space<smem>>
    %552 = vector.broadcast %551 : f32 to vector<8x128xf32>
    %553 = arith.mulf %552, %7 : vector<8x128xf32>
    %554 = arith.addf %550, %553 : vector<8x128xf32>
    %c8_251 = arith.constant 8 : index
    %c6_252 = arith.constant 6 : index
    %555 = memref.load %arg1[%c8_251, %c6_252] : memref<12x13xf32, #tpu.memory_space<smem>>
    %556 = vector.broadcast %555 : f32 to vector<8x128xf32>
    %557 = arith.mulf %556, %8 : vector<8x128xf32>
    %558 = arith.addf %554, %557 : vector<8x128xf32>
    %c8_253 = arith.constant 8 : index
    %c7_254 = arith.constant 7 : index
    %559 = memref.load %arg1[%c8_253, %c7_254] : memref<12x13xf32, #tpu.memory_space<smem>>
    %560 = vector.broadcast %559 : f32 to vector<8x128xf32>
    %561 = arith.mulf %560, %9 : vector<8x128xf32>
    %562 = arith.addf %558, %561 : vector<8x128xf32>
    %c8_255 = arith.constant 8 : index
    %c8_256 = arith.constant 8 : index
    %563 = memref.load %arg1[%c8_255, %c8_256] : memref<12x13xf32, #tpu.memory_space<smem>>
    %564 = vector.broadcast %563 : f32 to vector<8x128xf32>
    %565 = arith.mulf %564, %10 : vector<8x128xf32>
    %566 = arith.addf %562, %565 : vector<8x128xf32>
    %c8_257 = arith.constant 8 : index
    %c9_258 = arith.constant 9 : index
    %567 = memref.load %arg1[%c8_257, %c9_258] : memref<12x13xf32, #tpu.memory_space<smem>>
    %568 = vector.broadcast %567 : f32 to vector<8x128xf32>
    %569 = arith.mulf %568, %11 : vector<8x128xf32>
    %570 = arith.addf %566, %569 : vector<8x128xf32>
    %c8_259 = arith.constant 8 : index
    %c10_260 = arith.constant 10 : index
    %571 = memref.load %arg1[%c8_259, %c10_260] : memref<12x13xf32, #tpu.memory_space<smem>>
    %572 = vector.broadcast %571 : f32 to vector<8x128xf32>
    %573 = arith.mulf %572, %12 : vector<8x128xf32>
    %574 = arith.addf %570, %573 : vector<8x128xf32>
    %c8_261 = arith.constant 8 : index
    %c11_262 = arith.constant 11 : index
    %575 = memref.load %arg1[%c8_261, %c11_262] : memref<12x13xf32, #tpu.memory_space<smem>>
    %576 = vector.broadcast %575 : f32 to vector<8x128xf32>
    %577 = arith.mulf %576, %13 : vector<8x128xf32>
    %578 = arith.addf %574, %577 : vector<8x128xf32>
    %579 = arith.truncf %578 : vector<8x128xf32> to vector<8x128xbf16>
    %580 = arith.extf %579 : vector<8x128xbf16> to vector<8x128xf32>
    %581 = arith.subf %578, %580 : vector<8x128xf32>
    %582 = arith.truncf %581 : vector<8x128xf32> to vector<8x128xbf16>
    %cst_263 = arith.constant dense<0.000000e+00> : vector<8x256xf32>
    %583 = tpu.matmul %579, %0, %cst_263 {dimension_numbers = #tpu.dot_dimension_numbers<[1], [0], [0], [1], [0, 0, 1, 1], [], []>} : vector<8x128xbf16>, vector<128x256xbf16>, vector<8x256xf32> -> vector<8x256xf32>
    %cst_264 = arith.constant dense<0.000000e+00> : vector<8x256xf32>
    %584 = tpu.matmul %582, %0, %cst_264 {dimension_numbers = #tpu.dot_dimension_numbers<[1], [0], [0], [1], [0, 0, 1, 1], [], []>} : vector<8x128xbf16>, vector<128x256xbf16>, vector<8x256xf32> -> vector<8x256xf32>
    %585 = arith.addf %583, %584 : vector<8x256xf32>
    %cst_265 = arith.constant dense<0.000000e+00> : vector<8x256xf32>
    %586 = tpu.matmul %579, %1, %cst_265 {dimension_numbers = #tpu.dot_dimension_numbers<[1], [0], [0], [1], [0, 0, 1, 1], [], []>} : vector<8x128xbf16>, vector<128x256xbf16>, vector<8x256xf32> -> vector<8x256xf32>
    %587 = arith.addf %585, %586 : vector<8x256xf32>
    %588 = vector.extract_strided_slice %587 {offsets = [0, 0], sizes = [8, 128], strides = [1, 1]} : vector<8x256xf32> to vector<8x128xf32>
    %c8_266 = arith.constant 8 : index
    %c12_267 = arith.constant 12 : index
    %589 = memref.load %arg1[%c8_266, %c12_267] : memref<12x13xf32, #tpu.memory_space<smem>>
    %590 = vector.broadcast %589 : f32 to vector<8x128xf32>
    %591 = arith.addf %588, %590 : vector<8x128xf32>
    %592 = vector.extract_strided_slice %587 {offsets = [0, 128], sizes = [8, 128], strides = [1, 1]} : vector<8x256xf32> to vector<8x128xf32>
    %c9_268 = arith.constant 9 : index
    %c0_269 = arith.constant 0 : index
    %593 = memref.load %arg1[%c9_268, %c0_269] : memref<12x13xf32, #tpu.memory_space<smem>>
    %594 = vector.broadcast %593 : f32 to vector<8x128xf32>
    %595 = arith.mulf %594, %2 : vector<8x128xf32>
    %c9_270 = arith.constant 9 : index
    %c1_271 = arith.constant 1 : index
    %596 = memref.load %arg1[%c9_270, %c1_271] : memref<12x13xf32, #tpu.memory_space<smem>>
    %597 = vector.broadcast %596 : f32 to vector<8x128xf32>
    %598 = arith.mulf %597, %3 : vector<8x128xf32>
    %599 = arith.addf %595, %598 : vector<8x128xf32>
    %c9_272 = arith.constant 9 : index
    %c2_273 = arith.constant 2 : index
    %600 = memref.load %arg1[%c9_272, %c2_273] : memref<12x13xf32, #tpu.memory_space<smem>>
    %601 = vector.broadcast %600 : f32 to vector<8x128xf32>
    %602 = arith.mulf %601, %4 : vector<8x128xf32>
    %603 = arith.addf %599, %602 : vector<8x128xf32>
    %c9_274 = arith.constant 9 : index
    %c3_275 = arith.constant 3 : index
    %604 = memref.load %arg1[%c9_274, %c3_275] : memref<12x13xf32, #tpu.memory_space<smem>>
    %605 = vector.broadcast %604 : f32 to vector<8x128xf32>
    %606 = arith.mulf %605, %5 : vector<8x128xf32>
    %607 = arith.addf %603, %606 : vector<8x128xf32>
    %c9_276 = arith.constant 9 : index
    %c4_277 = arith.constant 4 : index
    %608 = memref.load %arg1[%c9_276, %c4_277] : memref<12x13xf32, #tpu.memory_space<smem>>
    %609 = vector.broadcast %608 : f32 to vector<8x128xf32>
    %610 = arith.mulf %609, %6 : vector<8x128xf32>
    %611 = arith.addf %607, %610 : vector<8x128xf32>
    %c9_278 = arith.constant 9 : index
    %c5_279 = arith.constant 5 : index
    %612 = memref.load %arg1[%c9_278, %c5_279] : memref<12x13xf32, #tpu.memory_space<smem>>
    %613 = vector.broadcast %612 : f32 to vector<8x128xf32>
    %614 = arith.mulf %613, %7 : vector<8x128xf32>
    %615 = arith.addf %611, %614 : vector<8x128xf32>
    %c9_280 = arith.constant 9 : index
    %c6_281 = arith.constant 6 : index
    %616 = memref.load %arg1[%c9_280, %c6_281] : memref<12x13xf32, #tpu.memory_space<smem>>
    %617 = vector.broadcast %616 : f32 to vector<8x128xf32>
    %618 = arith.mulf %617, %8 : vector<8x128xf32>
    %619 = arith.addf %615, %618 : vector<8x128xf32>
    %c9_282 = arith.constant 9 : index
    %c7_283 = arith.constant 7 : index
    %620 = memref.load %arg1[%c9_282, %c7_283] : memref<12x13xf32, #tpu.memory_space<smem>>
    %621 = vector.broadcast %620 : f32 to vector<8x128xf32>
    %622 = arith.mulf %621, %9 : vector<8x128xf32>
    %623 = arith.addf %619, %622 : vector<8x128xf32>
    %c9_284 = arith.constant 9 : index
    %c8_285 = arith.constant 8 : index
    %624 = memref.load %arg1[%c9_284, %c8_285] : memref<12x13xf32, #tpu.memory_space<smem>>
    %625 = vector.broadcast %624 : f32 to vector<8x128xf32>
    %626 = arith.mulf %625, %10 : vector<8x128xf32>
    %627 = arith.addf %623, %626 : vector<8x128xf32>
    %c9_286 = arith.constant 9 : index
    %c9_287 = arith.constant 9 : index
    %628 = memref.load %arg1[%c9_286, %c9_287] : memref<12x13xf32, #tpu.memory_space<smem>>
    %629 = vector.broadcast %628 : f32 to vector<8x128xf32>
    %630 = arith.mulf %629, %11 : vector<8x128xf32>
    %631 = arith.addf %627, %630 : vector<8x128xf32>
    %c9_288 = arith.constant 9 : index
    %c10_289 = arith.constant 10 : index
    %632 = memref.load %arg1[%c9_288, %c10_289] : memref<12x13xf32, #tpu.memory_space<smem>>
    %633 = vector.broadcast %632 : f32 to vector<8x128xf32>
    %634 = arith.mulf %633, %12 : vector<8x128xf32>
    %635 = arith.addf %631, %634 : vector<8x128xf32>
    %c9_290 = arith.constant 9 : index
    %c11_291 = arith.constant 11 : index
    %636 = memref.load %arg1[%c9_290, %c11_291] : memref<12x13xf32, #tpu.memory_space<smem>>
    %637 = vector.broadcast %636 : f32 to vector<8x128xf32>
    %638 = arith.mulf %637, %13 : vector<8x128xf32>
    %639 = arith.addf %635, %638 : vector<8x128xf32>
    %640 = arith.truncf %639 : vector<8x128xf32> to vector<8x128xbf16>
    %641 = arith.extf %640 : vector<8x128xbf16> to vector<8x128xf32>
    %642 = arith.subf %639, %641 : vector<8x128xf32>
    %643 = arith.truncf %642 : vector<8x128xf32> to vector<8x128xbf16>
    %cst_292 = arith.constant dense<0.000000e+00> : vector<8x256xf32>
    %644 = tpu.matmul %640, %0, %cst_292 {dimension_numbers = #tpu.dot_dimension_numbers<[1], [0], [0], [1], [0, 0, 1, 1], [], []>} : vector<8x128xbf16>, vector<128x256xbf16>, vector<8x256xf32> -> vector<8x256xf32>
    %cst_293 = arith.constant dense<0.000000e+00> : vector<8x256xf32>
    %645 = tpu.matmul %643, %0, %cst_293 {dimension_numbers = #tpu.dot_dimension_numbers<[1], [0], [0], [1], [0, 0, 1, 1], [], []>} : vector<8x128xbf16>, vector<128x256xbf16>, vector<8x256xf32> -> vector<8x256xf32>
    %646 = arith.addf %644, %645 : vector<8x256xf32>
    %cst_294 = arith.constant dense<0.000000e+00> : vector<8x256xf32>
    %647 = tpu.matmul %640, %1, %cst_294 {dimension_numbers = #tpu.dot_dimension_numbers<[1], [0], [0], [1], [0, 0, 1, 1], [], []>} : vector<8x128xbf16>, vector<128x256xbf16>, vector<8x256xf32> -> vector<8x256xf32>
    %648 = arith.addf %646, %647 : vector<8x256xf32>
    %649 = vector.extract_strided_slice %648 {offsets = [0, 0], sizes = [8, 128], strides = [1, 1]} : vector<8x256xf32> to vector<8x128xf32>
    %c9_295 = arith.constant 9 : index
    %c12_296 = arith.constant 12 : index
    %650 = memref.load %arg1[%c9_295, %c12_296] : memref<12x13xf32, #tpu.memory_space<smem>>
    %651 = vector.broadcast %650 : f32 to vector<8x128xf32>
    %652 = arith.addf %649, %651 : vector<8x128xf32>
    %653 = vector.extract_strided_slice %648 {offsets = [0, 128], sizes = [8, 128], strides = [1, 1]} : vector<8x256xf32> to vector<8x128xf32>
    %c10_297 = arith.constant 10 : index
    %c0_298 = arith.constant 0 : index
    %654 = memref.load %arg1[%c10_297, %c0_298] : memref<12x13xf32, #tpu.memory_space<smem>>
    %655 = vector.broadcast %654 : f32 to vector<8x128xf32>
    %656 = arith.mulf %655, %2 : vector<8x128xf32>
    %c10_299 = arith.constant 10 : index
    %c1_300 = arith.constant 1 : index
    %657 = memref.load %arg1[%c10_299, %c1_300] : memref<12x13xf32, #tpu.memory_space<smem>>
    %658 = vector.broadcast %657 : f32 to vector<8x128xf32>
    %659 = arith.mulf %658, %3 : vector<8x128xf32>
    %660 = arith.addf %656, %659 : vector<8x128xf32>
    %c10_301 = arith.constant 10 : index
    %c2_302 = arith.constant 2 : index
    %661 = memref.load %arg1[%c10_301, %c2_302] : memref<12x13xf32, #tpu.memory_space<smem>>
    %662 = vector.broadcast %661 : f32 to vector<8x128xf32>
    %663 = arith.mulf %662, %4 : vector<8x128xf32>
    %664 = arith.addf %660, %663 : vector<8x128xf32>
    %c10_303 = arith.constant 10 : index
    %c3_304 = arith.constant 3 : index
    %665 = memref.load %arg1[%c10_303, %c3_304] : memref<12x13xf32, #tpu.memory_space<smem>>
    %666 = vector.broadcast %665 : f32 to vector<8x128xf32>
    %667 = arith.mulf %666, %5 : vector<8x128xf32>
    %668 = arith.addf %664, %667 : vector<8x128xf32>
    %c10_305 = arith.constant 10 : index
    %c4_306 = arith.constant 4 : index
    %669 = memref.load %arg1[%c10_305, %c4_306] : memref<12x13xf32, #tpu.memory_space<smem>>
    %670 = vector.broadcast %669 : f32 to vector<8x128xf32>
    %671 = arith.mulf %670, %6 : vector<8x128xf32>
    %672 = arith.addf %668, %671 : vector<8x128xf32>
    %c10_307 = arith.constant 10 : index
    %c5_308 = arith.constant 5 : index
    %673 = memref.load %arg1[%c10_307, %c5_308] : memref<12x13xf32, #tpu.memory_space<smem>>
    %674 = vector.broadcast %673 : f32 to vector<8x128xf32>
    %675 = arith.mulf %674, %7 : vector<8x128xf32>
    %676 = arith.addf %672, %675 : vector<8x128xf32>
    %c10_309 = arith.constant 10 : index
    %c6_310 = arith.constant 6 : index
    %677 = memref.load %arg1[%c10_309, %c6_310] : memref<12x13xf32, #tpu.memory_space<smem>>
    %678 = vector.broadcast %677 : f32 to vector<8x128xf32>
    %679 = arith.mulf %678, %8 : vector<8x128xf32>
    %680 = arith.addf %676, %679 : vector<8x128xf32>
    %c10_311 = arith.constant 10 : index
    %c7_312 = arith.constant 7 : index
    %681 = memref.load %arg1[%c10_311, %c7_312] : memref<12x13xf32, #tpu.memory_space<smem>>
    %682 = vector.broadcast %681 : f32 to vector<8x128xf32>
    %683 = arith.mulf %682, %9 : vector<8x128xf32>
    %684 = arith.addf %680, %683 : vector<8x128xf32>
    %c10_313 = arith.constant 10 : index
    %c8_314 = arith.constant 8 : index
    %685 = memref.load %arg1[%c10_313, %c8_314] : memref<12x13xf32, #tpu.memory_space<smem>>
    %686 = vector.broadcast %685 : f32 to vector<8x128xf32>
    %687 = arith.mulf %686, %10 : vector<8x128xf32>
    %688 = arith.addf %684, %687 : vector<8x128xf32>
    %c10_315 = arith.constant 10 : index
    %c9_316 = arith.constant 9 : index
    %689 = memref.load %arg1[%c10_315, %c9_316] : memref<12x13xf32, #tpu.memory_space<smem>>
    %690 = vector.broadcast %689 : f32 to vector<8x128xf32>
    %691 = arith.mulf %690, %11 : vector<8x128xf32>
    %692 = arith.addf %688, %691 : vector<8x128xf32>
    %c10_317 = arith.constant 10 : index
    %c10_318 = arith.constant 10 : index
    %693 = memref.load %arg1[%c10_317, %c10_318] : memref<12x13xf32, #tpu.memory_space<smem>>
    %694 = vector.broadcast %693 : f32 to vector<8x128xf32>
    %695 = arith.mulf %694, %12 : vector<8x128xf32>
    %696 = arith.addf %692, %695 : vector<8x128xf32>
    %c10_319 = arith.constant 10 : index
    %c11_320 = arith.constant 11 : index
    %697 = memref.load %arg1[%c10_319, %c11_320] : memref<12x13xf32, #tpu.memory_space<smem>>
    %698 = vector.broadcast %697 : f32 to vector<8x128xf32>
    %699 = arith.mulf %698, %13 : vector<8x128xf32>
    %700 = arith.addf %696, %699 : vector<8x128xf32>
    %701 = arith.truncf %700 : vector<8x128xf32> to vector<8x128xbf16>
    %702 = arith.extf %701 : vector<8x128xbf16> to vector<8x128xf32>
    %703 = arith.subf %700, %702 : vector<8x128xf32>
    %704 = arith.truncf %703 : vector<8x128xf32> to vector<8x128xbf16>
    %cst_321 = arith.constant dense<0.000000e+00> : vector<8x256xf32>
    %705 = tpu.matmul %701, %0, %cst_321 {dimension_numbers = #tpu.dot_dimension_numbers<[1], [0], [0], [1], [0, 0, 1, 1], [], []>} : vector<8x128xbf16>, vector<128x256xbf16>, vector<8x256xf32> -> vector<8x256xf32>
    %cst_322 = arith.constant dense<0.000000e+00> : vector<8x256xf32>
    %706 = tpu.matmul %704, %0, %cst_322 {dimension_numbers = #tpu.dot_dimension_numbers<[1], [0], [0], [1], [0, 0, 1, 1], [], []>} : vector<8x128xbf16>, vector<128x256xbf16>, vector<8x256xf32> -> vector<8x256xf32>
    %707 = arith.addf %705, %706 : vector<8x256xf32>
    %cst_323 = arith.constant dense<0.000000e+00> : vector<8x256xf32>
    %708 = tpu.matmul %701, %1, %cst_323 {dimension_numbers = #tpu.dot_dimension_numbers<[1], [0], [0], [1], [0, 0, 1, 1], [], []>} : vector<8x128xbf16>, vector<128x256xbf16>, vector<8x256xf32> -> vector<8x256xf32>
    %709 = arith.addf %707, %708 : vector<8x256xf32>
    %710 = vector.extract_strided_slice %709 {offsets = [0, 0], sizes = [8, 128], strides = [1, 1]} : vector<8x256xf32> to vector<8x128xf32>
    %c10_324 = arith.constant 10 : index
    %c12_325 = arith.constant 12 : index
    %711 = memref.load %arg1[%c10_324, %c12_325] : memref<12x13xf32, #tpu.memory_space<smem>>
    %712 = vector.broadcast %711 : f32 to vector<8x128xf32>
    %713 = arith.addf %710, %712 : vector<8x128xf32>
    %714 = vector.extract_strided_slice %709 {offsets = [0, 128], sizes = [8, 128], strides = [1, 1]} : vector<8x256xf32> to vector<8x128xf32>
    %c11_326 = arith.constant 11 : index
    %c0_327 = arith.constant 0 : index
    %715 = memref.load %arg1[%c11_326, %c0_327] : memref<12x13xf32, #tpu.memory_space<smem>>
    %716 = vector.broadcast %715 : f32 to vector<8x128xf32>
    %717 = arith.mulf %716, %2 : vector<8x128xf32>
    %c11_328 = arith.constant 11 : index
    %c1_329 = arith.constant 1 : index
    %718 = memref.load %arg1[%c11_328, %c1_329] : memref<12x13xf32, #tpu.memory_space<smem>>
    %719 = vector.broadcast %718 : f32 to vector<8x128xf32>
    %720 = arith.mulf %719, %3 : vector<8x128xf32>
    %721 = arith.addf %717, %720 : vector<8x128xf32>
    %c11_330 = arith.constant 11 : index
    %c2_331 = arith.constant 2 : index
    %722 = memref.load %arg1[%c11_330, %c2_331] : memref<12x13xf32, #tpu.memory_space<smem>>
    %723 = vector.broadcast %722 : f32 to vector<8x128xf32>
    %724 = arith.mulf %723, %4 : vector<8x128xf32>
    %725 = arith.addf %721, %724 : vector<8x128xf32>
    %c11_332 = arith.constant 11 : index
    %c3_333 = arith.constant 3 : index
    %726 = memref.load %arg1[%c11_332, %c3_333] : memref<12x13xf32, #tpu.memory_space<smem>>
    %727 = vector.broadcast %726 : f32 to vector<8x128xf32>
    %728 = arith.mulf %727, %5 : vector<8x128xf32>
    %729 = arith.addf %725, %728 : vector<8x128xf32>
    %c11_334 = arith.constant 11 : index
    %c4_335 = arith.constant 4 : index
    %730 = memref.load %arg1[%c11_334, %c4_335] : memref<12x13xf32, #tpu.memory_space<smem>>
    %731 = vector.broadcast %730 : f32 to vector<8x128xf32>
    %732 = arith.mulf %731, %6 : vector<8x128xf32>
    %733 = arith.addf %729, %732 : vector<8x128xf32>
    %c11_336 = arith.constant 11 : index
    %c5_337 = arith.constant 5 : index
    %734 = memref.load %arg1[%c11_336, %c5_337] : memref<12x13xf32, #tpu.memory_space<smem>>
    %735 = vector.broadcast %734 : f32 to vector<8x128xf32>
    %736 = arith.mulf %735, %7 : vector<8x128xf32>
    %737 = arith.addf %733, %736 : vector<8x128xf32>
    %c11_338 = arith.constant 11 : index
    %c6_339 = arith.constant 6 : index
    %738 = memref.load %arg1[%c11_338, %c6_339] : memref<12x13xf32, #tpu.memory_space<smem>>
    %739 = vector.broadcast %738 : f32 to vector<8x128xf32>
    %740 = arith.mulf %739, %8 : vector<8x128xf32>
    %741 = arith.addf %737, %740 : vector<8x128xf32>
    %c11_340 = arith.constant 11 : index
    %c7_341 = arith.constant 7 : index
    %742 = memref.load %arg1[%c11_340, %c7_341] : memref<12x13xf32, #tpu.memory_space<smem>>
    %743 = vector.broadcast %742 : f32 to vector<8x128xf32>
    %744 = arith.mulf %743, %9 : vector<8x128xf32>
    %745 = arith.addf %741, %744 : vector<8x128xf32>
    %c11_342 = arith.constant 11 : index
    %c8_343 = arith.constant 8 : index
    %746 = memref.load %arg1[%c11_342, %c8_343] : memref<12x13xf32, #tpu.memory_space<smem>>
    %747 = vector.broadcast %746 : f32 to vector<8x128xf32>
    %748 = arith.mulf %747, %10 : vector<8x128xf32>
    %749 = arith.addf %745, %748 : vector<8x128xf32>
    %c11_344 = arith.constant 11 : index
    %c9_345 = arith.constant 9 : index
    %750 = memref.load %arg1[%c11_344, %c9_345] : memref<12x13xf32, #tpu.memory_space<smem>>
    %751 = vector.broadcast %750 : f32 to vector<8x128xf32>
    %752 = arith.mulf %751, %11 : vector<8x128xf32>
    %753 = arith.addf %749, %752 : vector<8x128xf32>
    %c11_346 = arith.constant 11 : index
    %c10_347 = arith.constant 10 : index
    %754 = memref.load %arg1[%c11_346, %c10_347] : memref<12x13xf32, #tpu.memory_space<smem>>
    %755 = vector.broadcast %754 : f32 to vector<8x128xf32>
    %756 = arith.mulf %755, %12 : vector<8x128xf32>
    %757 = arith.addf %753, %756 : vector<8x128xf32>
    %c11_348 = arith.constant 11 : index
    %c11_349 = arith.constant 11 : index
    %758 = memref.load %arg1[%c11_348, %c11_349] : memref<12x13xf32, #tpu.memory_space<smem>>
    %759 = vector.broadcast %758 : f32 to vector<8x128xf32>
    %760 = arith.mulf %759, %13 : vector<8x128xf32>
    %761 = arith.addf %757, %760 : vector<8x128xf32>
    %762 = arith.truncf %761 : vector<8x128xf32> to vector<8x128xbf16>
    %763 = arith.extf %762 : vector<8x128xbf16> to vector<8x128xf32>
    %764 = arith.subf %761, %763 : vector<8x128xf32>
    %765 = arith.truncf %764 : vector<8x128xf32> to vector<8x128xbf16>
    %cst_350 = arith.constant dense<0.000000e+00> : vector<8x256xf32>
    %766 = tpu.matmul %762, %0, %cst_350 {dimension_numbers = #tpu.dot_dimension_numbers<[1], [0], [0], [1], [0, 0, 1, 1], [], []>} : vector<8x128xbf16>, vector<128x256xbf16>, vector<8x256xf32> -> vector<8x256xf32>
    %cst_351 = arith.constant dense<0.000000e+00> : vector<8x256xf32>
    %767 = tpu.matmul %765, %0, %cst_351 {dimension_numbers = #tpu.dot_dimension_numbers<[1], [0], [0], [1], [0, 0, 1, 1], [], []>} : vector<8x128xbf16>, vector<128x256xbf16>, vector<8x256xf32> -> vector<8x256xf32>
    %768 = arith.addf %766, %767 : vector<8x256xf32>
    %cst_352 = arith.constant dense<0.000000e+00> : vector<8x256xf32>
    %769 = tpu.matmul %762, %1, %cst_352 {dimension_numbers = #tpu.dot_dimension_numbers<[1], [0], [0], [1], [0, 0, 1, 1], [], []>} : vector<8x128xbf16>, vector<128x256xbf16>, vector<8x256xf32> -> vector<8x256xf32>
    %770 = arith.addf %768, %769 : vector<8x256xf32>
    %771 = vector.extract_strided_slice %770 {offsets = [0, 0], sizes = [8, 128], strides = [1, 1]} : vector<8x256xf32> to vector<8x128xf32>
    %c11_353 = arith.constant 11 : index
    %c12_354 = arith.constant 12 : index
    %772 = memref.load %arg1[%c11_353, %c12_354] : memref<12x13xf32, #tpu.memory_space<smem>>
    %773 = vector.broadcast %772 : f32 to vector<8x128xf32>
    %774 = arith.addf %771, %773 : vector<8x128xf32>
    %775 = vector.extract_strided_slice %770 {offsets = [0, 128], sizes = [8, 128], strides = [1, 1]} : vector<8x256xf32> to vector<8x128xf32>
    %776 = arith.mulf %469, %530 : vector<8x128xf32>
    %777 = arith.mulf %470, %531 : vector<8x128xf32>
    %778 = arith.subf %776, %777 : vector<8x128xf32>
    %779 = arith.mulf %469, %531 : vector<8x128xf32>
    %780 = arith.mulf %470, %530 : vector<8x128xf32>
    %781 = arith.addf %779, %780 : vector<8x128xf32>
    %782 = arith.mulf %591, %652 : vector<8x128xf32>
    %783 = arith.mulf %592, %653 : vector<8x128xf32>
    %784 = arith.subf %782, %783 : vector<8x128xf32>
    %785 = arith.mulf %591, %653 : vector<8x128xf32>
    %786 = arith.mulf %592, %652 : vector<8x128xf32>
    %787 = arith.addf %785, %786 : vector<8x128xf32>
    %788 = arith.mulf %713, %774 : vector<8x128xf32>
    %789 = arith.mulf %714, %775 : vector<8x128xf32>
    %790 = arith.subf %788, %789 : vector<8x128xf32>
    %791 = arith.mulf %713, %775 : vector<8x128xf32>
    %792 = arith.mulf %714, %774 : vector<8x128xf32>
    %793 = arith.addf %791, %792 : vector<8x128xf32>
    %794 = arith.mulf %778, %784 : vector<8x128xf32>
    %795 = arith.mulf %781, %787 : vector<8x128xf32>
    %796 = arith.subf %794, %795 : vector<8x128xf32>
    %797 = arith.mulf %778, %787 : vector<8x128xf32>
    %798 = arith.mulf %781, %784 : vector<8x128xf32>
    %799 = arith.addf %797, %798 : vector<8x128xf32>
    %800 = arith.mulf %796, %790 : vector<8x128xf32>
    %801 = arith.mulf %799, %793 : vector<8x128xf32>
    %802 = arith.subf %800, %801 : vector<8x128xf32>
    %803 = arith.mulf %796, %793 : vector<8x128xf32>
    %804 = arith.mulf %799, %790 : vector<8x128xf32>
    %805 = arith.addf %803, %804 : vector<8x128xf32>
    %806 = arith.mulf %406, %802 : vector<8x128xf32>
    %807 = arith.mulf %409, %805 : vector<8x128xf32>
    %808 = arith.addf %806, %807 : vector<8x128xf32>
    %809 = arith.mulf %409, %802 : vector<8x128xf32>
    %810 = arith.mulf %406, %805 : vector<8x128xf32>
    %811 = arith.subf %809, %810 : vector<8x128xf32>
    %812 = tpu.concatenate %808, %811 in 1 : vector<8x128xf32>, vector<8x128xf32> -> vector<8x256xf32>
    %c0_355 = arith.constant 0 : index
    %c0_356 = arith.constant 0 : index
    %813 = vector.load %arg6[%c0_355, %c0_356] : memref<256x128xbf16, #tpu.memory_space<vmem>>, vector<256x128xbf16>
    %c0_357 = arith.constant 0 : index
    %c0_358 = arith.constant 0 : index
    %814 = vector.load %arg7[%c0_357, %c0_358] : memref<256x128xbf16, #tpu.memory_space<vmem>>, vector<256x128xbf16>
    %815 = arith.truncf %812 : vector<8x256xf32> to vector<8x256xbf16>
    %816 = arith.extf %815 : vector<8x256xbf16> to vector<8x256xf32>
    %817 = arith.subf %812, %816 : vector<8x256xf32>
    %818 = arith.truncf %817 : vector<8x256xf32> to vector<8x256xbf16>
    %cst_359 = arith.constant dense<0.000000e+00> : vector<8x128xf32>
    %819 = tpu.matmul %815, %813, %cst_359 {dimension_numbers = #tpu.dot_dimension_numbers<[1], [0], [0], [1], [0, 0, 1, 1], [], []>} : vector<8x256xbf16>, vector<256x128xbf16>, vector<8x128xf32> -> vector<8x128xf32>
    %cst_360 = arith.constant dense<0.000000e+00> : vector<8x128xf32>
    %820 = tpu.matmul %818, %813, %cst_360 {dimension_numbers = #tpu.dot_dimension_numbers<[1], [0], [0], [1], [0, 0, 1, 1], [], []>} : vector<8x256xbf16>, vector<256x128xbf16>, vector<8x128xf32> -> vector<8x128xf32>
    %821 = arith.addf %819, %820 : vector<8x128xf32>
    %cst_361 = arith.constant dense<0.000000e+00> : vector<8x128xf32>
    %822 = tpu.matmul %815, %814, %cst_361 {dimension_numbers = #tpu.dot_dimension_numbers<[1], [0], [0], [1], [0, 0, 1, 1], [], []>} : vector<8x256xbf16>, vector<256x128xbf16>, vector<8x128xf32> -> vector<8x128xf32>
    %823 = arith.addf %821, %822 : vector<8x128xf32>
    %c0_362 = arith.constant 0 : index
    %c0_363 = arith.constant 0 : index
    %824 = vector.load %arg8[%c0_362, %c0_363] : memref<8x128xf32, #tpu.memory_space<vmem>>, vector<8x128xf32>
    tpu.vector_store %arg8[%c0_362, %c0_363], %823 {strides = array<i32>} : memref<8x128xf32, #tpu.memory_space<vmem>>, vector<8x128xf32>,
    return
  }
  func.func @transform_0(%arg0: i32) -> (i32, i32) {
    %c0_i32 = arith.constant 0 : i32
    %c0_i32_0 = arith.constant 0 : i32
    %c0_i32_1 = arith.constant 0 : i32
    return %c0_i32, %c0_i32_0 : i32, i32
  }
  func.func @transform_1(%arg0: i32) -> (i32, i32) {
    %c0_i32 = arith.constant 0 : i32
    %c0_i32_0 = arith.constant 0 : i32
    return %arg0, %c0_i32 : i32, i32
  }
  func.func @transform_2(%arg0: i32) -> (i32, i32) {
    %c0_i32 = arith.constant 0 : i32
    %c0_i32_0 = arith.constant 0 : i32
    return %arg0, %c0_i32 : i32, i32
  }
  func.func @transform_3(%arg0: i32) -> (i32, i32) {
    %c0_i32 = arith.constant 0 : i32
    %c0_i32_0 = arith.constant 0 : i32
    %c0_i32_1 = arith.constant 0 : i32
    return %c0_i32, %c0_i32_0 : i32, i32
  }
  func.func @transform_4(%arg0: i32) -> (i32, i32) {
    %c0_i32 = arith.constant 0 : i32
    %c0_i32_0 = arith.constant 0 : i32
    %c0_i32_1 = arith.constant 0 : i32
    return %c0_i32, %c0_i32_0 : i32, i32
  }
  func.func @transform_5(%arg0: i32) -> (i32, i32) {
    %c0_i32 = arith.constant 0 : i32
    %c0_i32_0 = arith.constant 0 : i32
    %c0_i32_1 = arith.constant 0 : i32
    return %c0_i32, %c0_i32_0 : i32, i32
  }
  func.func @transform_6(%arg0: i32) -> (i32, i32) {
    %c0_i32 = arith.constant 0 : i32
    %c0_i32_0 = arith.constant 0 : i32
    %c0_i32_1 = arith.constant 0 : i32
    return %c0_i32, %c0_i32_0 : i32, i32
  }
  func.func @transform_7(%arg0: i32) -> (i32, i32) {
    %c0_i32 = arith.constant 0 : i32
    %c0_i32_0 = arith.constant 0 : i32
    return %arg0, %c0_i32 : i32, i32
  }
}

</mosaic_0001>

<bundles_post_ra>
// kernel: iravenx_formula_forward.1
= control target key start
LH: loop header
LB: loop body
LE: loop exit
PB: predicated region body
PF: predicated region fallthrough
CT: control target
= control target key end

     0   :  { %12 = vsyncpa [#allocation3], 0  ;;  %s5311_s0 = inlined_call_operand.vmem [shape: f32[12,13], index: 0, kind: input, shape index: {}]   ;;  %s5312_s1 = inlined_call_operand.vmem [shape: f32[8,1024], index: 1, kind: input, shape index: {}]   ;;  %s5313_s2 = inlined_call_operand.vmem [shape: f32[8,512], index: 2, kind: input, shape index: {}]   ;;  %s5314_s3 = inlined_call_operand.vmem [shape: bf16[128,256], index: 3, kind: input, shape index: {}]   ;;  %s5315_s4 = inlined_call_operand.vmem [shape: bf16[128,256], index: 4, kind: input, shape index: {}]   ;;  %s5316_s5 = inlined_call_operand.vmem [shape: bf16[256,128], index: 5, kind: input, shape index: {}]   ;;  %s5317_s6 = inlined_call_operand.vmem [shape: bf16[256,128], index: 6, kind: input, shape index: {}]   ;;  %s5318_s7 = inlined_call_operand.vmem [shape: f32[8,128], index: 7, kind: output, shape index: {}]  }
   0x1   :  { %s18_s26 = sshll.u32 %s5311_s0, 4  ;;  %s19_s26 = int_to_ptr.vmem [resolvable:$true] %s18_s26 }
   0x2   :  { %s3308_s27 = scalar_lea.vmem %s19_s26, 256  ;;  %p3313_p1 = scmp.lt.s32.totalorder %s19_s26, %s19_s26 }
   0x3   :  { %p3309_p0 = scmp.ne.s32.totalorder %s19_s26, %s3308_s27  ;;  %p3314_p2 = scmp.lt.s32.totalorder %s3308_s27, %s3308_s27 }
   0x5   :  { %p3315_p3 = por %p3314_p2, %p3313_p1 }
   0x7   :  { %p3316_p4 = pnand %p3315_p3, %p3309_p0 }
   0x9   :  { %3319 = shalt.err (!%p3316_p4)
}
   0xa   :  { %s3322_s28 = smov [#allocation2]   ;;  %s3323_s29 = smov 128  }
   0xb   :  { %s3324_s30 = smov 8  }
   0xc   :  { %24 = dma.vmem_to_smem %s19_s26, 256, %s3322_s28, [#allocation3], %s3323_s29, %s3323_s29, %s3324_s30  }
   0xd   :  { %3320 = dma.done.wait [#allocation3], 256  }
   0xe   :  { %3321 = vsyncadd [#allocation3], 4294967040 }
   0xf   :  { %40 = sfence }
  0x10   :  { %v3372_v0 = vld [vmem:[%s5314_s3 + $0x4] ss:$8 sps:$4 sm:$0xff]   ;;  %v3377_v1 = vld [vmem:[%s5314_s3] ss:$8 sps:$4 sm:$0xff]   ;;  %v3325_v2 = vmov 0   ;;  %s86_s11 = sld [smem:[#allocation2]] }
  0x11   :  { %290 = vmatprep.mubr.bf16.mxu1 %v3325_v2  ;;  %249 = vmatprep.mubr.bf16.mxu0 %v3325_v2  ;;  %v3386_v3 = vld [vmem:[%s5314_s3 + $0x14] ss:$8 sps:$4 sm:$0xff]   ;;  %v3393_v4 = vld [vmem:[%s5314_s3 + $0x10] ss:$8 sps:$4 sm:$0xff]   ;;  %v3400_v5 = vld [vmem:[%s5314_s3 + $0x24] ss:$8 sps:$4 sm:$0xff]  }
  0x12   :  { %258 = vmatprep.subr.bf16.mxu1 %v3372_v0  ;;  %217 = vmatprep.subr.bf16.mxu0 %v3372_v0  ;;  %s2851_s18 = sld [smem:[#allocation2 + $0x1]]  ;;  %s2852_s19 = sld [smem:[#allocation2 + $0x2]]  ;;  %v3407_v6 = vld [vmem:[%s5314_s3 + $0x20] ss:$8 sps:$4 sm:$0xff]   ;;  %v3414_v7 = vld [vmem:[%s5314_s3 + $0x34] ss:$8 sps:$4 sm:$0xff]  }
  0x13   :  { %259 = vmatpush1.bf16.msra.mxu1 %v3377_v1  ;;  %218 = vmatpush1.bf16.msra.mxu0 %v3377_v1  ;;  %s2853_s24 = sld [smem:[#allocation2 + $0x3]]  ;;  %s3416_s25 = sld [smem:[#allocation2 + $0x4]]  ;;  %v3421_v9 = vld [vmem:[%s5312_s1] sm:$0xff]  ;;  %v3428_v11 = vld [vmem:[%s5314_s3 + $0x30] ss:$8 sps:$4 sm:$0xff]   ;;  %v3433_v12 = vld [vmem:[%s5312_s1 + $0x8] sm:$0xff] }
  0x14   :  { %260 = vmatprep.subr.bf16.mxu1 %v3386_v3  ;;  %219 = vmatprep.subr.bf16.mxu0 %v3386_v3  ;;  %v3438_v13 = vld [vmem:[%s5312_s1 + $0x10] sm:$0xff]  ;;  %s2855_s10 = sld [smem:[#allocation2 + $0x5]]  ;;  %v3446_v16 = vld [vmem:[%s5314_s3 + $0x44] ss:$8 sps:$4 sm:$0xff]   ;;  %v3451_v17 = vld [vmem:[%s5312_s1 + $0x18] sm:$0xff]  ;;  %s3455_s15 = sld [smem:[#allocation2 + $0x6]] }
  0x15   :  { %v3460_v20 = vld [vmem:[%s5312_s1 + $0x20] sm:$0xff]  ;;  %s3469_s21 = sld [smem:[#allocation2 + $0x8]]  ;;  %s3471_s22 = sld [smem:[#allocation2 + $0x9]]  ;;  %v3478_v24 = vld [vmem:[%s5312_s1 + $0x28] sm:$0xff]  ;;  %v3487_v27 = vld [vmem:[%s5314_s3 + $0x54] ss:$8 sps:$4 sm:$0xff]  }
  0x16   :  { %v87_v8 = vstv %s86_s11  ;;  %v3467_v21 = vld [vmem:[%s5314_s3 + $0x40] ss:$8 sps:$4 sm:$0xff]   ;;  %s3490_s28 = sld [smem:[#allocation2 + $0xa]]  ;;  %v3495_v30 = vld [vmem:[%s5314_s3 + $0x50] ss:$8 sps:$4 sm:$0xff]   ;;  %s3504_s9 = sld [smem:[#allocation2 + $0xb]] }
  0x17   :  { %261 = vmatpush1.bf16.msra.mxu1 %v3393_v4  ;;  %220 = vmatpush1.bf16.msra.mxu0 %v3393_v4  ;;  %v88_v14 = vmul.f32 %v87_v8, %v3421_v9  ;;  %v3500_v31 = vld [vmem:[%s5312_s1 + $0x30] sm:$0xff]  ;;  %s3506_s0 = sld [smem:[#allocation2 + $0x80]]  ;;  %v3513_v36 = vld [vmem:[%s5312_s1 + $0x38] sm:$0xff]  ;;  %v3523_v38 = vld [vmem:[%s5314_s3 + $0x64] ss:$8 sps:$4 sm:$0xff]   ;;  %s3531_s17 = sld [smem:[#allocation2 + $0x82]] }
  0x18   :  { %262 = vmatprep.subr.bf16.mxu1 %v3400_v5  ;;  %221 = vmatprep.subr.bf16.mxu0 %v3400_v5  ;;  %v90_v10 = vstv %s2851_s18  ;;  %v94_v15 = vstv %s2852_s19  ;;  %s3462_s18 = sld [smem:[#allocation2 + $0x7]]  ;;  %v3528_v39 = vld [vmem:[%s5313_s2] sm:$0xff]  ;;  %s3536_s19 = sld [smem:[#allocation2 + $0x84]]  ;;  %v3546_v44 = vld [vmem:[%s5313_s2 + $0x8] sm:$0xff] }
  0x19   :  { %v91_v18 = vmul.f32 %v90_v10, %v3433_v12  ;;  %v95_v19 = vmul.f32 %v94_v15, %v3438_v13  ;;  %v98_v23 = vstv %s2853_s24  ;;  %v102_v26 = vstv %s3416_s25  ;;  %v3541_v43 = vld [vmem:[%s5314_s3 + $0x60] ss:$8 sps:$4 sm:$0xff]   ;;  %v3555_v48 = vld [vmem:[%s5314_s3 + $0x74] ss:$8 sps:$4 sm:$0xff]   ;;  %s3572_s25 = sld [smem:[#allocation2 + $0x86]]  ;;  %s3606_s14 = sld [smem:[#allocation2 + $0x89]] }
  0x1a   :  { %v99_v25 = vmul.f32 %v98_v23, %v3451_v17  ;;  %v103_v29 = vmul.f32 %v102_v26, %v3460_v20  ;;  %v106_v32 = vstv %s2855_s10  ;;  %v110_v35 = vstv %s3455_s15  ;;  %s3516_s10 = sld [smem:[#allocation2 + $0x81]]  ;;  %v3560_v49 = vld [vmem:[%s5313_s2 + $0x10] sm:$0xff]  ;;  %v3577_v57 = vld [vmem:[%s5313_s2 + $0x18] sm:$0xff]  ;;  %s3613_s15 = sld [smem:[#allocation2 + $0x8a]] }
  0x1b   :  { %263 = vmatpush1.bf16.msra.mxu1 %v3407_v6  ;;  %222 = vmatpush1.bf16.msra.mxu0 %v3407_v6  ;;  %v92_v22 = vadd.f32 %v91_v18, %v88_v14  ;;  %v107_v34 = vmul.f32 %v106_v32, %v3478_v24  ;;  %v111_v41 = vmul.f32 %v110_v35, %v3500_v31  ;;  %v118_v42 = vstv %s3469_s21  ;;  %v3589_v62 = vld [vmem:[%s5314_s3 + $0x70] ss:$8 sps:$4 sm:$0xff]   ;;  %v3602_v18 = vld [vmem:[%s5315_s4 + $0x4] ss:$8 sps:$4 sm:$0xff]   ;;  %s3621_s16 = sld [smem:[#allocation2 + $0x8b]]  ;;  %s2909_s20 = sld [smem:[#allocation2 + $0x101]] }
  0x1c   :  { %264 = vmatprep.subr.bf16.mxu1 %v3414_v7  ;;  %223 = vmatprep.subr.bf16.mxu0 %v3414_v7  ;;  %v122_v47 = vstv %s3471_s22  ;;  %v119_v51 = vmul.f32 %v118_v42, %v3528_v39  ;;  %v126_v52 = vstv %s3490_s28  ;;  %s3567_s22 = sld [smem:[#allocation2 + $0x85]]  ;;  %v130_v59 = vstv %s3504_s9  ;;  %s3582_s28 = sld [smem:[#allocation2 + $0x87]] }
  0x1d   :  { %v96_v28 = vadd.f32 %v95_v19, %v92_v22  ;;  %v426_v53 = vstv %s3506_s0  ;;  %v123_v54 = vmul.f32 %v122_v47, %v3546_v44  ;;  %v433_v61 = vstv %s3531_s17  ;;  %s3595_s9 = sld [smem:[#allocation2 + $0x88]]  ;;  %s2910_s27 = sld [smem:[#allocation2 + $0x102]] }
  0x1e   :  { %v114_v37 = vstv %s3462_s18  ;;  %s3534_s18 = sld [smem:[#allocation2 + $0x83]]  ;;  %v427_v55 = vmul.f32 %v426_v53, %v3421_v9  ;;  %v127_v63 = vmul.f32 %v126_v52, %v3560_v49  ;;  %v434_v8 = vmul.f32 %v433_v61, %v3438_v13  ;;  %v3643_v61 = vld [vmem:[%s5315_s4 + $0x14] ss:$8 sps:$4 sm:$0xff]   ;;  %s2912_s30 = sld [smem:[#allocation2 + $0x104]] }
  0x1f   :  { %265 = vmatpush1.bf16.msra.mxu1 %v3428_v11  ;;  %224 = vmatpush1.bf16.msra.mxu0 %v3428_v11  ;;  %v100_v33 = vadd.f32 %v99_v25, %v96_v28  ;;  %v115_v46 = vmul.f32 %v114_v37, %v3513_v36  ;;  %v441_v14 = vstv %s3536_s19  ;;  %v131_v23 = vmul.f32 %v130_v59, %v3577_v57  ;;  %s2908_s19 = sld [smem:[#allocation2 + $0x100]]  ;;  %s2911_s29 = sld [smem:[#allocation2 + $0x103]] }
  0x20   :  { %266 = vmatprep.subr.bf16.mxu1 %v3446_v16  ;;  %225 = vmatprep.subr.bf16.mxu0 %v3446_v16  ;;  %v429_v56 = vstv %s3516_s10  ;;  %v442_v28 = vmul.f32 %v441_v14, %v3460_v20  ;;  %v449_v32 = vstv %s3572_s25  ;;  %v3650_v14 = vld [vmem:[%s5315_s4 + $0x10] ss:$8 sps:$4 sm:$0xff]   ;;  %s2914_s25 = sld [smem:[#allocation2 + $0x106]]  ;;  %s2915_s8 = sld [smem:[#allocation2 + $0x107]] }
  0x21   :  { %v104_v40 = vadd.f32 %v103_v29, %v100_v33  ;;  %v430_v60 = vmul.f32 %v429_v56, %v3433_v12  ;;  %v450_v42 = vmul.f32 %v449_v32, %v3500_v31  ;;  %v3681_v32 = vld [vmem:[%s5315_s4 + $0x30] ss:$8 sps:$4 sm:$0xff]   ;;  %s2921_s11 = sld [smem:[#allocation2 + $0x180]]  ;;  %s3781_s12 = sld [smem:[#allocation2 + $0x182]] }
  0x22   :  { %v445_v29 = vstv %s3567_s22  ;;  %v453_v37 = vstv %s3582_s28  ;;  %s2913_s22 = sld [smem:[#allocation2 + $0x105]]  ;;  %s2922_s28 = sld [smem:[#allocation2 + $0x181]] }
  0x23   :  { %267 = vmatpush1.bf16.msra.mxu1 %v3467_v21  ;;  %226 = vmatpush1.bf16.msra.mxu0 %v3467_v21  ;;  %v108_v45 = vadd.f32 %v107_v34, %v104_v40  ;;  %v431_v19 = vadd.f32 %v430_v60, %v427_v55  ;;  %v446_v35 = vmul.f32 %v445_v29, %v3478_v24  ;;  %v465_v55 = vstv %s3613_s15  ;;  %s3777_s0 = sld [smem:[#allocation2 + $0x108]]  ;;  %s3790_s10 = sld [smem:[#allocation2 + $0x183]] }
  0x24   :  { %268 = vmatprep.subr.bf16.mxu1 %v3487_v27  ;;  %227 = vmatprep.subr.bf16.mxu0 %v3487_v27  ;;  %v437_v10 = vstv %s3534_s18  ;;  %s3796_s13 = sld [smem:[#allocation2 + $0x10a]]  ;;  %s3811_s15 = sld [smem:[#allocation2 + $0x10b]] }
  0x25   :  { %v112_v50 = vadd.f32 %v111_v41, %v108_v45  ;;  %v438_v22 = vmul.f32 %v437_v10, %v3451_v17  ;;  %v435_v26 = vadd.f32 %v434_v8, %v431_v19  ;;  %v457_v45 = vstv %s3595_s9  ;;  %s3786_s9 = sld [smem:[#allocation2 + $0x109]]  ;;  %s2927_s17 = sld [smem:[#allocation2 + $0x186]] }
  0x26   :  { %v466_v10 = vmul.f32 %v465_v55, %v3560_v49  ;;  %s2928_s18 = sld [smem:[#allocation2 + $0x187]]  ;;  %s2931_s23 = sld [smem:[#allocation2 + $0x18a]] }
  0x27   :  { %269 = vmatpush1.bf16.msra.mxu1 %v3495_v30  ;;  %228 = vmatpush1.bf16.msra.mxu0 %v3495_v30  ;;  %v116_v58 = vadd.f32 %v115_v46, %v112_v50  ;;  %v439_v34 = vadd.f32 %v438_v22, %v435_v26  ;;  %v454_v50 = vmul.f32 %v453_v37, %v3513_v36  ;;  %v3660_v22 = vld [vmem:[%s5315_s4 + $0x24] ss:$8 sps:$4 sm:$0xff]   ;;  %v3667_v26 = vld [vmem:[%s5315_s4 + $0x20] ss:$8 sps:$4 sm:$0xff]   ;;  %v3703_v37 = vld [vmem:[%s5315_s4 + $0x54] ss:$8 sps:$4 sm:$0xff]  }
  0x28   :  { %270 = vmatprep.subr.bf16.mxu1 %v3523_v38  ;;  %229 = vmatprep.subr.bf16.mxu0 %v3523_v38  ;;  %s2932_s26 = sld [smem:[#allocation2 + $0x18b]]  ;;  %s2934_s24 = sld [smem:[#allocation2 + $0x200]] }
  0x29   :  { %v120_v15 = vadd.f32 %v119_v51, %v116_v58  ;;  %v443_v41 = vadd.f32 %v442_v28, %v439_v34  ;;  %v461_v51 = vstv %s3606_s14  ;;  %v3636_v58 = vld [vmem:[%s5315_s4] ss:$8 sps:$4 sm:$0xff]   ;;  %v3674_v28 = vld [vmem:[%s5315_s4 + $0x34] ss:$8 sps:$4 sm:$0xff]   ;;  %s3805_s14 = sld [smem:[#allocation2 + $0x184]]  ;;  %s2935_s21 = sld [smem:[#allocation2 + $0x201]] }
  0x2a   :  { %v462_v60 = vmul.f32 %v461_v51, %v3546_v44 }
  0x2b   :  { %271 = vmatpush1.bf16.msra.mxu1 %v3541_v43  ;;  %230 = vmatpush1.bf16.msra.mxu0 %v3541_v43  ;;  %v124_v25 = vadd.f32 %v123_v54, %v120_v15  ;;  %v447_v47 = vadd.f32 %v446_v35, %v443_v41  ;;  %v458_v54 = vmul.f32 %v457_v45, %v3528_v39  ;;  %v469_v15 = vstv %s3621_s16  ;;  %v3697_v35 = vld [vmem:[%s5315_s4 + $0x40] ss:$8 sps:$4 sm:$0xff]   ;;  %v3714_v41 = vld [vmem:[%s5315_s4 + $0x50] ss:$8 sps:$4 sm:$0xff]   ;;  %s3817_s16 = sld [smem:[#allocation2 + $0x185]] }
  0x2c   :  { %272 = vmatprep.subr.bf16.mxu1 %v3555_v48  ;;  %231 = vmatprep.subr.bf16.mxu0 %v3555_v48 }
  0x2d   :  { %v128_v33 = vadd.f32 %v127_v63, %v124_v25  ;;  %v451_v53 = vadd.f32 %v450_v42, %v447_v47  ;;  %v470_v25 = vmul.f32 %v469_v15, %v3577_v57  ;;  %v3720_v42 = vld [vmem:[%s5315_s4 + $0x64] ss:$8 sps:$4 sm:$0xff]   ;;  %v3728_v47 = vld [vmem:[%s5315_s4 + $0x60] ss:$8 sps:$4 sm:$0xff]   ;;  %v620_v15 = vstv %s2912_s30  ;;  %s4568_s30 = sld [smem:[#allocation2 + $0x408]] }
  0x2f   :  { %273 = vmatpush1.bf16.msra.mxu1 %v3589_v62  ;;  %232 = vmatpush1.bf16.msra.mxu0 %v3589_v62  ;;  %v132_v40 = vadd.f32 %v131_v23, %v128_v33  ;;  %v455_v59 = vadd.f32 %v454_v50, %v451_v53  ;;  %v3687_v33 = vld [vmem:[%s5315_s4 + $0x44] ss:$8 sps:$4 sm:$0xff]   ;;  %v3734_v50 = vld [vmem:[%s5315_s4 + $0x74] ss:$8 sps:$4 sm:$0xff]   ;;  %v605_v53 = vstv %s2908_s19  ;;  %s2929_s19 = sld [smem:[#allocation2 + $0x188]] }
  0x30   :  { %476 = vmatprep.subr.bf16.mxu1 %v3372_v0  ;;  %379 = vmatprep.subr.bf16.mxu0 %v3602_v18  ;;  %v606_v55 = vmul.f32 %v605_v53, %v3421_v9 }
  0x31   :  { %v3623_v46 = vpack.c.bf16 %v132_v40, %v132_v40  ;;  %v459_v8 = vadd.f32 %v458_v54, %v455_v59  ;;  %v608_v54 = vstv %s2909_s20  ;;  %v612_v59 = vstv %s2910_s27  ;;  %s2930_s20 = sld [smem:[#allocation2 + $0x189]]  ;;  %s2936_s27 = sld [smem:[#allocation2 + $0x202]] }
  0x33   :  { %291 = vmatmul.mubr.bf16.vlgmr.msra.gmra.mrb[0].mxu1 %v3623_v46  ;;  %v134_v52 = vunpack.c.l.bf16 %v3623_v46  ;;  %v463_v19 = vadd.f32 %v462_v60, %v459_v8 }
  0x34   :  { %477 = vmatpush1.bf16.msra.mxu1 %v3377_v1  ;;  %508 = vmatprep.mubr.bf16.mxu1 %v3325_v2 }
  0x35   :  { %v135_v56 = vsub.f32 %v132_v40, %v134_v52  ;;  %478 = vmatprep.subr.bf16.mxu1 %v3386_v3  ;;  %v467_v23 = vadd.f32 %v466_v10, %v463_v19  ;;  %v3742_v52 = vld [vmem:[%s5315_s4 + $0x70] ss:$8 sps:$4 sm:$0xff]  }
  0x37   :  { %v136_v63 = vpack.c.bf16 %v135_v56, %v135_v56  ;;  %v471_v29 = vadd.f32 %v470_v25, %v467_v23  ;;  %v609_v56 = vmul.f32 %v608_v54, %v3433_v12  ;;  %v621_v23 = vmul.f32 %v620_v15, %v3460_v20 }
  0x38   :  { %479 = vmatpush1.bf16.msra.mxu1 %v3393_v4  ;;  %v624_v25 = vstv %s2913_s22  ;;  %v632_v54 = vstv %s2915_s8  ;;  %s3995_s8 = sld [smem:[#allocation2 + $0x282]] }
  0x39   :  { %250 = vmatmul.mubr.bf16.vlgmr.msra.gmra.mrb[0].mxu0 %v136_v63  ;;  %480 = vmatprep.subr.bf16.mxu1 %v3400_v5  ;;  %v3691_v34 = vpack.c.bf16 %v471_v29, %v471_v29  ;;  %v610_v60 = vadd.f32 %v609_v56, %v606_v55  ;;  %v616_v63 = vstv %s2911_s29  ;;  %v784_v55 = vstv %s2921_s11  ;;  %s2937_s29 = sld [smem:[#allocation2 + $0x203]]  ;;  %s2938_s11 = sld [smem:[#allocation2 + $0x204]] }
  0x3a   :  { %380 = vmatpush1.bf16.msra.mxu0 %v3636_v58  ;;  %411 = vmatprep.mubr.bf16.mxu0 %v3325_v2  ;;  %v617_v10 = vmul.f32 %v616_v63, %v3451_v17  ;;  %v787_v56 = vstv %s2922_s28  ;;  %v785_v63 = vmul.f32 %v784_v55, %v3421_v9  ;;  %s4006_s28 = sld [smem:[#allocation2 + $0x283]]  ;;  %s4571_s22 = sld [smem:[#allocation2 + $0x482]] }
  0x3b   :  { %381 = vmatprep.subr.bf16.mxu0 %v3643_v61  ;;  %v473_v40 = vunpack.c.l.bf16 %v3691_v34 }
  0x3c   :  { %481 = vmatpush1.bf16.msra.mxu1 %v3407_v6 }
  0x3d   :  { %482 = vmatprep.subr.bf16.mxu1 %v3414_v7  ;;  %v474_v45 = vsub.f32 %v471_v29, %v473_v40  ;;  %v625_v40 = vmul.f32 %v624_v25, %v3478_v24 }
  0x3e   :  { %382 = vmatpush1.bf16.msra.mxu0 %v3650_v14 }
  0x3f   :  { %383 = vmatprep.subr.bf16.mxu0 %v3660_v22  ;;  %v475_v51 = vpack.c.bf16 %v474_v45, %v474_v45  ;;  %v628_v45 = vstv %s2914_s25  ;;  %s3991_s25 = sld [smem:[#allocation2 + $0x208]] }
  0x40   :  { %483 = vmatpush1.bf16.msra.mxu1 %v3428_v11  ;;  %v629_v53 = vmul.f32 %v628_v45, %v3500_v31 }
  0x41   :  { %484 = vmatprep.subr.bf16.mxu1 %v3446_v16 }
  0x42   :  { %384 = vmatpush1.bf16.msra.mxu0 %v3667_v26 }
  0x43   :  { %385 = vmatprep.subr.bf16.mxu0 %v3674_v28 }
  0x44   :  { %485 = vmatpush1.bf16.msra.mxu1 %v3467_v21 }
  0x45   :  { %486 = vmatprep.subr.bf16.mxu1 %v3487_v27 }
  0x46   :  { %386 = vmatpush1.bf16.msra.mxu0 %v3681_v32 }
  0x47   :  { %387 = vmatprep.subr.bf16.mxu0 %v3687_v33 }
  0x48   :  { %487 = vmatpush1.bf16.msra.mxu1 %v3495_v30 }
  0x49   :  { %488 = vmatprep.subr.bf16.mxu1 %v3523_v38 }
  0x4a   :  { %388 = vmatpush1.bf16.msra.mxu0 %v3697_v35 }
  0x4b   :  { %389 = vmatprep.subr.bf16.mxu0 %v3703_v37 }
  0x4c   :  { %489 = vmatpush1.bf16.msra.mxu1 %v3541_v43 }
  0x4d   :  { %490 = vmatprep.subr.bf16.mxu1 %v3555_v48 }
  0x4e   :  { %390 = vmatpush1.bf16.msra.mxu0 %v3714_v41 }
  0x4f   :  { %391 = vmatprep.subr.bf16.mxu0 %v3720_v42 }
  0x50   :  { %491 = vmatpush1.bf16.msra.mxu1 %v3589_v62 }
  0x51   :  { %558 = vmatprep.subr.bf16.mxu1 %v3602_v18 }
  0x52   :  { %392 = vmatpush1.bf16.msra.mxu0 %v3728_v47 }
  0x53   :  { %393 = vmatprep.subr.bf16.mxu0 %v3734_v50  ;;  %509 = vmatmul.mubr.bf16.vlgmr.msra.gmra.mrb[4].mxu1 %v475_v51 }
  0x54   :  { %559 = vmatpush1.bf16.msra.mxu1 %v3636_v58  ;;  %590 = vmatprep.mubr.bf16.mxu1 %v3325_v2 }
  0x55   :  { %560 = vmatprep.subr.bf16.mxu1 %v3643_v61 }
  0x56   :  { %394 = vmatpush1.bf16.msra.mxu0 %v3742_v52 }
  0x57   :  { %517 = vmatprep.subr.bf16.mxu0 %v3372_v0 }
  0x58   :  { %561 = vmatpush1.bf16.msra.mxu1 %v3650_v14 }
  0x59   :  { %412 = vmatmul.mubr.bf16.vlgmr.msra.gmra.mrb[4].mxu0 %v3623_v46  ;;  %562 = vmatprep.subr.bf16.mxu1 %v3660_v22  ;;  %v613_v46 = vmul.f32 %v612_v59, %v3438_v13 }
  0x5a   :  { %518 = vmatpush1.bf16.msra.mxu0 %v3377_v1  ;;  %549 = vmatprep.mubr.bf16.mxu0 %v3325_v2 }
  0x5b   :  { %519 = vmatprep.subr.bf16.mxu0 %v3386_v3  ;;  %v614_v8 = vadd.f32 %v613_v46, %v610_v60  ;;  %v633_v60 = vmul.f32 %v632_v54, %v3513_v36  ;;  %v636_v46 = vstv %s3777_s0  ;;  %s4012_s0 = sld [smem:[#allocation2 + $0x20a]] }
  0x5c   :  { %563 = vmatpush1.bf16.msra.mxu1 %v3667_v26 }
  0x5d   :  { %564 = vmatprep.subr.bf16.mxu1 %v3674_v28  ;;  %v618_v19 = vadd.f32 %v617_v10, %v614_v8  ;;  %v788_v8 = vmul.f32 %v787_v56, %v3433_v12  ;;  %v791_v10 = vstv %s3781_s12  ;;  %s2961_s12 = sld [smem:[#allocation2 + $0x301]] }
  0x5e   :  { %520 = vmatpush1.bf16.msra.mxu0 %v3393_v4 }
  0x5f   :  { %521 = vmatprep.subr.bf16.mxu0 %v3400_v5  ;;  %v622_v29 = vadd.f32 %v621_v23, %v618_v19  ;;  %v637_v19 = vmul.f32 %v636_v46, %v3528_v39  ;;  %v640_v23 = vstv %s3786_s9  ;;  %v789_v25 = vadd.f32 %v788_v8, %v785_v63  ;;  %s2962_s9 = sld [smem:[#allocation2 + $0x302]] }
  0x60   :  { %565 = vmatpush1.bf16.msra.mxu1 %v3681_v32  ;;  %v803_v8 = vstv %s3817_s16  ;;  %s2963_s16 = sld [smem:[#allocation2 + $0x303]] }
  0x61   :  { %566 = vmatprep.subr.bf16.mxu1 %v3687_v33  ;;  %v626_v51 = vadd.f32 %v625_v40, %v622_v29  ;;  %v792_v29 = vmul.f32 %v791_v10, %v3438_v13  ;;  %v795_v40 = vstv %s3790_s10  ;;  %s2939_s10 = sld [smem:[#allocation2 + $0x205]] }
  0x62   :  { %522 = vmatpush1.bf16.msra.mxu0 %v3407_v6  ;;  %v796_v55 = vmul.f32 %v795_v40, %v3451_v17 }
  0x63   :  { %523 = vmatprep.subr.bf16.mxu0 %v3414_v7  ;;  %v630_v59 = vadd.f32 %v629_v53, %v626_v51  ;;  %v641_v51 = vmul.f32 %v640_v23, %v3546_v44  ;;  %v644_v53 = vstv %s3796_s13  ;;  %v793_v54 = vadd.f32 %v792_v29, %v789_v25  ;;  %s4333_s13 = sld [smem:[#allocation2 + $0x309]] }
  0x64   :  { %567 = vmatpush1.bf16.msra.mxu1 %v3697_v35  ;;  %v804_v23 = vmul.f32 %v803_v8, %v3478_v24  ;;  %v807_v25 = vstv %s2927_s17  ;;  %s2940_s17 = sld [smem:[#allocation2 + $0x206]] }
  0x65   :  { %568 = vmatprep.subr.bf16.mxu1 %v3703_v37  ;;  %v634_v15 = vadd.f32 %v633_v60, %v630_v59  ;;  %v645_v59 = vmul.f32 %v644_v53, %v3560_v49  ;;  %v648_v60 = vstv %s3811_s15  ;;  %v797_v46 = vadd.f32 %v796_v55, %v793_v54  ;;  %s4037_s15 = sld [smem:[#allocation2 + $0x20b]] }
  0x66   :  { %524 = vmatpush1.bf16.msra.mxu0 %v3428_v11 }
  0x67   :  { %525 = vmatprep.subr.bf16.mxu0 %v3446_v16  ;;  %v638_v45 = vadd.f32 %v637_v19, %v634_v15  ;;  %v649_v15 = vmul.f32 %v648_v60, %v3577_v57 }
  0x68   :  { %569 = vmatpush1.bf16.msra.mxu1 %v3714_v41 }
  0x69   :  { %570 = vmatprep.subr.bf16.mxu1 %v3720_v42  ;;  %v642_v56 = vadd.f32 %v641_v51, %v638_v45  ;;  %v808_v45 = vmul.f32 %v807_v25, %v3500_v31  ;;  %v811_v51 = vstv %s2928_s18  ;;  %v827_v25 = vstv %s2932_s26  ;;  %s2941_s26 = sld [smem:[#allocation2 + $0x207]]  ;;  %s4048_s18 = sld [smem:[#allocation2 + $0x285]] }
  0x6a   :  { %526 = vmatpush1.bf16.msra.mxu0 %v3467_v21  ;;  %v812_v55 = vmul.f32 %v811_v51, %v3513_v36  ;;  %v3930_v51 = vld [vmem:[%s5314_s3 + $0x14] ss:$8 sps:$4 sm:$0xff]  }
  0x6b   :  { %527 = vmatprep.subr.bf16.mxu0 %v3487_v27  ;;  %v646_v10 = vadd.f32 %v645_v59, %v642_v56 }
  0x6c   :  { %571 = vmatpush1.bf16.msra.mxu1 %v3728_v47 }
  0x6d   :  { %572 = vmatprep.subr.bf16.mxu1 %v3734_v50  ;;  %v650_v29 = vadd.f32 %v649_v15, %v646_v10  ;;  %v823_v15 = vstv %s2931_s23  ;;  %s4065_s23 = sld [smem:[#allocation2 + $0x286]] }
  0x6e   :  { %528 = vmatpush1.bf16.msra.mxu0 %v3495_v30 }
  0x6f   :  { %529 = vmatprep.subr.bf16.mxu0 %v3523_v38  ;;  %v3849_v53 = vpack.c.bf16 %v650_v29, %v650_v29 }
  0x70   :  { %573 = vmatpush1.bf16.msra.mxu1 %v3742_v52 }
  0x71   :  { %696 = vmatprep.subr.bf16.mxu1 %v3372_v0  ;;  %v652_v56 = vunpack.c.l.bf16 %v3849_v53 }
  0x72   :  { %530 = vmatpush1.bf16.msra.mxu0 %v3541_v43 }
  0x73   :  { %531 = vmatprep.subr.bf16.mxu0 %v3555_v48  ;;  %591 = vmatmul.mubr.bf16.vlgmr.msra.gmra.mrb[8].mxu1 %v3691_v34 }
  0x74   :  { %697 = vmatpush1.bf16.msra.mxu1 %v3377_v1  ;;  %728 = vmatprep.mubr.bf16.mxu1 %v3325_v2 }
  0x75   :  { %698 = vmatprep.subr.bf16.mxu1 %v3386_v3 }
  0x76   :  { %532 = vmatpush1.bf16.msra.mxu0 %v3589_v62 }
  0x77   :  { %655 = vmatprep.subr.bf16.mxu0 %v3372_v0 }
  0x78   :  { %699 = vmatpush1.bf16.msra.mxu1 %v3393_v4 }
  0x79   :  { %550 = vmatmul.mubr.bf16.vlgmr.msra.gmra.mrb[8].mxu0 %v3691_v34  ;;  %700 = vmatprep.subr.bf16.mxu1 %v3400_v5  ;;  %v799_v34 = vstv %s3805_s14  ;;  %s4031_s14 = sld [smem:[#allocation2 + $0x284]] }
  0x7a   :  { %656 = vmatpush1.bf16.msra.mxu0 %v3377_v1  ;;  %687 = vmatprep.mubr.bf16.mxu0 %v3325_v2  ;;  %v800_v63 = vmul.f32 %v799_v34, %v3460_v20  ;;  %v815_v34 = vstv %s2929_s19  ;;  %s2957_s19 = sld [smem:[#allocation2 + $0x28a]] }
  0x7b   :  { %657 = vmatprep.subr.bf16.mxu0 %v3386_v3  ;;  %v816_v60 = vmul.f32 %v815_v34, %v3528_v39 }
  0x7c   :  { %701 = vmatpush1.bf16.msra.mxu1 %v3407_v6  ;;  %v801_v19 = vadd.f32 %v800_v63, %v797_v46  ;;  %v819_v46 = vstv %s2930_s20  ;;  %v653_v63 = vsub.f32 %v650_v29, %v652_v56  ;;  %v3954_v56 = vld [vmem:[%s5314_s3 + $0x20] ss:$8 sps:$4 sm:$0xff]   ;;  %s4385_s20 = sld [smem:[#allocation2 + $0x387]] }
  0x7d   :  { %702 = vmatprep.subr.bf16.mxu1 %v3414_v7  ;;  %v820_v10 = vmul.f32 %v819_v46, %v3546_v44 }
  0x7e   :  { %658 = vmatpush1.bf16.msra.mxu0 %v3393_v4  ;;  %v805_v40 = vadd.f32 %v804_v23, %v801_v19  ;;  %v654_v19 = vpack.c.bf16 %v653_v63, %v653_v63  ;;  %v824_v23 = vmul.f32 %v823_v15, %v3560_v49  ;;  %v3912_v49 = vld [vmem:[%s5314_s3 + $0x4] ss:$8 sps:$4 sm:$0xff]   ;;  %v3969_v63 = vld [vmem:[%s5314_s3 + $0x30] ss:$8 sps:$4 sm:$0xff]  }
  0x7f   :  { %659 = vmatprep.subr.bf16.mxu0 %v3400_v5 }
  0x80   :  { %703 = vmatpush1.bf16.msra.mxu1 %v3428_v11  ;;  %v809_v54 = vadd.f32 %v808_v45, %v805_v40  ;;  %v3923_v40 = vld [vmem:[%s5314_s3] ss:$8 sps:$4 sm:$0xff]   ;;  %v970_v45 = vstv %s2936_s27  ;;  %s3979_s27 = sld [smem:[#allocation2 + $0x280]] }
  0x81   :  { %704 = vmatprep.subr.bf16.mxu1 %v3446_v16 }
  0x82   :  { %660 = vmatpush1.bf16.msra.mxu0 %v3407_v6  ;;  %v813_v59 = vadd.f32 %v812_v55, %v809_v54  ;;  %v974_v54 = vstv %s2937_s29  ;;  %v3945_v55 = vld [vmem:[%s5314_s3 + $0x24] ss:$8 sps:$4 sm:$0xff]   ;;  %s3981_s29 = sld [smem:[#allocation2 + $0x281]] }
  0x83   :  { %661 = vmatprep.subr.bf16.mxu0 %v3414_v7  ;;  %v975_v34 = vmul.f32 %v974_v54, %v3451_v17 }
  0x84   :  { %705 = vmatpush1.bf16.msra.mxu1 %v3467_v21  ;;  %v817_v8 = vadd.f32 %v816_v60, %v813_v59  ;;  %v978_v59 = vstv %s2938_s11  ;;  %v3960_v60 = vld [vmem:[%s5314_s3 + $0x34] ss:$8 sps:$4 sm:$0xff]   ;;  %s4000_s11 = sld [smem:[#allocation2 + $0x209]] }
  0x85   :  { %706 = vmatprep.subr.bf16.mxu1 %v3487_v27  ;;  %v979_v46 = vmul.f32 %v978_v59, %v3460_v20  ;;  %v1006_v59 = vstv %s4037_s15  ;;  %s4345_s15 = sld [smem:[#allocation2 + $0x30a]] }
  0x86   :  { %662 = vmatpush1.bf16.msra.mxu0 %v3428_v11 }
  0x87   :  { %663 = vmatprep.subr.bf16.mxu0 %v3446_v16 }
  0x88   :  { %707 = vmatpush1.bf16.msra.mxu1 %v3495_v30 }
  0x89   :  { %708 = vmatprep.subr.bf16.mxu1 %v3523_v38 }
  0x8a   :  { %664 = vmatpush1.bf16.msra.mxu0 %v3467_v21 }
  0x8b   :  { %665 = vmatprep.subr.bf16.mxu0 %v3487_v27 }
  0x8c   :  { %709 = vmatpush1.bf16.msra.mxu1 %v3541_v43 }
  0x8d   :  { %710 = vmatprep.subr.bf16.mxu1 %v3555_v48 }
  0x8e   :  { %666 = vmatpush1.bf16.msra.mxu0 %v3495_v30 }
  0x8f   :  { %667 = vmatprep.subr.bf16.mxu0 %v3523_v38 }
  0x90   :  { %711 = vmatpush1.bf16.msra.mxu1 %v3589_v62 }
  0x91   :  { %834 = vmatprep.subr.bf16.mxu1 %v3372_v0  ;;  %v821_v0 = vadd.f32 %v820_v10, %v817_v8  ;;  %v982_v8 = vstv %s2939_s10  ;;  %v3975_v10 = vld [vmem:[%s5314_s3 + $0x44] ss:$8 sps:$4 sm:$0xff]   ;;  %s4122_s10 = sld [smem:[#allocation2 + $0x289]] }
  0x92   :  { %668 = vmatpush1.bf16.msra.mxu0 %v3541_v43  ;;  %v983_v15 = vmul.f32 %v982_v8, %v3478_v24 }
  0x93   :  { %669 = vmatprep.subr.bf16.mxu0 %v3555_v48  ;;  %729 = vmatmul.mubr.bf16.vlgmr.msra.gmra.mrb[12].mxu1 %v3849_v53 }
  0x94   :  { %835 = vmatpush1.bf16.msra.mxu1 %v3377_v1  ;;  %866 = vmatprep.mubr.bf16.mxu1 %v3325_v2  ;;  %v825_v1 = vadd.f32 %v824_v23, %v821_v0  ;;  %v986_v0 = vstv %s2940_s17  ;;  %s4360_s17 = sld [smem:[#allocation2 + $0x30b]] }
  0x95   :  { %836 = vmatprep.subr.bf16.mxu1 %v3386_v3  ;;  %v828_v3 = vmul.f32 %v827_v25, %v3577_v57  ;;  %v987_v23 = vmul.f32 %v986_v0, %v3500_v31  ;;  %v990_v25 = vstv %s2941_s26  ;;  %v4019_v31 = vld [vmem:[%s5312_s1] sm:$0xff]  ;;  %v1007_v0 = vmul.f32 %v1006_v59, %v3577_v57  ;;  %v4104_v57 = vld [vmem:[%s5314_s3 + $0x54] ss:$8 sps:$4 sm:$0xff]   ;;  %s4396_s26 = sld [smem:[#allocation2 + $0xc]] }
  0x96   :  { %670 = vmatpush1.bf16.msra.mxu0 %v3589_v62 }
  0x97   :  { %737 = vmatprep.subr.bf16.mxu0 %v3602_v18 }
  0x98   :  { %837 = vmatpush1.bf16.msra.mxu1 %v3393_v4  ;;  %v829_v4 = vadd.f32 %v828_v3, %v825_v1  ;;  %v1145_v1 = vstv %s3981_s29  ;;  %s4085_s29 = sld [smem:[#allocation2 + $0x287]] }
  0x99   :  { %688 = vmatmul.mubr.bf16.vlgmr.msra.gmra.mrb[12].mxu0 %v654_v19  ;;  %838 = vmatprep.subr.bf16.mxu1 %v3400_v5  ;;  %v3988_v19 = vld [vmem:[%s5314_s3 + $0x40] ss:$8 sps:$4 sm:$0xff]  }
  0x9a   :  { %738 = vmatpush1.bf16.msra.mxu0 %v3636_v58  ;;  %769 = vmatprep.mubr.bf16.mxu0 %v3325_v2  ;;  %v3886_v5 = vpack.c.bf16 %v829_v4, %v829_v4 }
  0x9b   :  { %739 = vmatprep.subr.bf16.mxu0 %v3643_v61 }
  0x9c   :  { %839 = vmatpush1.bf16.msra.mxu1 %v3407_v6  ;;  %v831_v6 = vunpack.c.l.bf16 %v3886_v5 }
  0x9d   :  { %840 = vmatprep.subr.bf16.mxu1 %v3414_v7 }
  0x9e   :  { %740 = vmatpush1.bf16.msra.mxu0 %v3650_v14  ;;  %v832_v7 = vsub.f32 %v829_v4, %v831_v6  ;;  %v991_v4 = vmul.f32 %v990_v25, %v3513_v36  ;;  %v4025_v36 = vld [vmem:[%s5312_s1 + $0x8] sm:$0xff] }
  0x9f   :  { %741 = vmatprep.subr.bf16.mxu0 %v3660_v22 }
  0xa0   :  { %841 = vmatpush1.bf16.msra.mxu1 %v3428_v11  ;;  %v833_v11 = vpack.c.bf16 %v832_v7, %v832_v7 }
  0xa1   :  { %842 = vmatprep.subr.bf16.mxu1 %v3446_v16  ;;  %v963_v16 = vstv %s2934_s24  ;;  %s4400_s24 = sld [smem:[#allocation2 + $0x8c]] }
  0xa2   :  { %742 = vmatpush1.bf16.msra.mxu0 %v3667_v26 }
  0xa3   :  { %743 = vmatprep.subr.bf16.mxu0 %v3674_v28 }
  0xa4   :  { %843 = vmatpush1.bf16.msra.mxu1 %v3467_v21  ;;  %v966_v21 = vstv %s2935_s21  ;;  %s4406_s21 = sld [smem:[#allocation2 + $0x389]] }
  0xa5   :  { %844 = vmatprep.subr.bf16.mxu1 %v3487_v27  ;;  %v967_v29 = vmul.f32 %v966_v21, %v3433_v12  ;;  %v971_v12 = vmul.f32 %v970_v45, %v3438_v13  ;;  %v4043_v21 = vld [vmem:[%s5312_s1 + $0x10] sm:$0xff]  ;;  %v1002_v45 = vstv %s4012_s0  ;;  %s2960_s0 = sld [smem:[#allocation2 + $0x300]] }
  0xa6   :  { %744 = vmatpush1.bf16.msra.mxu0 %v3681_v32 }
  0xa7   :  { %745 = vmatprep.subr.bf16.mxu0 %v3687_v33 }
  0xa8   :  { %845 = vmatpush1.bf16.msra.mxu1 %v3495_v30 }
  0xa9   :  { %846 = vmatprep.subr.bf16.mxu1 %v3523_v38 }
  0xaa   :  { %746 = vmatpush1.bf16.msra.mxu0 %v3697_v35 }
  0xab   :  { %747 = vmatprep.subr.bf16.mxu0 %v3703_v37 }
  0xac   :  { %847 = vmatpush1.bf16.msra.mxu1 %v3541_v43 }
  0xad   :  { %848 = vmatprep.subr.bf16.mxu1 %v3555_v48 }
  0xae   :  { %748 = vmatpush1.bf16.msra.mxu0 %v3714_v41 }
  0xaf   :  { %749 = vmatprep.subr.bf16.mxu0 %v3720_v42 }
  0xb0   :  { %849 = vmatpush1.bf16.msra.mxu1 %v3589_v62 }
  0xb1   :  { %916 = vmatprep.subr.bf16.mxu1 %v3602_v18  ;;  %v964_v18 = vmul.f32 %v963_v16, %v3421_v9 }
  0xb2   :  { %750 = vmatpush1.bf16.msra.mxu0 %v3728_v47 }
  0xb3   :  { %751 = vmatprep.subr.bf16.mxu0 %v3734_v50  ;;  %867 = vmatmul.mubr.bf16.vlgmr.msra.gmra.mrb[16].mxu1 %v833_v11  ;;  %v968_v9 = vadd.f32 %v967_v29, %v964_v18  ;;  %v998_v11 = vstv %s4000_s11  ;;  %s4294_s11 = sld [smem:[#allocation2 + $0x306]] }
  0xb4   :  { %917 = vmatpush1.bf16.msra.mxu1 %v3636_v58  ;;  %948 = vmatprep.mubr.bf16.mxu1 %v3325_v2  ;;  %v999_v29 = vmul.f32 %v998_v11, %v3546_v44  ;;  %v1157_v44 = vstv %s4031_s14  ;;  %v4137_v11 = vld [vmem:[%s5312_s1 + $0x38] sm:$0xff]  ;;  %s4338_s14 = sld [smem:[#allocation2 + $0x383]] }
  0xb5   :  { %918 = vmatprep.subr.bf16.mxu1 %v3643_v61  ;;  %v972_v13 = vadd.f32 %v971_v12, %v968_v9  ;;  %v4060_v12 = vld [vmem:[%s5312_s1 + $0x18] sm:$0xff] }
  0xb6   :  { %752 = vmatpush1.bf16.msra.mxu0 %v3742_v52 }
  0xb7   :  { %875 = vmatprep.subr.bf16.mxu0 %v3912_v49  ;;  %v976_v17 = vadd.f32 %v975_v34, %v972_v13  ;;  %v4071_v13 = vld [vmem:[%s5313_s2 + $0x10] sm:$0xff] }
  0xb8   :  { %919 = vmatpush1.bf16.msra.mxu1 %v3650_v14  ;;  %v1003_v34 = vmul.f32 %v4071_v13, %v1002_v45 }
  0xb9   :  { %770 = vmatmul.mubr.bf16.vlgmr.msra.gmra.mrb[16].mxu0 %v3849_v53  ;;  %920 = vmatprep.subr.bf16.mxu1 %v3660_v22  ;;  %v3939_v53 = vld [vmem:[%s5314_s3 + $0x10] ss:$8 sps:$4 sm:$0xff]   ;;  %v980_v20 = vadd.f32 %v979_v46, %v976_v17  ;;  %v4080_v46 = vld [vmem:[%s5312_s1 + $0x20] sm:$0xff] }
  0xba   :  { %876 = vmatpush1.bf16.msra.mxu0 %v3923_v40  ;;  %907 = vmatprep.mubr.bf16.mxu0 %v3325_v2  ;;  %v1158_v8 = vmul.f32 %v4080_v46, %v1157_v44  ;;  %v4165_v44 = vld [vmem:[%s5314_s3 + $0x70] ss:$8 sps:$4 sm:$0xff]  }
  0xbb   :  { %877 = vmatprep.subr.bf16.mxu0 %v3930_v51  ;;  %v984_v24 = vadd.f32 %v983_v15, %v980_v20  ;;  %v1161_v20 = vstv %s4048_s18  ;;  %s4365_s18 = sld [smem:[#allocation2 + $0x385]] }
  0xbc   :  { %921 = vmatpush1.bf16.msra.mxu1 %v3667_v26 }
  0xbd   :  { %922 = vmatprep.subr.bf16.mxu1 %v3674_v28  ;;  %v988_v3 = vadd.f32 %v987_v23, %v984_v24  ;;  %v4094_v23 = vld [vmem:[%s5312_s1 + $0x28] sm:$0xff] }
  0xbe   :  { %878 = vmatpush1.bf16.msra.mxu0 %v3939_v53  ;;  %v1162_v25 = vmul.f32 %v4094_v23, %v1161_v20  ;;  %v1181_v20 = vstv %s2957_s19  ;;  %s2979_s19 = sld [smem:[#allocation2 + $0x386]] }
  0xbf   :  { %879 = vmatprep.subr.bf16.mxu0 %v3945_v55  ;;  %v992_v6 = vadd.f32 %v991_v4, %v988_v3  ;;  %v4112_v4 = vld [vmem:[%s5312_s1 + $0x30] sm:$0xff] }
  0xc0   :  { %923 = vmatpush1.bf16.msra.mxu1 %v3681_v32 }
  0xc1   :  { %924 = vmatprep.subr.bf16.mxu1 %v3687_v33 }
  0xc2   :  { %880 = vmatpush1.bf16.msra.mxu0 %v3954_v56 }
  0xc3   :  { %881 = vmatprep.subr.bf16.mxu0 %v3960_v60 }
  0xc4   :  { %925 = vmatpush1.bf16.msra.mxu1 %v3697_v35 }
  0xc5   :  { %926 = vmatprep.subr.bf16.mxu1 %v3703_v37 }
  0xc6   :  { %882 = vmatpush1.bf16.msra.mxu0 %v3969_v63 }
  0xc7   :  { %883 = vmatprep.subr.bf16.mxu0 %v3975_v10 }
  0xc8   :  { %927 = vmatpush1.bf16.msra.mxu1 %v3714_v41 }
  0xc9   :  { %928 = vmatprep.subr.bf16.mxu1 %v3720_v42 }
  0xca   :  { %884 = vmatpush1.bf16.msra.mxu0 %v3988_v19 }
  0xcb   :  { %885 = vmatprep.subr.bf16.mxu0 %v3487_v27  ;;  %v1142_v27 = vstv %s3979_s27  ;;  %s4416_s27 = sld [smem:[#allocation2 + $0x38a]] }
  0xcc   :  { %929 = vmatpush1.bf16.msra.mxu1 %v3728_v47 }
  0xcd   :  { %930 = vmatprep.subr.bf16.mxu1 %v3734_v50 }
  0xce   :  { %886 = vmatpush1.bf16.msra.mxu0 %v3495_v30  ;;  %v994_v30 = vstv %s3991_s25  ;;  %s4099_s25 = sld [smem:[#allocation2 + $0x288]] }
  0xcf   :  { %887 = vmatprep.subr.bf16.mxu0 %v3523_v38  ;;  %v1143_v38 = vmul.f32 %v4019_v31, %v1142_v27  ;;  %v995_v7 = vmul.f32 %v994_v30, %v3528_v39  ;;  %v1153_v39 = vstv %s4006_s28  ;;  %v1165_v27 = vstv %s4065_s23  ;;  %s2964_s23 = sld [smem:[#allocation2 + $0x304]]  ;;  %s4303_s28 = sld [smem:[#allocation2 + $0x307]] }
  0xd0   :  { %931 = vmatpush1.bf16.msra.mxu1 %v3742_v52  ;;  %v1166_v30 = vmul.f32 %v4112_v4, %v1165_v27 }
  0xd1   :  { %1054 = vmatprep.subr.bf16.mxu1 %v3912_v49 }
  0xd2   :  { %888 = vmatpush1.bf16.msra.mxu0 %v3541_v43  ;;  %v1146_v43 = vmul.f32 %v4025_v36, %v1145_v1 }
  0xd3   :  { %889 = vmatprep.subr.bf16.mxu0 %v3555_v48  ;;  %949 = vmatmul.mubr.bf16.vlgmr.msra.gmra.mrb[20].mxu1 %v3886_v5  ;;  %v1149_v48 = vstv %s3995_s8  ;;  %s4589_s8 = sld [smem:[#allocation2 + $0x483]] }
  0xd4   :  { %1055 = vmatpush1.bf16.msra.mxu1 %v3923_v40  ;;  %1086 = vmatprep.mubr.bf16.mxu1 %v3325_v2  ;;  %v1147_v16 = vadd.f32 %v1146_v43, %v1143_v38  ;;  %v1150_v18 = vmul.f32 %v4043_v21, %v1149_v48  ;;  %v4118_v38 = vld [vmem:[%s5314_s3 + $0x50] ss:$8 sps:$4 sm:$0xff]   ;;  %v1169_v43 = vstv %s4085_s29  ;;  %v4127_v48 = vld [vmem:[%s5314_s3 + $0x64] ss:$8 sps:$4 sm:$0xff]   ;;  %s2958_s29 = sld [smem:[#allocation2 + $0x28b]] }
  0xd5   :  { %1056 = vmatprep.subr.bf16.mxu1 %v3930_v51 }
  0xd6   :  { %890 = vmatpush1.bf16.msra.mxu0 %v3589_v62  ;;  %v996_v62 = vadd.f32 %v995_v7, %v992_v6  ;;  %v1151_v9 = vadd.f32 %v1150_v18, %v1147_v16  ;;  %v1170_v16 = vmul.f32 %v4137_v11, %v1169_v43  ;;  %v4143_v18 = vld [vmem:[%s5314_s3 + $0x60] ss:$8 sps:$4 sm:$0xff]  }
  0xd7   :  { %1013 = vmatprep.subr.bf16.mxu0 %v3912_v49 }
  0xd8   :  { %1057 = vmatpush1.bf16.msra.mxu1 %v3939_v53  ;;  %v1000_v54 = vadd.f32 %v999_v29, %v996_v62  ;;  %v4150_v62 = vld [vmem:[%s5314_s3 + $0x74] ss:$8 sps:$4 sm:$0xff]  }
  0xd9   :  { %908 = vmatmul.mubr.bf16.vlgmr.msra.gmra.mrb[20].mxu0 %v3886_v5  ;;  %1058 = vmatprep.subr.bf16.mxu1 %v3945_v55  ;;  %v1154_v5 = vmul.f32 %v4060_v12, %v1153_v39  ;;  %v1173_v39 = vstv %s4099_s25  ;;  %s4584_s25 = sld [smem:[#allocation2 + $0x409]] }
  0xda   :  { %1014 = vmatpush1.bf16.msra.mxu0 %v3923_v40  ;;  %1045 = vmatprep.mubr.bf16.mxu0 %v3325_v2  ;;  %v1004_v15 = vadd.f32 %v1003_v34, %v1000_v54  ;;  %v1177_v54 = vstv %s4122_s10  ;;  %v1185_v27 = vstv %s2958_s29  ;;  %s2965_s29 = sld [smem:[#allocation2 + $0x305]]  ;;  %s4320_s10 = sld [smem:[#allocation2 + $0x382]] }
  0xdb   :  { %1015 = vmatprep.subr.bf16.mxu0 %v3930_v51  ;;  %v1155_v17 = vadd.f32 %v1154_v5, %v1151_v9  ;;  %v4159_v9 = vld [vmem:[%s5313_s2] sm:$0xff] }
  0xdc   :  { %1059 = vmatpush1.bf16.msra.mxu1 %v3954_v56  ;;  %v1008_v1 = vadd.f32 %v1007_v0, %v1004_v15  ;;  %v1174_v5 = vmul.f32 %v4159_v9, %v1173_v39  ;;  %v4186_v0 = vld [vmem:[%s5315_s4 + $0x4] ss:$8 sps:$4 sm:$0xff]  }
  0xdd   :  { %1060 = vmatprep.subr.bf16.mxu1 %v3960_v60  ;;  %v1159_v24 = vadd.f32 %v1158_v8, %v1155_v17  ;;  %v4176_v17 = vld [vmem:[%s5313_s2 + $0x8] sm:$0xff] }
  0xde   :  { %1016 = vmatpush1.bf16.msra.mxu0 %v3939_v53  ;;  %v4130_v6 = vpack.c.bf16 %v1008_v1, %v1008_v1  ;;  %v1178_v8 = vmul.f32 %v4176_v17, %v1177_v54  ;;  %v4235_v54 = vld [vmem:[%s5315_s4] ss:$8 sps:$4 sm:$0xff]  }
  0xdf   :  { %1017 = vmatprep.subr.bf16.mxu0 %v3945_v55  ;;  %v1163_v3 = vadd.f32 %v1162_v25, %v1159_v24  ;;  %v1182_v25 = vmul.f32 %v4071_v13, %v1181_v20  ;;  %v4250_v20 = vld [vmem:[%s5315_s4 + $0x10] ss:$8 sps:$4 sm:$0xff]  }
  0xe0   :  { %1061 = vmatpush1.bf16.msra.mxu1 %v3969_v63  ;;  %v1010_v29 = vunpack.c.l.bf16 %v4130_v6 }
  0xe1   :  { %1062 = vmatprep.subr.bf16.mxu1 %v3975_v10  ;;  %v1167_v7 = vadd.f32 %v1166_v30, %v1163_v3  ;;  %v4198_v3 = vld [vmem:[%s5313_s2 + $0x18] sm:$0xff] }
  0xe2   :  { %1018 = vmatpush1.bf16.msra.mxu0 %v3954_v56  ;;  %v1011_v34 = vsub.f32 %v1008_v1, %v1010_v29  ;;  %v1186_v30 = vmul.f32 %v4198_v3, %v1185_v27  ;;  %v1358_v27 = vstv %s2962_s9  ;;  %s4317_s9 = sld [smem:[#allocation2 + $0x308]] }
  0xe3   :  { %1019 = vmatprep.subr.bf16.mxu0 %v3960_v60  ;;  %v1171_v45 = vadd.f32 %v1170_v16, %v1167_v7 }
  0xe4   :  { %1063 = vmatpush1.bf16.msra.mxu1 %v3988_v19  ;;  %v1012_v15 = vpack.c.bf16 %v1011_v34, %v1011_v34  ;;  %v4242_v34 = vld [vmem:[%s5315_s4 + $0x14] ss:$8 sps:$4 sm:$0xff]  }
  0xe5   :  { %1064 = vmatprep.subr.bf16.mxu1 %v4104_v57  ;;  %v1175_v59 = vadd.f32 %v1174_v5, %v1171_v45 }
  0xe6   :  { %1020 = vmatpush1.bf16.msra.mxu0 %v3969_v63 }
  0xe7   :  { %1021 = vmatprep.subr.bf16.mxu0 %v3975_v10  ;;  %v1179_v24 = vadd.f32 %v1178_v8, %v1175_v59  ;;  %v1351_v59 = vstv %s2960_s0  ;;  %v1354_v8 = vstv %s2961_s12  ;;  %s4308_s0 = sld [smem:[#allocation2 + $0x380]]  ;;  %s4310_s12 = sld [smem:[#allocation2 + $0x381]] }
  0xe8   :  { %1065 = vmatpush1.bf16.msra.mxu1 %v4118_v38 }
  0xe9   :  { %1066 = vmatprep.subr.bf16.mxu1 %v4127_v48  ;;  %v1183_v1 = vadd.f32 %v1182_v25, %v1179_v24  ;;  %v1352_v24 = vmul.f32 %v4019_v31, %v1351_v59  ;;  %v1355_v25 = vmul.f32 %v4025_v36, %v1354_v8 }
  0xea   :  { %1022 = vmatpush1.bf16.msra.mxu0 %v3988_v19 }
  0xeb   :  { %1023 = vmatprep.subr.bf16.mxu0 %v4104_v57 }
  0xec   :  { %1067 = vmatpush1.bf16.msra.mxu1 %v4143_v18 }
  0xed   :  { %1068 = vmatprep.subr.bf16.mxu1 %v4150_v62 }
  0xee   :  { %1024 = vmatpush1.bf16.msra.mxu0 %v4118_v38 }
  0xef   :  { %1025 = vmatprep.subr.bf16.mxu0 %v4127_v48 }
  0xf0   :  { %1069 = vmatpush1.bf16.msra.mxu1 %v4165_v44 }
  0xf1   :  { %1192 = vmatprep.subr.bf16.mxu1 %v3912_v49 }
  0xf2   :  { %1026 = vmatpush1.bf16.msra.mxu0 %v4143_v18 }
  0xf3   :  { %1027 = vmatprep.subr.bf16.mxu0 %v4150_v62  ;;  %1087 = vmatmul.mubr.bf16.vlgmr.msra.gmra.mrb[24].mxu1 %v4130_v6 }
  0xf4   :  { %1193 = vmatpush1.bf16.msra.mxu1 %v3923_v40  ;;  %1224 = vmatprep.mubr.bf16.mxu1 %v3325_v2 }
  0xf5   :  { %1194 = vmatprep.subr.bf16.mxu1 %v3930_v51 }
  0xf6   :  { %1028 = vmatpush1.bf16.msra.mxu0 %v4165_v44 }
  0xf7   :  { %1095 = vmatprep.subr.bf16.mxu0 %v4186_v0 }
  0xf8   :  { %1195 = vmatpush1.bf16.msra.mxu1 %v3939_v53 }
  0xf9   :  { %1046 = vmatmul.mubr.bf16.vlgmr.msra.gmra.mrb[24].mxu0 %v1012_v15  ;;  %1196 = vmatprep.subr.bf16.mxu1 %v3945_v55  ;;  %v4257_v15 = vld [vmem:[%s5315_s4 + $0x24] ss:$8 sps:$4 sm:$0xff]  }
  0xfa   :  { %1096 = vmatpush1.bf16.msra.mxu0 %v3636_v58  ;;  %1127 = vmatprep.mubr.bf16.mxu0 %v3325_v2  ;;  %v1187_v58 = vadd.f32 %v1186_v30, %v1183_v1  ;;  %v4274_v1 = vld [vmem:[%s5315_s4 + $0x34] ss:$8 sps:$4 sm:$0xff]   ;;  %v1356_v30 = vadd.f32 %v1355_v25, %v1352_v24  ;;  %v1374_v24 = vstv %s4294_s11  ;;  %s4692_s11 = sld [smem:[#allocation2 + $0x488]] }
  0xfb   :  { %1097 = vmatprep.subr.bf16.mxu0 %v3643_v61 }
  0xfc   :  { %1197 = vmatpush1.bf16.msra.mxu1 %v3954_v56  ;;  %v4209_v61 = vpack.c.bf16 %v1187_v58, %v1187_v58 }
  0xfd   :  { %1198 = vmatprep.subr.bf16.mxu1 %v3960_v60 }
  0xfe   :  { %1098 = vmatpush1.bf16.msra.mxu0 %v3650_v14  ;;  %v1189_v43 = vunpack.c.l.bf16 %v4209_v61 }
  0xff   :  { %1099 = vmatprep.subr.bf16.mxu0 %v3660_v22 }
 0x100   :  { %1199 = vmatpush1.bf16.msra.mxu1 %v3969_v63 }
 0x101   :  { %1200 = vmatprep.subr.bf16.mxu1 %v3975_v10 }
 0x102   :  { %1100 = vmatpush1.bf16.msra.mxu0 %v3667_v26 }
 0x103   :  { %1101 = vmatprep.subr.bf16.mxu0 %v3674_v28  ;;  %v1190_v28 = vsub.f32 %v1187_v58, %v1189_v43  ;;  %v1359_v58 = vmul.f32 %v4043_v21, %v1358_v27  ;;  %v4289_v43 = vld [vmem:[%s5315_s4 + $0x44] ss:$8 sps:$4 sm:$0xff]  }
 0x104   :  { %1201 = vmatpush1.bf16.msra.mxu1 %v3988_v19 }
 0x105   :  { %1202 = vmatprep.subr.bf16.mxu1 %v4104_v57  ;;  %v1191_v5 = vpack.c.bf16 %v1190_v28, %v1190_v28  ;;  %v1366_v28 = vstv %s2964_s23  ;;  %s4393_s23 = sld [smem:[#allocation2 + $0x388]] }
 0x106   :  { %1102 = vmatpush1.bf16.msra.mxu0 %v3681_v32  ;;  %v292_v14 = vpop.f32.mrb[0].mxu1 }
 0x107   :  { %1103 = vmatprep.subr.bf16.mxu0 %v3687_v33  ;;  %v294_v22 = vpop.f32.mrb[1].mxu1 }
 0x108   :  { %1203 = vmatpush1.bf16.msra.mxu1 %v4118_v38  ;;  %v296_v7 = vpop.f32.mrb[2].mxu1 }
 0x109   :  { %v297_v26 = vpop.f32.mrb[3].mxu1  ;;  %1204 = vmatprep.subr.bf16.mxu1 %v4127_v48  ;;  %v1360_v7 = vadd.f32 %v1359_v58, %v1356_v30  ;;  %v1375_v30 = vmul.f32 %v4112_v4, %v1374_v24  ;;  %v1541_v24 = vstv %s4338_s14  ;;  %s5068_s14 = sld [smem:[#allocation2 + $0x28c]] }
 0x10a   :  { %1104 = vmatpush1.bf16.msra.mxu0 %v3697_v35 }
 0x10b   :  { %1105 = vmatprep.subr.bf16.mxu0 %v3703_v37 }
 0x10c   :  { %v251_v16 = vpop.f32.mrb[0].mxu0  ;;  %1205 = vmatpush1.bf16.msra.mxu1 %v4143_v18 }
 0x10d   :  { %v4221_v32 = vadd.f32 %v292_v14, %v251_v16  ;;  %v253_v33 = vpop.f32.mrb[1].mxu0  ;;  %1206 = vmatprep.subr.bf16.mxu1 %v4150_v62  ;;  %v1362_v14 = vstv %s2963_s16  ;;  %s4352_s16 = sld [smem:[#allocation2 + $0x384]] }
 0x10e   :  { %v4224_v39 = vadd.f32 %v294_v22, %v253_v33  ;;  %1106 = vmatpush1.bf16.msra.mxu0 %v3714_v41  ;;  %v255_v29 = vpop.f32.mrb[2].mxu0  ;;  %v4283_v22 = vld [vmem:[%s5315_s4 + $0x30] ss:$8 sps:$4 sm:$0xff]   ;;  %v1363_v26 = vmul.f32 %v4060_v12, %v1362_v14  ;;  %v1367_v33 = vmul.f32 %v4080_v46, %v1366_v28  ;;  %v1382_v28 = vstv %s4317_s9  ;;  %s4704_s9 = sld [smem:[#allocation2 + $0x18c]] }
 0x10f   :  { %v256_v45 = vpop.f32.mrb[3].mxu0  ;;  %1107 = vmatprep.subr.bf16.mxu0 %v3720_v42 }
 0x110   :  { %1207 = vmatpush1.bf16.msra.mxu1 %v4165_v44  ;;  %v1364_v16 = vadd.f32 %v1363_v26, %v1360_v7  ;;  %v1370_v45 = vstv %s2965_s29  ;;  %v1378_v7 = vstv %s4303_s28  ;;  %v1533_v26 = vstv %s4310_s12  ;;  %s4430_s29 = sld [smem:[#allocation2 + $0x38b]]  ;;  %s2987_s12 = sld [smem:[#allocation2 + $0x401]] }
 0x111   :  { %1274 = vmatprep.subr.bf16.mxu1 %v4186_v0  ;;  %v1371_v8 = vmul.f32 %v4094_v23, %v1370_v45  ;;  %s5023_s28 = sld [smem:[#allocation2 + $0x50b]] }
 0x112   :  { %1108 = vmatpush1.bf16.msra.mxu0 %v3728_v47  ;;  %v1368_v59 = vadd.f32 %v1367_v33, %v1364_v16  ;;  %v1534_v33 = vmul.f32 %v4025_v36, %v1533_v26 }
 0x113   :  { %1109 = vmatprep.subr.bf16.mxu0 %v3734_v50  ;;  %1225 = vmatmul.mubr.bf16.vlgmr.msra.gmra.mrb[28].mxu1 %v1191_v5 }
 0x114   :  { %1275 = vmatpush1.bf16.msra.mxu1 %v4235_v54  ;;  %1306 = vmatprep.mubr.bf16.mxu1 %v3325_v2  ;;  %v1372_v27 = vadd.f32 %v1371_v8, %v1368_v59 }
 0x115   :  { %1276 = vmatprep.subr.bf16.mxu1 %v4242_v34 }
 0x116   :  { %1110 = vmatpush1.bf16.msra.mxu0 %v3742_v52 }
 0x117   :  { %1233 = vmatprep.subr.bf16.mxu0 %v3912_v49 }
 0x118   :  { %1277 = vmatpush1.bf16.msra.mxu1 %v4250_v20 }
 0x119   :  { %1128 = vmatmul.mubr.bf16.vlgmr.msra.gmra.mrb[28].mxu0 %v4130_v6  ;;  %1278 = vmatprep.subr.bf16.mxu1 %v4257_v15  ;;  %v4268_v6 = vld [vmem:[%s5315_s4 + $0x20] ss:$8 sps:$4 sm:$0xff]  }
 0x11a   :  { %1234 = vmatpush1.bf16.msra.mxu0 %v3923_v40  ;;  %1265 = vmatprep.mubr.bf16.mxu0 %v3325_v2 }
 0x11b   :  { %1235 = vmatprep.subr.bf16.mxu0 %v3930_v51 }
 0x11c   :  { %1279 = vmatpush1.bf16.msra.mxu1 %v4268_v6 }
 0x11d   :  { %1280 = vmatprep.subr.bf16.mxu1 %v4274_v1 }
 0x11e   :  { %1236 = vmatpush1.bf16.msra.mxu0 %v3939_v53 }
 0x11f   :  { %1237 = vmatprep.subr.bf16.mxu0 %v3945_v55 }
 0x120   :  { %1281 = vmatpush1.bf16.msra.mxu1 %v4283_v22 }
 0x121   :  { %1282 = vmatprep.subr.bf16.mxu1 %v4289_v43 }
 0x122   :  { %1238 = vmatpush1.bf16.msra.mxu0 %v3954_v56 }
 0x123   :  { %1239 = vmatprep.subr.bf16.mxu0 %v3960_v60 }
 0x124   :  { %1283 = vmatpush1.bf16.msra.mxu1 %v3697_v35 }
 0x125   :  { %1284 = vmatprep.subr.bf16.mxu1 %v3703_v37 }
 0x126   :  { %1240 = vmatpush1.bf16.msra.mxu0 %v3969_v63  ;;  %v4301_v29 = vpop.f32.mrb[4].mxu1 }
 0x127   :  { %1241 = vmatprep.subr.bf16.mxu0 %v3975_v10  ;;  %v4306_v5 = vpop.f32.mrb[5].mxu1 }
 0x128   :  { %1285 = vmatpush1.bf16.msra.mxu1 %v3714_v41  ;;  %v514_v35 = vpop.f32.mrb[6].mxu1 }
 0x129   :  { %v515_v37 = vpop.f32.mrb[7].mxu1  ;;  %1286 = vmatprep.subr.bf16.mxu1 %v3720_v42  ;;  %v1383_v35 = vmul.f32 %v4159_v9, %v1382_v28 }
 0x12a   :  { %1242 = vmatpush1.bf16.msra.mxu0 %v3988_v19  ;;  %v1386_v37 = vstv %s4333_s13  ;;  %s4719_s13 = sld [smem:[#allocation2 + $0x48a]] }
 0x12b   :  { %1243 = vmatprep.subr.bf16.mxu0 %v4104_v57 }
 0x12c   :  { %v413_v41 = vpop.f32.mrb[4].mxu0  ;;  %1287 = vmatpush1.bf16.msra.mxu1 %v3728_v47 }
 0x12d   :  { %v4324_v42 = vadd.f32 %v413_v41, %v4221_v32  ;;  %v415_v25 = vpop.f32.mrb[5].mxu0  ;;  %1288 = vmatprep.subr.bf16.mxu1 %v3734_v50  ;;  %v1530_v32 = vstv %s4308_s0  ;;  %v1376_v50 = vadd.f32 %v1375_v30, %v1372_v27  ;;  %v1390_v27 = vstv %s4345_s15  ;;  %s2986_s0 = sld [smem:[#allocation2 + $0x400]]  ;;  %s2988_s15 = sld [smem:[#allocation2 + $0x402]] }
 0x12e   :  { %v4329_v58 = vadd.f32 %v415_v25, %v4224_v39  ;;  %v417_v14 = vpop.f32.mrb[6].mxu0  ;;  %1244 = vmatpush1.bf16.msra.mxu0 %v4118_v38  ;;  %v1379_v39 = vmul.f32 %v4137_v11, %v1378_v7  ;;  %v1531_v16 = vmul.f32 %v4019_v31, %v1530_v32  ;;  %v1387_v25 = vmul.f32 %v4176_v17, %v1386_v37 }
 0x12f   :  { %v418_v47 = vpop.f32.mrb[7].mxu0  ;;  %1245 = vmatprep.subr.bf16.mxu0 %v4127_v48  ;;  %v1542_v14 = vmul.f32 %v4060_v12, %v1541_v24  ;;  %v1545_v7 = vstv %s4352_s16  ;;  %v1394_v32 = vstv %s4360_s17  ;;  %s4631_s16 = sld [smem:[#allocation2 + $0x485]]  ;;  %s4951_s17 = sld [smem:[#allocation2 + $0x580]] }
 0x130   :  { %1289 = vmatpush1.bf16.msra.mxu1 %v3742_v52  ;;  %v1537_v52 = vstv %s4320_s10  ;;  %v1380_v45 = vadd.f32 %v1379_v39, %v1376_v50  ;;  %v1535_v59 = vadd.f32 %v1534_v33, %v1531_v16  ;;  %v1391_v47 = vmul.f32 %v4071_v13, %v1390_v27  ;;  %s4709_s10 = sld [smem:[#allocation2 + $0x489]] }
 0x131   :  { %1442 = vmatprep.subr.bf16.mxu1 %v3912_v49  ;;  %v1538_v8 = vmul.f32 %v4043_v21, %v1537_v52  ;;  %v1546_v50 = vmul.f32 %v4080_v46, %v1545_v7  ;;  %v1549_v39 = vstv %s4365_s18  ;;  %v1395_v16 = vmul.f32 %v4198_v3, %v1394_v32  ;;  %s4953_s18 = sld [smem:[#allocation2 + $0x581]] }
 0x132   :  { %1246 = vmatpush1.bf16.msra.mxu0 %v4143_v18  ;;  %v1384_v41 = vadd.f32 %v1383_v35, %v1380_v45  ;;  %v1550_v52 = vmul.f32 %v4094_v23, %v1549_v39  ;;  %v1553_v45 = vstv %s2979_s19  ;;  %v423_v32 = vstv %s4396_s26  ;;  %s2991_s26 = sld [smem:[#allocation2 + $0x405]] }
 0x133   :  { %1247 = vmatprep.subr.bf16.mxu0 %v4150_v62  ;;  %1307 = vmatmul.mubr.bf16.vlgmr.msra.gmra.mrb[32].mxu1 %v4209_v61  ;;  %v1539_v30 = vadd.f32 %v1538_v8, %v1535_v59  ;;  %v1554_v8 = vmul.f32 %v4112_v4, %v1553_v45 }
 0x134   :  { %1443 = vmatpush1.bf16.msra.mxu1 %v3923_v40  ;;  %1474 = vmatprep.mubr.bf16.mxu1 %v3325_v2 }
 0x135   :  { %1444 = vmatprep.subr.bf16.mxu1 %v3930_v51  ;;  %v1543_v26 = vadd.f32 %v1542_v14, %v1539_v30 }
 0x136   :  { %1248 = vmatpush1.bf16.msra.mxu0 %v4165_v44 }
 0x137   :  { %1401 = vmatprep.subr.bf16.mxu0 %v3912_v49  ;;  %v1547_v33 = vadd.f32 %v1546_v50, %v1543_v26 }
 0x138   :  { %1445 = vmatpush1.bf16.msra.mxu1 %v3939_v53 }
 0x139   :  { %1266 = vmatmul.mubr.bf16.vlgmr.msra.gmra.mrb[32].mxu0 %v4209_v61  ;;  %1446 = vmatprep.subr.bf16.mxu1 %v3945_v55  ;;  %v1388_v61 = vadd.f32 %v1387_v25, %v1384_v41  ;;  %v1551_v59 = vadd.f32 %v1550_v52, %v1547_v33  ;;  %v1557_v41 = vstv %s4385_s20  ;;  %s2989_s20 = sld [smem:[#allocation2 + $0x403]] }
 0x13a   :  { %1402 = vmatpush1.bf16.msra.mxu0 %v3923_v40  ;;  %1433 = vmatprep.mubr.bf16.mxu0 %v3325_v2  ;;  %v1558_v7 = vmul.f32 %v4137_v11, %v1557_v41 }
 0x13b   :  { %1403 = vmatprep.subr.bf16.mxu0 %v3930_v51  ;;  %v1392_v28 = vadd.f32 %v1391_v47, %v1388_v61  ;;  %v1555_v14 = vadd.f32 %v1554_v8, %v1551_v59  ;;  %v1561_v61 = vstv %s4393_s23  ;;  %s2990_s23 = sld [smem:[#allocation2 + $0x404]] }
 0x13c   :  { %1447 = vmatpush1.bf16.msra.mxu1 %v3954_v56  ;;  %v1562_v45 = vmul.f32 %v4159_v9, %v1561_v61 }
 0x13d   :  { %1448 = vmatprep.subr.bf16.mxu1 %v3960_v60  ;;  %v1396_v35 = vadd.f32 %v1395_v16, %v1392_v28  ;;  %v602_v28 = vstv %s4400_s24  ;;  %v1559_v52 = vadd.f32 %v1558_v7, %v1555_v14  ;;  %s4545_s24 = sld [smem:[#allocation2 + $0x406]] }
 0x13e   :  { %1404 = vmatpush1.bf16.msra.mxu0 %v3939_v53 }
 0x13f   :  { %1405 = vmatprep.subr.bf16.mxu0 %v3945_v55  ;;  %v4409_v30 = vpack.c.bf16 %v1396_v35, %v1396_v35 }
 0x140   :  { %1449 = vmatpush1.bf16.msra.mxu1 %v3969_v63 }
 0x141   :  { %1450 = vmatprep.subr.bf16.mxu1 %v3975_v10  ;;  %v1398_v39 = vunpack.c.l.bf16 %v4409_v30 }
 0x142   :  { %1406 = vmatpush1.bf16.msra.mxu0 %v3954_v56 }
 0x143   :  { %1407 = vmatprep.subr.bf16.mxu0 %v3960_v60 }
 0x144   :  { %1451 = vmatpush1.bf16.msra.mxu1 %v3988_v19 }
 0x145   :  { %1452 = vmatprep.subr.bf16.mxu1 %v4104_v57 }
 0x146   :  { %1408 = vmatpush1.bf16.msra.mxu0 %v3969_v63  ;;  %v592_v37 = vpop.f32.mrb[8].mxu1 }
 0x147   :  { %1409 = vmatprep.subr.bf16.mxu0 %v3975_v10  ;;  %v594_v24 = vpop.f32.mrb[9].mxu1 }
 0x148   :  { %1453 = vmatpush1.bf16.msra.mxu1 %v4118_v38  ;;  %v596_v25 = vpop.f32.mrb[10].mxu1 }
 0x149   :  { %v597_v27 = vpop.f32.mrb[11].mxu1  ;;  %1454 = vmatprep.subr.bf16.mxu1 %v4127_v48  ;;  %v1565_v25 = vstv %s4406_s21  ;;  %s4554_s21 = sld [smem:[#allocation2 + $0x407]] }
 0x14a   :  { %1410 = vmatpush1.bf16.msra.mxu0 %v3988_v19  ;;  %v1399_v27 = vsub.f32 %v1396_v35, %v1398_v39  ;;  %v1569_v35 = vstv %s4416_s27  ;;  %v1573_v39 = vstv %s4430_s29  ;;  %s4559_s27 = sld [smem:[#allocation2 + $0x480]]  ;;  %s4561_s29 = sld [smem:[#allocation2 + $0x481]] }
 0x14b   :  { %1411 = vmatprep.subr.bf16.mxu0 %v4104_v57 }
 0x14c   :  { %v551_v47 = vpop.f32.mrb[8].mxu0  ;;  %1455 = vmatpush1.bf16.msra.mxu1 %v4143_v18 }
 0x14d   :  { %v552_v26 = vadd.f32 %v551_v47, %v4301_v29  ;;  %v553_v50 = vpop.f32.mrb[9].mxu0  ;;  %1456 = vmatprep.subr.bf16.mxu1 %v4150_v62  ;;  %v424_v29 = vadd.f32 %v423_v32, %v4324_v42 }
 0x14e   :  { %v554_v16 = vadd.f32 %v553_v50, %v4306_v5  ;;  %v555_v33 = vpop.f32.mrb[10].mxu0  ;;  %1412 = vmatpush1.bf16.msra.mxu0 %v4118_v38  ;;  %v1570_v50 = vmul.f32 %v4071_v13, %v1569_v35 }
 0x14f   :  { %v599_v59 = vadd.f32 %v592_v37, %v552_v26  ;;  %v556_v8 = vpop.f32.mrb[11].mxu0  ;;  %1413 = vmatprep.subr.bf16.mxu0 %v4127_v48  ;;  %v1563_v37 = vadd.f32 %v1562_v45, %v1559_v52  ;;  %v1400_v26 = vpack.c.bf16 %v1399_v27, %v1399_v27 }
 0x150   :  { %v600_v41 = vadd.f32 %v594_v24, %v554_v16  ;;  %1457 = vmatpush1.bf16.msra.mxu1 %v4165_v44  ;;  %v1566_v24 = vmul.f32 %v4176_v17, %v1565_v25  ;;  %v1574_v16 = vmul.f32 %v4198_v3, %v1573_v39  ;;  %v4477_v25 = vld [vmem:[%s5315_s4 + $0x40] ss:$8 sps:$4 sm:$0xff]   ;;  %v4515_v39 = vld [vmem:[%s5315_s4 + $0x74] ss:$8 sps:$4 sm:$0xff]  }
 0x151   :  { %v603_v5 = vadd.f32 %v602_v28, %v599_v59  ;;  %1580 = vmatprep.subr.bf16.mxu1 %v3912_v49 }
 0x152   :  { %v1321_v14 = vmul.f32 %v600_v41, %v4329_v58  ;;  %v1323_v7 = vmul.f32 %v600_v41, %v424_v29  ;;  %1414 = vmatpush1.bf16.msra.mxu0 %v4143_v18 }
 0x153   :  { %v1320_v61 = vmul.f32 %v603_v5, %v424_v29  ;;  %v1324_v42 = vmul.f32 %v603_v5, %v4329_v58  ;;  %1415 = vmatprep.subr.bf16.mxu0 %v4150_v62  ;;  %1475 = vmatmul.mubr.bf16.vlgmr.msra.gmra.mrb[36].mxu1 %v4409_v30  ;;  %v1567_v58 = vadd.f32 %v1566_v24, %v1563_v37  ;;  %v4483_v5 = vld [vmem:[%s5315_s4 + $0x54] ss:$8 sps:$4 sm:$0xff]   ;;  %v4495_v24 = vld [vmem:[%s5315_s4 + $0x50] ss:$8 sps:$4 sm:$0xff]  }
 0x154   :  { %1581 = vmatpush1.bf16.msra.mxu1 %v3923_v40  ;;  %1612 = vmatprep.mubr.bf16.mxu1 %v3325_v2 }
 0x155   :  { %v4442_v47 = vsub.f32 %v1320_v61, %v1321_v14  ;;  %v4444_v32 = vadd.f32 %v1324_v42, %v1323_v7  ;;  %1582 = vmatprep.subr.bf16.mxu1 %v3930_v51  ;;  %v1571_v28 = vadd.f32 %v1570_v50, %v1567_v58  ;;  %v4509_v50 = vld [vmem:[%s5315_s4 + $0x60] ss:$8 sps:$4 sm:$0xff]  }
 0x156   :  { %1416 = vmatpush1.bf16.msra.mxu0 %v4165_v44 }
 0x157   :  { %1483 = vmatprep.subr.bf16.mxu0 %v4186_v0  ;;  %v1575_v33 = vadd.f32 %v1574_v16, %v1571_v28  ;;  %v1709_v28 = vstv %s2986_s0  ;;  %v1712_v16 = vstv %s2987_s12  ;;  %s4601_s0 = sld [smem:[#allocation2 + $0x40a]]  ;;  %s4608_s12 = sld [smem:[#allocation2 + $0x484]] }
 0x158   :  { %1583 = vmatpush1.bf16.msra.mxu1 %v3939_v53 }
 0x159   :  { %1434 = vmatmul.mubr.bf16.vlgmr.msra.gmra.mrb[36].mxu0 %v1400_v26  ;;  %1584 = vmatprep.subr.bf16.mxu1 %v3945_v55  ;;  %v4465_v52 = vpack.c.bf16 %v1575_v33, %v1575_v33  ;;  %v4501_v26 = vld [vmem:[%s5315_s4 + $0x64] ss:$8 sps:$4 sm:$0xff]  }
 0x15a   :  { %1484 = vmatpush1.bf16.msra.mxu0 %v4235_v54  ;;  %1515 = vmatprep.mubr.bf16.mxu0 %v3325_v2 }
 0x15b   :  { %1485 = vmatprep.subr.bf16.mxu0 %v4242_v34  ;;  %v1577_v8 = vunpack.c.l.bf16 %v4465_v52 }
 0x15c   :  { %1585 = vmatpush1.bf16.msra.mxu1 %v3954_v56 }
 0x15d   :  { %1586 = vmatprep.subr.bf16.mxu1 %v3960_v60  ;;  %v1578_v27 = vsub.f32 %v1575_v33, %v1577_v8  ;;  %v1710_v33 = vmul.f32 %v4019_v31, %v1709_v28  ;;  %v1720_v8 = vstv %s2989_s20 }
 0x15e   :  { %1486 = vmatpush1.bf16.msra.mxu0 %v4250_v20 }
 0x15f   :  { %1487 = vmatprep.subr.bf16.mxu0 %v4257_v15  ;;  %v1579_v58 = vpack.c.bf16 %v1578_v27, %v1578_v27  ;;  %v1728_v27 = vstv %s2991_s26  ;;  %s4968_s26 = sld [smem:[#allocation2 + $0x582]] }
 0x160   :  { %1587 = vmatpush1.bf16.msra.mxu1 %v3969_v63 }
 0x161   :  { %1588 = vmatprep.subr.bf16.mxu1 %v3975_v10 }
 0x162   :  { %1488 = vmatpush1.bf16.msra.mxu0 %v4268_v6 }
 0x163   :  { %1489 = vmatprep.subr.bf16.mxu0 %v4274_v1 }
 0x164   :  { %1589 = vmatpush1.bf16.msra.mxu1 %v3988_v19 }
 0x165   :  { %1590 = vmatprep.subr.bf16.mxu1 %v4104_v57 }
 0x166   :  { %1490 = vmatpush1.bf16.msra.mxu0 %v4283_v22  ;;  %v730_v45 = vpop.f32.mrb[12].mxu1 }
 0x167   :  { %1491 = vmatprep.subr.bf16.mxu0 %v4289_v43  ;;  %v732_v59 = vpop.f32.mrb[13].mxu1 }
 0x168   :  { %1591 = vmatpush1.bf16.msra.mxu1 %v4118_v38  ;;  %v734_v29 = vpop.f32.mrb[14].mxu1 }
 0x169   :  { %v735_v41 = vpop.f32.mrb[15].mxu1  ;;  %1592 = vmatprep.subr.bf16.mxu1 %v4127_v48  ;;  %v1724_v29 = vstv %s2990_s23  ;;  %s4653_s23 = sld [smem:[#allocation2 + $0x486]] }
 0x16a   :  { %1492 = vmatpush1.bf16.msra.mxu0 %v4477_v25 }
 0x16b   :  { %1493 = vmatprep.subr.bf16.mxu0 %v4483_v5 }
 0x16c   :  { %v689_v14 = vpop.f32.mrb[12].mxu0  ;;  %1593 = vmatpush1.bf16.msra.mxu1 %v4143_v18 }
 0x16d   :  { %v4487_v7 = vadd.f32 %v730_v45, %v689_v14  ;;  %v691_v37 = vpop.f32.mrb[13].mxu0  ;;  %1594 = vmatprep.subr.bf16.mxu1 %v4150_v62  ;;  %v1713_v45 = vmul.f32 %v4025_v36, %v1712_v16 }
 0x16e   :  { %v4490_v61 = vadd.f32 %v732_v59, %v691_v37  ;;  %v693_v42 = vpop.f32.mrb[14].mxu0  ;;  %1494 = vmatpush1.bf16.msra.mxu0 %v4495_v24  ;;  %v1716_v59 = vstv %s2988_s15  ;;  %v1729_v37 = vmul.f32 %v4094_v23, %v1728_v27  ;;  %s4626_s15 = sld [smem:[#allocation2 + $0x40b]] }
 0x16f   :  { %v694_v35 = vpop.f32.mrb[15].mxu0  ;;  %1495 = vmatprep.subr.bf16.mxu0 %v4501_v26  ;;  %v1732_v42 = vstv %s4545_s24 }
 0x170   :  { %1595 = vmatpush1.bf16.msra.mxu1 %v4165_v44 }
 0x171   :  { %1662 = vmatprep.subr.bf16.mxu1 %v4186_v0  ;;  %v4524_v0 = vld [vmem:[%s5315_s4 + $0x70] ss:$8 sps:$4 sm:$0xff]  }
 0x172   :  { %1496 = vmatpush1.bf16.msra.mxu0 %v4509_v50 }
 0x173   :  { %1497 = vmatprep.subr.bf16.mxu0 %v4515_v39  ;;  %1613 = vmatmul.mubr.bf16.vlgmr.msra.gmra.mrb[40].mxu1 %v1579_v58 }
 0x174   :  { %1663 = vmatpush1.bf16.msra.mxu1 %v4235_v54  ;;  %1694 = vmatprep.mubr.bf16.mxu1 %v3325_v2 }
 0x175   :  { %1664 = vmatprep.subr.bf16.mxu1 %v4242_v34 }
 0x176   :  { %1498 = vmatpush1.bf16.msra.mxu0 %v4524_v0 }
 0x177   :  { %1621 = vmatprep.subr.bf16.mxu0 %v3912_v49  ;;  %v1714_v49 = vadd.f32 %v1713_v45, %v1710_v33  ;;  %v1736_v45 = vstv %s4554_s21  ;;  %s3016_s21 = sld [smem:[#allocation2 + $0x504]] }
 0x178   :  { %1665 = vmatpush1.bf16.msra.mxu1 %v4250_v20 }
 0x179   :  { %1516 = vmatmul.mubr.bf16.vlgmr.msra.gmra.mrb[40].mxu0 %v4409_v30  ;;  %1666 = vmatprep.subr.bf16.mxu1 %v4257_v15  ;;  %v1717_v30 = vmul.f32 %v4043_v21, %v1716_v59 }
 0x17a   :  { %1622 = vmatpush1.bf16.msra.mxu0 %v3923_v40  ;;  %1653 = vmatprep.mubr.bf16.mxu0 %v3325_v2 }
 0x17b   :  { %1623 = vmatprep.subr.bf16.mxu0 %v3930_v51  ;;  %v1718_v40 = vadd.f32 %v1717_v30, %v1714_v49  ;;  %v1721_v51 = vmul.f32 %v4060_v12, %v1720_v8  ;;  %v1891_v49 = vstv %s4561_s29  ;;  %v1737_v8 = vmul.f32 %v4137_v11, %v1736_v45  ;;  %v4658_v45 = vld [vmem:[%s5314_s3 + $0x20] ss:$8 sps:$4 sm:$0xff]   ;;  %s4673_s29 = sld [smem:[#allocation2 + $0x487]] }
 0x17c   :  { %1667 = vmatpush1.bf16.msra.mxu1 %v4268_v6 }
 0x17d   :  { %1668 = vmatprep.subr.bf16.mxu1 %v4274_v1 }
 0x17e   :  { %1624 = vmatpush1.bf16.msra.mxu0 %v3939_v53  ;;  %v1722_v53 = vadd.f32 %v1721_v51, %v1718_v40  ;;  %v1740_v40 = vstv %s4568_s30 }
 0x17f   :  { %1625 = vmatprep.subr.bf16.mxu0 %v3945_v55  ;;  %v1725_v55 = vmul.f32 %v4080_v46, %v1724_v29  ;;  %v1892_v29 = vmul.f32 %v4025_v36, %v1891_v49  ;;  %v1741_v27 = vmul.f32 %v4159_v9, %v1740_v40  ;;  %v1752_v49 = vstv %s4626_s15  ;;  %s4857_s15 = sld [smem:[#allocation2 + $0x503]] }
 0x180   :  { %1669 = vmatpush1.bf16.msra.mxu1 %v4283_v22  ;;  %v1907_v40 = vstv %s4631_s16  ;;  %s4739_s16 = sld [smem:[#allocation2 + $0x48b]] }
 0x181   :  { %1670 = vmatprep.subr.bf16.mxu1 %v4289_v43 }
 0x182   :  { %1626 = vmatpush1.bf16.msra.mxu0 %v3954_v56 }
 0x183   :  { %1627 = vmatprep.subr.bf16.mxu0 %v3960_v60 }
 0x184   :  { %1671 = vmatpush1.bf16.msra.mxu1 %v4477_v25 }
 0x185   :  { %1672 = vmatprep.subr.bf16.mxu1 %v4483_v5 }
 0x186   :  { %1628 = vmatpush1.bf16.msra.mxu0 %v3969_v63  ;;  %v4552_v41 = vpop.f32.mrb[16].mxu1  ;;  %v1726_v63 = vadd.f32 %v1725_v55, %v1722_v53  ;;  %v1895_v53 = vstv %s4571_s22  ;;  %v4613_v55 = vld [vmem:[%s5314_s3] ss:$8 sps:$4 sm:$0xff]  }
 0x187   :  { %1629 = vmatprep.subr.bf16.mxu0 %v3975_v10  ;;  %v4557_v56 = vpop.f32.mrb[17].mxu1 }
 0x188   :  { %1673 = vmatpush1.bf16.msra.mxu1 %v4495_v24  ;;  %v872_v60 = vpop.f32.mrb[18].mxu1  ;;  %v1730_v28 = vadd.f32 %v1729_v37, %v1726_v63  ;;  %v1896_v63 = vmul.f32 %v4043_v21, %v1895_v53  ;;  %v1899_v37 = vstv %s4589_s8 }
 0x189   :  { %v873_v14 = vpop.f32.mrb[19].mxu1  ;;  %1674 = vmatprep.subr.bf16.mxu1 %v4501_v26  ;;  %v1744_v60 = vstv %s4584_s25  ;;  %s5003_s25 = sld [smem:[#allocation2 + $0x50a]] }
 0x18a   :  { %1630 = vmatpush1.bf16.msra.mxu0 %v3988_v19  ;;  %v1733_v19 = vmul.f32 %v4112_v4, %v1732_v42  ;;  %v4636_v42 = vld [vmem:[%s5314_s3 + $0x10] ss:$8 sps:$4 sm:$0xff]  }
 0x18b   :  { %1631 = vmatprep.subr.bf16.mxu0 %v4104_v57 }
 0x18c   :  { %v771_v10 = vpop.f32.mrb[16].mxu0  ;;  %1675 = vmatpush1.bf16.msra.mxu1 %v4509_v50  ;;  %v1734_v30 = vadd.f32 %v1733_v19, %v1730_v28  ;;  %v1748_v28 = vstv %s4601_s0  ;;  %s3013_s0 = sld [smem:[#allocation2 + $0x501]] }
 0x18d   :  { %v4575_v35 = vadd.f32 %v771_v10, %v4487_v7  ;;  %v773_v58 = vpop.f32.mrb[17].mxu0  ;;  %1676 = vmatprep.subr.bf16.mxu1 %v4515_v39  ;;  %v1888_v7 = vstv %s4559_s27  ;;  %v4643_v10 = vld [vmem:[%s5314_s3 + $0x24] ss:$8 sps:$4 sm:$0xff]   ;;  %s4986_s27 = sld [smem:[#allocation2 + $0x509]] }
 0x18e   :  { %v4580_v16 = vadd.f32 %v773_v58, %v4490_v61  ;;  %v775_v33 = vpop.f32.mrb[18].mxu0  ;;  %1632 = vmatpush1.bf16.msra.mxu0 %v4118_v38  ;;  %v4595_v61 = vld [vmem:[%s5314_s3 + $0x4] ss:$8 sps:$4 sm:$0xff]   ;;  %v1889_v51 = vmul.f32 %v4019_v31, %v1888_v7  ;;  %v4620_v31 = vld [vmem:[%s5314_s3 + $0x14] ss:$8 sps:$4 sm:$0xff]   ;;  %v1738_v36 = vadd.f32 %v1737_v8, %v1734_v30  ;;  %v1745_v58 = vmul.f32 %v4176_v17, %v1744_v60 }
 0x18f   :  { %v776_v59 = vpop.f32.mrb[19].mxu0  ;;  %1633 = vmatprep.subr.bf16.mxu0 %v4127_v48  ;;  %v1903_v33 = vstv %s4608_s12  ;;  %v1749_v7 = vmul.f32 %v4071_v13, %v1748_v28  ;;  %v4684_v13 = vld [vmem:[%s5314_s3 + $0x44] ss:$8 sps:$4 sm:$0xff]   ;;  %v4697_v60 = vld [vmem:[%s5314_s3 + $0x40] ss:$8 sps:$4 sm:$0xff]   ;;  %s4700_s12 = sld [smem:[#allocation2 + $0x10c]] }
 0x190   :  { %1677 = vmatpush1.bf16.msra.mxu1 %v4524_v0  ;;  %v1893_v14 = vadd.f32 %v1892_v29, %v1889_v51  ;;  %v1742_v21 = vadd.f32 %v1741_v27, %v1738_v36  ;;  %v4664_v59 = vld [vmem:[%s5314_s3 + $0x34] ss:$8 sps:$4 sm:$0xff]   ;;  %v1904_v8 = vmul.f32 %v4080_v46, %v1903_v33  ;;  %v4678_v51 = vld [vmem:[%s5314_s3 + $0x30] ss:$8 sps:$4 sm:$0xff]   ;;  %v1753_v29 = vmul.f32 %v4198_v3, %v1752_v49 }
 0x191   :  { %1800 = vmatprep.subr.bf16.mxu1 %v4595_v61  ;;  %v1908_v36 = vmul.f32 %v4094_v23, %v1907_v40  ;;  %v1911_v27 = vstv %s4653_s23  ;;  %v1919_v33 = vstv %s4692_s11  ;;  %s4909_s11 = sld [smem:[#allocation2 + $0x505]]  ;;  %s4965_s23 = sld [smem:[#allocation2 + $0x508]] }
 0x192   :  { %1634 = vmatpush1.bf16.msra.mxu0 %v4143_v18  ;;  %v1897_v19 = vadd.f32 %v1896_v63, %v1893_v14  ;;  %v1912_v63 = vmul.f32 %v4112_v4, %v1911_v27 }
 0x193   :  { %1635 = vmatprep.subr.bf16.mxu0 %v4150_v62  ;;  %1695 = vmatmul.mubr.bf16.vlgmr.msra.gmra.mrb[44].mxu1 %v4465_v52 }
 0x194   :  { %1801 = vmatpush1.bf16.msra.mxu1 %v4613_v55  ;;  %1832 = vmatprep.mubr.bf16.mxu1 %v3325_v2 }
 0x195   :  { %1802 = vmatprep.subr.bf16.mxu1 %v4620_v31 }
 0x196   :  { %1636 = vmatpush1.bf16.msra.mxu0 %v4165_v44 }
 0x197   :  { %1759 = vmatprep.subr.bf16.mxu0 %v4595_v61 }
 0x198   :  { %1803 = vmatpush1.bf16.msra.mxu1 %v4636_v42 }
 0x199   :  { %1654 = vmatmul.mubr.bf16.vlgmr.msra.gmra.mrb[44].mxu0 %v4465_v52  ;;  %1804 = vmatprep.subr.bf16.mxu1 %v4643_v10  ;;  %v1900_v52 = vmul.f32 %v4060_v12, %v1899_v37  ;;  %v1746_v12 = vadd.f32 %v1745_v58, %v1742_v21  ;;  %v1915_v21 = vstv %s4673_s29  ;;  %s4991_s29 = sld [smem:[#allocation2 + $0x583]] }
 0x19a   :  { %1760 = vmatpush1.bf16.msra.mxu0 %v4613_v55  ;;  %1791 = vmatprep.mubr.bf16.mxu0 %v3325_v2  ;;  %v1916_v4 = vmul.f32 %v4137_v11, %v1915_v21 }
 0x19b   :  { %1761 = vmatprep.subr.bf16.mxu0 %v4620_v31  ;;  %v1901_v30 = vadd.f32 %v1900_v52, %v1897_v19  ;;  %v1750_v46 = vadd.f32 %v1749_v7, %v1746_v12  ;;  %v781_v7 = vstv %s4700_s12  ;;  %s4840_s12 = sld [smem:[#allocation2 + $0x502]] }
 0x19c   :  { %1805 = vmatpush1.bf16.msra.mxu1 %v4658_v45 }
 0x19d   :  { %1806 = vmatprep.subr.bf16.mxu1 %v4664_v59  ;;  %v1905_v53 = vadd.f32 %v1904_v8, %v1901_v30  ;;  %v1754_v3 = vadd.f32 %v1753_v29, %v1750_v46  ;;  %v960_v8 = vstv %s4704_s9  ;;  %v1920_v46 = vmul.f32 %v4159_v9, %v1919_v33  ;;  %s3031_s9 = sld [smem:[#allocation2 + $0x586]] }
 0x19e   :  { %1762 = vmatpush1.bf16.msra.mxu0 %v4636_v42 }
 0x19f   :  { %1763 = vmatprep.subr.bf16.mxu0 %v4643_v10  ;;  %v1909_v14 = vadd.f32 %v1908_v36, %v1905_v53  ;;  %v4713_v19 = vpack.c.bf16 %v1754_v3, %v1754_v3  ;;  %v782_v53 = vadd.f32 %v781_v7, %v4575_v35 }
 0x1a0   :  { %1807 = vmatpush1.bf16.msra.mxu1 %v4678_v51 }
 0x1a1   :  { %1808 = vmatprep.subr.bf16.mxu1 %v4684_v13  ;;  %v1913_v52 = vadd.f32 %v1912_v63, %v1909_v14  ;;  %v1756_v30 = vunpack.c.l.bf16 %v4713_v19 }
 0x1a2   :  { %1764 = vmatpush1.bf16.msra.mxu0 %v4658_v45 }
 0x1a3   :  { %1765 = vmatprep.subr.bf16.mxu0 %v4664_v59  ;;  %v1757_v9 = vsub.f32 %v1754_v3, %v1756_v30  ;;  %v4754_v3 = vld [vmem:[%s5314_s3 + $0x74] ss:$8 sps:$4 sm:$0xff]   ;;  %v1931_v30 = vstv %s4739_s16  ;;  %s4946_s16 = sld [smem:[#allocation2 + $0x507]] }
 0x1a4   :  { %1809 = vmatpush1.bf16.msra.mxu1 %v4697_v60 }
 0x1a5   :  { %1810 = vmatprep.subr.bf16.mxu1 %v4104_v57 }
 0x1a6   :  { %1766 = vmatpush1.bf16.msra.mxu0 %v4678_v51  ;;  %v950_v23 = vpop.f32.mrb[20].mxu1 }
 0x1a7   :  { %1767 = vmatprep.subr.bf16.mxu0 %v4684_v13  ;;  %v952_v37 = vpop.f32.mrb[21].mxu1 }
 0x1a8   :  { %1811 = vmatpush1.bf16.msra.mxu1 %v4118_v38  ;;  %v954_v58 = vpop.f32.mrb[22].mxu1 }
 0x1a9   :  { %v955_v28 = vpop.f32.mrb[23].mxu1  ;;  %1812 = vmatprep.subr.bf16.mxu1 %v4127_v48  ;;  %v1758_v58 = vpack.c.bf16 %v1757_v9, %v1757_v9 }
 0x1aa   :  { %1768 = vmatpush1.bf16.msra.mxu0 %v4697_v60 }
 0x1ab   :  { %1769 = vmatprep.subr.bf16.mxu0 %v4104_v57  ;;  %v1917_v57 = vadd.f32 %v1916_v4, %v1913_v52  ;;  %v4771_v52 = vld [vmem:[%s5313_s2 + $0x10] sm:$0xff] }
 0x1ac   :  { %v909_v12 = vpop.f32.mrb[20].mxu0  ;;  %1813 = vmatpush1.bf16.msra.mxu1 %v4143_v18 }
 0x1ad   :  { %v910_v49 = vadd.f32 %v909_v12, %v4552_v41  ;;  %v911_v48 = vpop.f32.mrb[21].mxu0  ;;  %1814 = vmatprep.subr.bf16.mxu1 %v4150_v62  ;;  %v4733_v41 = vld [vmem:[%s5314_s3 + $0x64] ss:$8 sps:$4 sm:$0xff]   ;;  %v1923_v62 = vstv %s4709_s10  ;;  %v1921_v35 = vadd.f32 %v1920_v46, %v1917_v57  ;;  %v4814_v57 = vld [vmem:[%s5314_s3 + $0x54] ss:$8 sps:$4 sm:$0xff]   ;;  %s5061_s10 = sld [smem:[#allocation2 + $0x588]] }
 0x1ae   :  { %v912_v11 = vadd.f32 %v911_v48, %v4557_v56  ;;  %v913_v40 = vpop.f32.mrb[22].mxu0  ;;  %1770 = vmatpush1.bf16.msra.mxu0 %v4118_v38  ;;  %v4781_v48 = vld [vmem:[%s5315_s4 + $0x4] ss:$8 sps:$4 sm:$0xff]  }
 0x1af   :  { %v957_v29 = vadd.f32 %v950_v23, %v910_v49  ;;  %v914_v18 = vpop.f32.mrb[23].mxu0  ;;  %1771 = vmatprep.subr.bf16.mxu0 %v4733_v41  ;;  %v4746_v23 = vld [vmem:[%s5314_s3 + $0x60] ss:$8 sps:$4 sm:$0xff]  }
 0x1b0   :  { %v958_v36 = vadd.f32 %v952_v37, %v912_v11  ;;  %1815 = vmatpush1.bf16.msra.mxu1 %v4165_v44  ;;  %v1924_v44 = vmul.f32 %v4176_v17, %v1923_v62  ;;  %v1927_v37 = vstv %s4719_s13  ;;  %s4931_s13 = sld [smem:[#allocation2 + $0x506]] }
 0x1b1   :  { %v961_v38 = vadd.f32 %v960_v8, %v957_v29  ;;  %1938 = vmatprep.subr.bf16.mxu1 %v4595_v61  ;;  %v1928_v4 = vmul.f32 %v4771_v52, %v1927_v37  ;;  %v4876_v37 = vld [vmem:[%s5312_s1] sm:$0xff] }
 0x1b2   :  { %v1327_v56 = vmul.f32 %v958_v36, %v4580_v16  ;;  %v1329_v27 = vmul.f32 %v958_v36, %v782_v53  ;;  %1772 = vmatpush1.bf16.msra.mxu0 %v4746_v23  ;;  %v1925_v28 = vadd.f32 %v1924_v44, %v1921_v35  ;;  %v2070_v44 = vstv %s3013_s0 }
 0x1b3   :  { %v1326_v14 = vmul.f32 %v961_v38, %v782_v53  ;;  %v1330_v63 = vmul.f32 %v961_v38, %v4580_v16  ;;  %1773 = vmatprep.subr.bf16.mxu0 %v4754_v3  ;;  %1833 = vmatmul.mubr.bf16.vlgmr.msra.gmra.mrb[48].mxu1 %v4713_v19  ;;  %v4765_v16 = vld [vmem:[%s5314_s3 + $0x70] ss:$8 sps:$4 sm:$0xff]  }
 0x1b4   :  { %1939 = vmatpush1.bf16.msra.mxu1 %v4613_v55  ;;  %1970 = vmatprep.mubr.bf16.mxu1 %v3325_v2 }
 0x1b5   :  { %v1328_v21 = vsub.f32 %v1326_v14, %v1327_v56  ;;  %v1331_v17 = vadd.f32 %v1330_v63, %v1329_v27  ;;  %1940 = vmatprep.subr.bf16.mxu1 %v4620_v31  ;;  %v4846_v56 = vld [vmem:[%s5315_s4] ss:$8 sps:$4 sm:$0xff]   ;;  %v4853_v27 = vld [vmem:[%s5315_s4 + $0x14] ss:$8 sps:$4 sm:$0xff]   ;;  %v4863_v14 = vld [vmem:[%s5315_s4 + $0x10] ss:$8 sps:$4 sm:$0xff]  }
 0x1b6   :  { %1774 = vmatpush1.bf16.msra.mxu0 %v4765_v16  ;;  %v4870_v63 = vld [vmem:[%s5315_s4 + $0x24] ss:$8 sps:$4 sm:$0xff]  }
 0x1b7   :  { %v1338_v33 = vmul.f32 %v1328_v21, %v4442_v47  ;;  %v1339_v12 = vmul.f32 %v1331_v17, %v4444_v32  ;;  %v1341_v7 = vmul.f32 %v1331_v17, %v4442_v47  ;;  %v1342_v49 = vmul.f32 %v1328_v21, %v4444_v32  ;;  %1841 = vmatprep.subr.bf16.mxu0 %v4781_v48  ;;  %v4797_v32 = vld [vmem:[%s5313_s2 + $0x18] sm:$0xff]  ;;  %v4882_v17 = vld [vmem:[%s5312_s1 + $0x8] sm:$0xff] }
 0x1b8   :  { %1941 = vmatpush1.bf16.msra.mxu1 %v4636_v42  ;;  %v1929_v47 = vadd.f32 %v1928_v4, %v1925_v28  ;;  %v1932_v40 = vmul.f32 %v4797_v32, %v1931_v30  ;;  %v4892_v28 = vld [vmem:[%s5315_s4 + $0x20] ss:$8 sps:$4 sm:$0xff]   ;;  %v4898_v4 = vld [vmem:[%s5315_s4 + $0x34] ss:$8 sps:$4 sm:$0xff]   ;;  %v4915_v30 = vld [vmem:[%s5315_s4 + $0x30] ss:$8 sps:$4 sm:$0xff]  }
 0x1b9   :  { %1792 = vmatmul.mubr.bf16.vlgmr.msra.gmra.mrb[48].mxu0 %v1758_v58  ;;  %1942 = vmatprep.subr.bf16.mxu1 %v4643_v10  ;;  %v4787_v8 = vsub.f32 %v1338_v33, %v1339_v12  ;;  %v4789_v11 = vadd.f32 %v1342_v49, %v1341_v7  ;;  %v2074_v58 = vstv %s4840_s12  ;;  %v4904_v12 = vld [vmem:[%s5312_s1 + $0x10] sm:$0xff]  ;;  %v2078_v49 = vstv %s4857_s15  ;;  %s5073_s15 = sld [smem:[#allocation2 + $0x589]] }
 0x1ba   :  { %1842 = vmatpush1.bf16.msra.mxu0 %v4235_v54  ;;  %1873 = vmatprep.mubr.bf16.mxu0 %v3325_v2  ;;  %v1933_v54 = vadd.f32 %v1932_v40, %v1929_v47  ;;  %v2075_v7 = vmul.f32 %v4904_v12, %v2074_v58  ;;  %v4921_v47 = vld [vmem:[%s5315_s4 + $0x44] ss:$8 sps:$4 sm:$0xff]  }
 0x1bb   :  { %1843 = vmatprep.subr.bf16.mxu0 %v4242_v34 }
 0x1bc   :  { %1943 = vmatpush1.bf16.msra.mxu1 %v4658_v45  ;;  %v4808_v34 = vpack.c.bf16 %v1933_v54, %v1933_v54 }
 0x1bd   :  { %1944 = vmatprep.subr.bf16.mxu1 %v4664_v59 }
 0x1be   :  { %1844 = vmatpush1.bf16.msra.mxu0 %v4250_v20 }
 0x1bf   :  { %1845 = vmatprep.subr.bf16.mxu0 %v4257_v15 }
 0x1c0   :  { %1945 = vmatpush1.bf16.msra.mxu1 %v4678_v51 }
 0x1c1   :  { %1946 = vmatprep.subr.bf16.mxu1 %v4684_v13 }
 0x1c2   :  { %1846 = vmatpush1.bf16.msra.mxu0 %v4268_v6  ;;  %v1935_v6 = vunpack.c.l.bf16 %v4808_v34 }
 0x1c3   :  { %1847 = vmatprep.subr.bf16.mxu0 %v4274_v1  ;;  %v4823_v1 = vld [vmem:[%s5314_s3 + $0x50] ss:$8 sps:$4 sm:$0xff]   ;;  %s3012_s3 = sld [smem:[#allocation2 + $0x500]] }
 0x1c4   :  { %1947 = vmatpush1.bf16.msra.mxu1 %v4697_v60 }
 0x1c5   :  { %1948 = vmatprep.subr.bf16.mxu1 %v4814_v57 }
 0x1c6   :  { %1848 = vmatpush1.bf16.msra.mxu0 %v4283_v22  ;;  %v1088_v20 = vpop.f32.mrb[24].mxu1  ;;  %v1936_v22 = vsub.f32 %v1933_v54, %v1935_v6  ;;  %v4927_v54 = vld [vmem:[%s5312_s1 + $0x18] sm:$0xff] }
 0x1c7   :  { %1849 = vmatprep.subr.bf16.mxu0 %v4289_v43  ;;  %v1090_v15 = vpop.f32.mrb[25].mxu1 }
 0x1c8   :  { %1949 = vmatpush1.bf16.msra.mxu1 %v4823_v1  ;;  %v1092_v46 = vpop.f32.mrb[26].mxu1  ;;  %v1937_v9 = vpack.c.bf16 %v1936_v22, %v1936_v22 }
 0x1c9   :  { %v1093_v29 = vpop.f32.mrb[27].mxu1  ;;  %1950 = vmatprep.subr.bf16.mxu1 %v4733_v41  ;;  %v2067_v35 = vstv %s3012_s3  ;;  %v4939_v46 = vld [vmem:[%s5312_s1 + $0x20] sm:$0xff]  ;;  %s5028_s3 = sld [smem:[#allocation2 + $0x585]] }
 0x1ca   :  { %1850 = vmatpush1.bf16.msra.mxu0 %v4477_v25  ;;  %v2068_v21 = vmul.f32 %v4876_v37, %v2067_v35  ;;  %v2090_v35 = vstv %s4931_s13  ;;  %s5064_s13 = sld [smem:[#allocation2 + $0x20c]] }
 0x1cb   :  { %1851 = vmatprep.subr.bf16.mxu0 %v4483_v5 }
 0x1cc   :  { %v1047_v43 = vpop.f32.mrb[24].mxu0  ;;  %1951 = vmatpush1.bf16.msra.mxu1 %v4746_v23 }
 0x1cd   :  { %v4830_v18 = vadd.f32 %v1088_v20, %v1047_v43  ;;  %v1049_v62 = vpop.f32.mrb[25].mxu0  ;;  %1952 = vmatprep.subr.bf16.mxu1 %v4754_v3  ;;  %v2079_v20 = vmul.f32 %v4927_v54, %v2078_v49  ;;  %v2086_v43 = vstv %s4909_s11  ;;  %v2249_v49 = vstv %s4953_s18  ;;  %s2985_s11 = sld [smem:[#allocation2 + $0x38c]] }
 0x1ce   :  { %v4833_v53 = vadd.f32 %v1090_v15, %v1049_v62  ;;  %v1051_v36 = vpop.f32.mrb[26].mxu0  ;;  %1852 = vmatpush1.bf16.msra.mxu0 %v4495_v24  ;;  %v2082_v15 = vstv %s3016_s21 }
 0x1cf   :  { %v1052_v38 = vpop.f32.mrb[27].mxu0  ;;  %1853 = vmatprep.subr.bf16.mxu0 %v4501_v26  ;;  %v2083_v29 = vmul.f32 %v4939_v46, %v2082_v15  ;;  %v2098_v15 = vstv %s4965_s23 }
 0x1d0   :  { %1953 = vmatpush1.bf16.msra.mxu1 %v4765_v16  ;;  %v4960_v38 = vld [vmem:[%s5312_s1 + $0x28] sm:$0xff] }
 0x1d1   :  { %2020 = vmatprep.subr.bf16.mxu1 %v4781_v48 }
 0x1d2   :  { %1854 = vmatpush1.bf16.msra.mxu0 %v4509_v50 }
 0x1d3   :  { %1855 = vmatprep.subr.bf16.mxu0 %v4515_v39  ;;  %1971 = vmatmul.mubr.bf16.vlgmr.msra.gmra.mrb[52].mxu1 %v1937_v9  ;;  %v2087_v9 = vmul.f32 %v4960_v38, %v2086_v43 }
 0x1d4   :  { %2021 = vmatpush1.bf16.msra.mxu1 %v4846_v56  ;;  %2052 = vmatprep.mubr.bf16.mxu1 %v3325_v2 }
 0x1d5   :  { %2022 = vmatprep.subr.bf16.mxu1 %v4853_v27 }
 0x1d6   :  { %1856 = vmatpush1.bf16.msra.mxu0 %v4524_v0 }
 0x1d7   :  { %1979 = vmatprep.subr.bf16.mxu0 %v4595_v61 }
 0x1d8   :  { %2023 = vmatpush1.bf16.msra.mxu1 %v4863_v14 }
 0x1d9   :  { %1874 = vmatmul.mubr.bf16.vlgmr.msra.gmra.mrb[52].mxu0 %v4713_v19  ;;  %2024 = vmatprep.subr.bf16.mxu1 %v4870_v63  ;;  %v2071_v19 = vmul.f32 %v4882_v17, %v2070_v44 }
 0x1da   :  { %1980 = vmatpush1.bf16.msra.mxu0 %v4613_v55  ;;  %2011 = vmatprep.mubr.bf16.mxu0 %v3325_v2 }
 0x1db   :  { %1981 = vmatprep.subr.bf16.mxu0 %v4620_v31  ;;  %v2072_v33 = vadd.f32 %v2071_v19, %v2068_v21  ;;  %v4978_v19 = vld [vmem:[%s5312_s1 + $0x30] sm:$0xff] }
 0x1dc   :  { %2025 = vmatpush1.bf16.msra.mxu1 %v4892_v28  ;;  %v2091_v58 = vmul.f32 %v4978_v19, %v2090_v35 }
 0x1dd   :  { %2026 = vmatprep.subr.bf16.mxu1 %v4898_v4  ;;  %v2076_v40 = vadd.f32 %v2075_v7, %v2072_v33 }
 0x1de   :  { %1982 = vmatpush1.bf16.msra.mxu0 %v4636_v42 }
 0x1df   :  { %1983 = vmatprep.subr.bf16.mxu0 %v4643_v10  ;;  %v2080_v6 = vadd.f32 %v2079_v20, %v2076_v40  ;;  %v4998_v40 = vld [vmem:[%s5312_s1 + $0x38] sm:$0xff]  ;;  %s5010_s1 = sld [smem:[#allocation2 + $0x584]] }
 0x1e0   :  { %2027 = vmatpush1.bf16.msra.mxu1 %v4915_v30 }
 0x1e1   :  { %2028 = vmatprep.subr.bf16.mxu1 %v4921_v47  ;;  %v2084_v36 = vadd.f32 %v2083_v29, %v2080_v6  ;;  %v2253_v29 = vstv %s4968_s26 }
 0x1e2   :  { %1984 = vmatpush1.bf16.msra.mxu0 %v4658_v45 }
 0x1e3   :  { %1985 = vmatprep.subr.bf16.mxu0 %v4664_v59  ;;  %v2088_v21 = vadd.f32 %v2087_v9, %v2084_v36  ;;  %v2254_v36 = vmul.f32 %v4904_v12, %v2253_v29  ;;  %v2257_v9 = vstv %s4991_s29 }
 0x1e4   :  { %2029 = vmatpush1.bf16.msra.mxu1 %v4477_v25 }
 0x1e5   :  { %2030 = vmatprep.subr.bf16.mxu1 %v4483_v5 }
 0x1e6   :  { %1986 = vmatpush1.bf16.msra.mxu0 %v4678_v51  ;;  %v4943_v22 = vpop.f32.mrb[28].mxu1 }
 0x1e7   :  { %1987 = vmatprep.subr.bf16.mxu0 %v4684_v13  ;;  %v4949_v25 = vpop.f32.mrb[29].mxu1 }
 0x1e8   :  { %2031 = vmatpush1.bf16.msra.mxu1 %v4495_v24  ;;  %v1230_v5 = vpop.f32.mrb[30].mxu1 }
 0x1e9   :  { %v1231_v62 = vpop.f32.mrb[31].mxu1  ;;  %2032 = vmatprep.subr.bf16.mxu1 %v4501_v26  ;;  %v2102_v5 = vstv %s4986_s27 }
 0x1ea   :  { %1988 = vmatpush1.bf16.msra.mxu0 %v4697_v60 }
 0x1eb   :  { %1989 = vmatprep.subr.bf16.mxu0 %v4814_v57 }
 0x1ec   :  { %v1129_v24 = vpop.f32.mrb[28].mxu0  ;;  %2033 = vmatpush1.bf16.msra.mxu1 %v4509_v50  ;;  %v2094_v50 = vstv %s4946_s16  ;;  %s5083_s16 = sld [smem:[#allocation2 + $0x58a]] }
 0x1ed   :  { %v4972_v26 = vadd.f32 %v1129_v24, %v4830_v18  ;;  %v1131_v44 = vpop.f32.mrb[29].mxu0  ;;  %2034 = vmatprep.subr.bf16.mxu1 %v4515_v39  ;;  %v2246_v39 = vstv %s4951_s17  ;;  %v2095_v20 = vmul.f32 %v4998_v40, %v2094_v50  ;;  %v5036_v24 = vld [vmem:[%s5313_s2 + $0x8] sm:$0xff]  ;;  %s5098_s17 = sld [smem:[#allocation2 + $0x58b]] }
 0x1ee   :  { %v4982_v33 = vadd.f32 %v1131_v44, %v4833_v53  ;;  %v1133_v7 = vpop.f32.mrb[30].mxu0  ;;  %1990 = vmatpush1.bf16.msra.mxu0 %v4823_v1  ;;  %v2092_v53 = vadd.f32 %v2091_v58, %v2088_v21  ;;  %v2247_v6 = vmul.f32 %v4876_v37, %v2246_v39  ;;  %v5018_v37 = vld [vmem:[%s5313_s2] sm:$0xff]  ;;  %v2103_v12 = vmul.f32 %v5036_v24, %v2102_v5  ;;  %s5053_s2 = sld [smem:[#allocation2 + $0x587]] }
 0x1ef   :  { %v1134_v18 = vpop.f32.mrb[31].mxu0  ;;  %1991 = vmatprep.subr.bf16.mxu0 %v4733_v41  ;;  %v2106_v44 = vstv %s5003_s25  ;;  %v2261_v58 = vstv %s5010_s1 }
 0x1f0   :  { %2035 = vmatpush1.bf16.msra.mxu1 %v4524_v0  ;;  %v2250_v0 = vmul.f32 %v4882_v17, %v2249_v49  ;;  %v2096_v43 = vadd.f32 %v2095_v20, %v2092_v53  ;;  %v2099_v17 = vmul.f32 %v5018_v37, %v2098_v15  ;;  %v2107_v50 = vmul.f32 %v4771_v52, %v2106_v44 }
 0x1f1   :  { %2158 = vmatprep.subr.bf16.mxu1 %v4595_v61  ;;  %v2110_v18 = vstv %s5023_s28  ;;  %v2262_v49 = vmul.f32 %v4939_v46, %v2261_v58  ;;  %v2269_v46 = vstv %s3031_s9  ;;  %s2998_s9 = sld [smem:[#allocation2 + $0x40c]] }
 0x1f2   :  { %1992 = vmatpush1.bf16.msra.mxu0 %v4746_v23  ;;  %v2251_v62 = vadd.f32 %v2250_v0, %v2247_v6  ;;  %v2100_v35 = vadd.f32 %v2099_v17, %v2096_v43  ;;  %v2111_v20 = vmul.f32 %v4797_v32, %v2110_v18 }
 0x1f3   :  { %1993 = vmatprep.subr.bf16.mxu0 %v4754_v3  ;;  %2053 = vmatmul.mubr.bf16.vlgmr.msra.gmra.mrb[56].mxu1 %v4808_v34 }
 0x1f4   :  { %2159 = vmatpush1.bf16.msra.mxu1 %v4613_v55  ;;  %2190 = vmatprep.mubr.bf16.mxu1 %v3325_v2  ;;  %v2255_v21 = vadd.f32 %v2254_v36, %v2251_v62  ;;  %v2104_v7 = vadd.f32 %v2103_v12, %v2100_v35  ;;  %v2273_v5 = vstv %s5053_s2  ;;  %v2277_v12 = vstv %s5061_s10 }
 0x1f5   :  { %2160 = vmatprep.subr.bf16.mxu1 %v4620_v31 }
 0x1f6   :  { %1994 = vmatpush1.bf16.msra.mxu0 %v4765_v16  ;;  %v2108_v53 = vadd.f32 %v2107_v50, %v2104_v7  ;;  %v1318_v50 = vstv %s5068_s14  ;;  %s3037_s14 = sld [smem:[#allocation2 + $0x58c]] }
 0x1f7   :  { %2117 = vmatprep.subr.bf16.mxu0 %v4595_v61 }
 0x1f8   :  { %2161 = vmatpush1.bf16.msra.mxu1 %v4636_v42  ;;  %v2112_v0 = vadd.f32 %v2111_v20, %v2108_v53  ;;  %v2281_v20 = vstv %s5073_s15 }
 0x1f9   :  { %2012 = vmatmul.mubr.bf16.vlgmr.msra.gmra.mrb[56].mxu0 %v4808_v34  ;;  %2162 = vmatprep.subr.bf16.mxu1 %v4643_v10  ;;  %v2258_v34 = vmul.f32 %v4927_v54, %v2257_v9  ;;  %v2265_v54 = vstv %s5028_s3 }
 0x1fa   :  { %2118 = vmatpush1.bf16.msra.mxu0 %v4613_v55  ;;  %2149 = vmatprep.mubr.bf16.mxu0 %v3325_v2  ;;  %v2266_v6 = vmul.f32 %v4960_v38, %v2265_v54  ;;  %v2270_v38 = vmul.f32 %v4978_v19, %v2269_v46  ;;  %v5077_v9 = vpack.c.bf16 %v2112_v0, %v2112_v0 }
 0x1fb   :  { %2119 = vmatprep.subr.bf16.mxu0 %v4620_v31  ;;  %v2259_v39 = vadd.f32 %v2258_v34, %v2255_v21  ;;  %v2274_v19 = vmul.f32 %v4998_v40, %v2273_v5  ;;  %v1139_v21 = vstv %s5064_s13  ;;  %s3011_s13 = sld [smem:[#allocation2 + $0x48c]] }
 0x1fc   :  { %2163 = vmatpush1.bf16.msra.mxu1 %v4658_v45  ;;  %v2114_v7 = vunpack.c.l.bf16 %v5077_v9 }
 0x1fd   :  { %2164 = vmatprep.subr.bf16.mxu1 %v4664_v59  ;;  %v2263_v15 = vadd.f32 %v2262_v49, %v2259_v39  ;;  %v2278_v49 = vmul.f32 %v5018_v37, %v2277_v12 }
 0x1fe   :  { %2120 = vmatpush1.bf16.msra.mxu0 %v4636_v42 }
 0x1ff   :  { %2121 = vmatprep.subr.bf16.mxu0 %v4643_v10  ;;  %v2267_v43 = vadd.f32 %v2266_v6, %v2263_v15  ;;  %v2115_v6 = vsub.f32 %v2112_v0, %v2114_v7 }
 0x200   :  { %2165 = vmatpush1.bf16.msra.mxu1 %v4678_v51 }
 0x201   :  { %2166 = vmatprep.subr.bf16.mxu1 %v4684_v13  ;;  %v2271_v35 = vadd.f32 %v2270_v38, %v2267_v43  ;;  %v2282_v43 = vmul.f32 %v5036_v24, %v2281_v20 }
 0x202   :  { %2122 = vmatpush1.bf16.msra.mxu0 %v4658_v45 }
 0x203   :  { %2123 = vmatprep.subr.bf16.mxu0 %v4664_v59  ;;  %v2275_v39 = vadd.f32 %v2274_v19, %v2271_v35 }
 0x204   :  { %2167 = vmatpush1.bf16.msra.mxu1 %v4697_v60 }
 0x205   :  { %2168 = vmatprep.subr.bf16.mxu1 %v4814_v57 }
 0x206   :  { %2124 = vmatpush1.bf16.msra.mxu0 %v4678_v51  ;;  %v1308_v29 = vpop.f32.mrb[32].mxu1 }
 0x207   :  { %2125 = vmatprep.subr.bf16.mxu0 %v4684_v13  ;;  %v1310_v17 = vpop.f32.mrb[33].mxu1 }
 0x208   :  { %2169 = vmatpush1.bf16.msra.mxu1 %v4823_v1  ;;  %v1312_v62 = vpop.f32.mrb[34].mxu1 }
 0x209   :  { %v1313_v36 = vpop.f32.mrb[35].mxu1  ;;  %2170 = vmatprep.subr.bf16.mxu1 %v4733_v41  ;;  %v2116_v62 = vpack.c.bf16 %v2115_v6, %v2115_v6  ;;  %v3303_v6 = vld [vmem:[%s5315_s4 + $0x50] ss:$8 sps:$4 sm:$0xff]  }
 0x20a   :  { %2126 = vmatpush1.bf16.msra.mxu0 %v4697_v60 }
 0x20b   :  { %2127 = vmatprep.subr.bf16.mxu0 %v4814_v57 }
 0x20c   :  { %v1267_v44 = vpop.f32.mrb[32].mxu0  ;;  %2171 = vmatpush1.bf16.msra.mxu1 %v4746_v23 }
 0x20d   :  { %v1268_v34 = vadd.f32 %v1267_v44, %v4943_v22  ;;  %v1269_v58 = vpop.f32.mrb[33].mxu0  ;;  %2172 = vmatprep.subr.bf16.mxu1 %v4754_v3  ;;  %v1140_v22 = vadd.f32 %v1139_v21, %v4972_v26  ;;  %v2289_v44 = vstv %s5098_s17 }
 0x20e   :  { %v1270_v40 = vadd.f32 %v1269_v58, %v4949_v25  ;;  %v1271_v18 = vpop.f32.mrb[34].mxu0  ;;  %2128 = vmatpush1.bf16.msra.mxu0 %v4823_v1 }
 0x20f   :  { %v1315_v54 = vadd.f32 %v1308_v29, %v1268_v34  ;;  %v1272_v53 = vpop.f32.mrb[35].mxu0  ;;  %2129 = vmatprep.subr.bf16.mxu0 %v4733_v41  ;;  %v2279_v29 = vadd.f32 %v2278_v49, %v2275_v39  ;;  %v3301_v39 = vld [vmem:[%s5315_s4 + $0x40] ss:$8 sps:$4 sm:$0xff]   ;;  %v3302_v49 = vld [vmem:[%s5315_s4 + $0x54] ss:$8 sps:$4 sm:$0xff]  }
 0x210   :  { %v1316_v15 = vadd.f32 %v1310_v17, %v1270_v40  ;;  %2173 = vmatpush1.bf16.msra.mxu1 %v4765_v16  ;;  %v2285_v17 = vstv %s5083_s16 }
 0x211   :  { %v1319_v25 = vadd.f32 %v1318_v50, %v1315_v54  ;;  %2296 = vmatprep.subr.bf16.mxu1 %v4595_v61  ;;  %v2283_v24 = vadd.f32 %v2282_v43, %v2279_v29  ;;  %v3305_v43 = vld [vmem:[%s5315_s4 + $0x60] ss:$8 sps:$4 sm:$0xff]  }
 0x212   :  { %v1333_v46 = vmul.f32 %v1316_v15, %v4982_v33  ;;  %v1335_v37 = vmul.f32 %v1316_v15, %v1140_v22  ;;  %2130 = vmatpush1.bf16.msra.mxu0 %v4746_v23 }
 0x213   :  { %v1332_v38 = vmul.f32 %v1319_v25, %v1140_v22  ;;  %v1336_v26 = vmul.f32 %v1319_v25, %v4982_v33  ;;  %2131 = vmatprep.subr.bf16.mxu0 %v4754_v3  ;;  %2191 = vmatmul.mubr.bf16.vlgmr.msra.gmra.mrb[60].mxu1 %v5077_v9  ;;  %v2286_v33 = vmul.f32 %v4771_v52, %v2285_v17 }
 0x214   :  { %2297 = vmatpush1.bf16.msra.mxu1 %v4613_v55  ;;  %2328 = vmatprep.mubr.bf16.mxu1 %v3325_v2 }
 0x215   :  { %v1334_v0 = vsub.f32 %v1332_v38, %v1333_v46  ;;  %v1337_v5 = vadd.f32 %v1336_v26, %v1335_v37  ;;  %2298 = vmatprep.subr.bf16.mxu1 %v4620_v31  ;;  %v2287_v52 = vadd.f32 %v2286_v33, %v2283_v24  ;;  %v3304_v37 = vld [vmem:[%s5315_s4 + $0x64] ss:$8 sps:$4 sm:$0xff]   ;;  %v3306_v38 = vld [vmem:[%s5315_s4 + $0x74] ss:$8 sps:$4 sm:$0xff]  }
 0x216   :  { %2132 = vmatpush1.bf16.msra.mxu0 %v4765_v16 }
 0x217   :  { %v1344_v36 = vmul.f32 %v4787_v8, %v1334_v0  ;;  %v1345_v35 = vmul.f32 %v4789_v11, %v1337_v5  ;;  %v1347_v19 = vmul.f32 %v4787_v8, %v1337_v5  ;;  %v1348_v12 = vmul.f32 %v4789_v11, %v1334_v0  ;;  %2199 = vmatprep.subr.bf16.mxu0 %v4781_v48 }
 0x218   :  { %2299 = vmatpush1.bf16.msra.mxu1 %v4636_v42  ;;  %v2290_v8 = vmul.f32 %v4797_v32, %v2289_v44 }
 0x219   :  { %v5120_v21 = vsub.f32 %v1344_v36, %v1345_v35  ;;  %v5122_v34 = vadd.f32 %v1348_v12, %v1347_v19  ;;  %2150 = vmatmul.mubr.bf16.vlgmr.msra.gmra.mrb[60].mxu0 %v2116_v62  ;;  %2300 = vmatprep.subr.bf16.mxu1 %v4643_v10 }
 0x21a   :  { %2200 = vmatpush1.bf16.msra.mxu0 %v4846_v56  ;;  %2231 = vmatprep.mubr.bf16.mxu0 %v3325_v2  ;;  %v2291_v11 = vadd.f32 %v2290_v8, %v2287_v52 }
 0x21b   :  { %2201 = vmatprep.subr.bf16.mxu0 %v4853_v27 }
 0x21c   :  { %2301 = vmatpush1.bf16.msra.mxu1 %v4658_v45  ;;  %v5137_v58 = vpack.c.bf16 %v2291_v11, %v2291_v11 }
 0x21d   :  { %2302 = vmatprep.subr.bf16.mxu1 %v4664_v59 }
 0x21e   :  { %2202 = vmatpush1.bf16.msra.mxu0 %v4863_v14  ;;  %v2293_v50 = vunpack.c.l.bf16 %v5137_v58 }
 0x21f   :  { %2203 = vmatprep.subr.bf16.mxu0 %v4870_v63 }
 0x220   :  { %2303 = vmatpush1.bf16.msra.mxu1 %v4678_v51  ;;  %v2294_v54 = vsub.f32 %v2291_v11, %v2293_v50  ;;  %v3190_v50 = vld [vmem:[%s5316_s5 + $0x48] sm:$0xff]  }
 0x221   :  { %2304 = vmatprep.subr.bf16.mxu1 %v4684_v13 }
 0x222   :  { %2204 = vmatpush1.bf16.msra.mxu0 %v4892_v28  ;;  %v2295_v29 = vpack.c.bf16 %v2294_v54, %v2294_v54 }
 0x223   :  { %2205 = vmatprep.subr.bf16.mxu0 %v4898_v4 }
 0x224   :  { %2305 = vmatpush1.bf16.msra.mxu1 %v4697_v60 }
 0x225   :  { %2306 = vmatprep.subr.bf16.mxu1 %v4814_v57 }
 0x226   :  { %2206 = vmatpush1.bf16.msra.mxu0 %v4915_v30  ;;  %v1476_v32 = vpop.f32.mrb[36].mxu1 }
 0x227   :  { %2207 = vmatprep.subr.bf16.mxu0 %v4921_v47  ;;  %v1478_v7 = vpop.f32.mrb[37].mxu1 }
 0x228   :  { %2307 = vmatpush1.bf16.msra.mxu1 %v4823_v1  ;;  %v1480_v40 = vpop.f32.mrb[38].mxu1 }
 0x229   :  { %v1481_v18 = vpop.f32.mrb[39].mxu1  ;;  %2308 = vmatprep.subr.bf16.mxu1 %v4733_v41  ;;  %v3191_v40 = vld [vmem:[%s5316_s5 + $0x8] sm:$0xff]  }
 0x22a   :  { %2208 = vmatpush1.bf16.msra.mxu0 %v3301_v39  ;;  %v3192_v18 = vld [vmem:[%s5316_s5 + $0x50] sm:$0xff]  }
 0x22b   :  { %2209 = vmatprep.subr.bf16.mxu0 %v3302_v49 }
 0x22c   :  { %v1435_v53 = vpop.f32.mrb[36].mxu0  ;;  %2309 = vmatpush1.bf16.msra.mxu1 %v4746_v23 }
 0x22d   :  { %v1477_v20 = vadd.f32 %v1476_v32, %v1435_v53  ;;  %v1437_v22 = vpop.f32.mrb[37].mxu0  ;;  %2310 = vmatprep.subr.bf16.mxu1 %v4754_v3  ;;  %v3188_v32 = vld [vmem:[%s5316_s5 + $0x40] sm:$0xff]  }
 0x22e   :  { %v1479_v15 = vadd.f32 %v1478_v7, %v1437_v22  ;;  %v1439_v25 = vpop.f32.mrb[38].mxu0  ;;  %2210 = vmatpush1.bf16.msra.mxu0 %v3303_v6  ;;  %v3189_v7 = vld [vmem:[%s5316_s5] sm:$0xff]  }
 0x22f   :  { %v1440_v46 = vpop.f32.mrb[39].mxu0  ;;  %2211 = vmatprep.subr.bf16.mxu0 %v3304_v37 }
 0x230   :  { %2311 = vmatpush1.bf16.msra.mxu1 %v4765_v16  ;;  %v3195_v46 = vld [vmem:[%s5316_s5 + $0x18] sm:$0xff]  }
 0x231   :  { %2378 = vmatprep.subr.bf16.mxu1 %v4781_v48  ;;  %v3307_v48 = vld [vmem:[%s5315_s4 + $0x70] ss:$8 sps:$4 sm:$0xff]   ;;  %s2972_s4 = sld [smem:[#allocation2 + $0x30c]] }
 0x232   :  { %2212 = vmatpush1.bf16.msra.mxu0 %v3305_v43 }
 0x233   :  { %2213 = vmatprep.subr.bf16.mxu0 %v3306_v38  ;;  %2329 = vmatmul.mubr.bf16.vlgmr.msra.gmra.mrb[64].mxu1 %v2295_v29 }
 0x234   :  { %2379 = vmatpush1.bf16.msra.mxu1 %v4846_v56  ;;  %2410 = vmatprep.mubr.bf16.mxu1 %v3325_v2 }
 0x235   :  { %2380 = vmatprep.subr.bf16.mxu1 %v4853_v27 }
 0x236   :  { %2214 = vmatpush1.bf16.msra.mxu0 %v3307_v48 }
 0x237   :  { %2337 = vmatprep.subr.bf16.mxu0 %v4595_v61 }
 0x238   :  { %2381 = vmatpush1.bf16.msra.mxu1 %v4863_v14  ;;  %v1527_v14 = vstv %s2972_s4 }
 0x239   :  { %2232 = vmatmul.mubr.bf16.vlgmr.msra.gmra.mrb[64].mxu0 %v5077_v9  ;;  %2382 = vmatprep.subr.bf16.mxu1 %v4870_v63 }
 0x23a   :  { %2338 = vmatpush1.bf16.msra.mxu0 %v4613_v55  ;;  %2369 = vmatprep.mubr.bf16.mxu0 %v3325_v2 }
 0x23b   :  { %2339 = vmatprep.subr.bf16.mxu0 %v4620_v31 }
 0x23c   :  { %2383 = vmatpush1.bf16.msra.mxu1 %v4892_v28  ;;  %v1706_v28 = vstv %s2985_s11 }
 0x23d   :  { %2384 = vmatprep.subr.bf16.mxu1 %v4898_v4 }
 0x23e   :  { %2340 = vmatpush1.bf16.msra.mxu0 %v4636_v42 }
 0x23f   :  { %2341 = vmatprep.subr.bf16.mxu0 %v4643_v10 }
 0x240   :  { %2385 = vmatpush1.bf16.msra.mxu1 %v4915_v30 }
 0x241   :  { %2386 = vmatprep.subr.bf16.mxu1 %v4921_v47 }
 0x242   :  { %2342 = vmatpush1.bf16.msra.mxu0 %v4658_v45 }
 0x243   :  { %2343 = vmatprep.subr.bf16.mxu0 %v4664_v59 }
 0x244   :  { %2387 = vmatpush1.bf16.msra.mxu1 %v3301_v39 }
 0x245   :  { %2388 = vmatprep.subr.bf16.mxu1 %v3302_v49  ;;  %v3193_v49 = vld [vmem:[%s5316_s5 + $0x10] sm:$0xff]  }
 0x246   :  { %2344 = vmatpush1.bf16.msra.mxu0 %v4678_v51  ;;  %v1614_v2 = vpop.f32.mrb[40].mxu1 }
 0x247   :  { %2345 = vmatprep.subr.bf16.mxu0 %v4684_v13  ;;  %v1616_v61 = vpop.f32.mrb[41].mxu1 }
 0x248   :  { %2389 = vmatpush1.bf16.msra.mxu1 %v3303_v6  ;;  %v1618_v55 = vpop.f32.mrb[42].mxu1 }
 0x249   :  { %v1619_v31 = vpop.f32.mrb[43].mxu1  ;;  %2390 = vmatprep.subr.bf16.mxu1 %v3304_v37  ;;  %v3200_v55 = vld [vmem:[%s5316_s5 + $0x70] sm:$0xff]  }
 0x24a   :  { %2346 = vmatpush1.bf16.msra.mxu0 %v4697_v60  ;;  %v3201_v31 = vld [vmem:[%s5316_s5 + $0x30] sm:$0xff]  }
 0x24b   :  { %2347 = vmatprep.subr.bf16.mxu0 %v4814_v57 }
 0x24c   :  { %v1517_v42 = vpop.f32.mrb[40].mxu0  ;;  %2391 = vmatpush1.bf16.msra.mxu1 %v3305_v43 }
 0x24d   :  { %v1524_v10 = vadd.f32 %v1517_v42, %v1477_v20  ;;  %v1519_v45 = vpop.f32.mrb[41].mxu0  ;;  %2392 = vmatprep.subr.bf16.mxu1 %v3306_v38  ;;  %v3196_v38 = vld [vmem:[%s5316_s5 + $0x60] sm:$0xff]   ;;  %v3202_v42 = vld [vmem:[%s5316_s5 + $0x78] sm:$0xff]  }
 0x24e   :  { %v1525_v59 = vadd.f32 %v1519_v45, %v1479_v15  ;;  %v1521_v56 = vpop.f32.mrb[42].mxu0  ;;  %2348 = vmatpush1.bf16.msra.mxu0 %v4823_v1  ;;  %v3194_v15 = vld [vmem:[%s5316_s5 + $0x58] sm:$0xff]   ;;  %v3204_v45 = vld [vmem:[%s5317_s6 + $0x40] sm:$0xff]  }
 0x24f   :  { %v1522_v51 = vpop.f32.mrb[43].mxu0  ;;  %2349 = vmatprep.subr.bf16.mxu0 %v4733_v41  ;;  %v1528_v47 = vadd.f32 %v1527_v14, %v1524_v10  ;;  %v3203_v10 = vld [vmem:[%s5316_s5 + $0x38] sm:$0xff]   ;;  %v2064_v14 = vstv %s3011_s13 }
 0x250   :  { %2393 = vmatpush1.bf16.msra.mxu1 %v3307_v48  ;;  %v3197_v48 = vld [vmem:[%s5316_s5 + $0x20] sm:$0xff]  }
 0x251   :  { %3092 = vmatprep.subr.bf16.mxu1 %v3188_v32 }
 0x252   :  { %2350 = vmatpush1.bf16.msra.mxu0 %v4746_v23 }
 0x253   :  { %2351 = vmatprep.subr.bf16.mxu0 %v4754_v3  ;;  %2411 = vmatmul.mubr.bf16.vlgmr.msra.gmra.mrb[68].mxu1 %v5137_v58 }
 0x254   :  { %3093 = vmatpush3.bf16.msra.mxu1 %v3189_v7 }
 0x255   :  { %3094 = vmatprep.subr.bf16.mxu1 %v3190_v50 }
 0x256   :  { %2352 = vmatpush1.bf16.msra.mxu0 %v4765_v16 }
 0x257   :  { %3070 = vmatprep.subr.bf16.mxu0 %v3188_v32 }
 0x258   :  { %3095 = vmatpush3.bf16.msra.mxu1 %v3191_v40 }
 0x259   :  { %2370 = vmatmul.mubr.bf16.vlgmr.msra.gmra.mrb[68].mxu0 %v5137_v58  ;;  %3096 = vmatprep.subr.bf16.mxu1 %v3192_v18 }
 0x25a   :  { %3071 = vmatpush3.bf16.msra.mxu0 %v3189_v7 }
 0x25b   :  { %3072 = vmatprep.subr.bf16.mxu0 %v3190_v50 }
 0x25c   :  { %3097 = vmatpush3.bf16.msra.mxu1 %v3193_v49 }
 0x25d   :  { %3098 = vmatprep.subr.bf16.mxu1 %v3194_v15 }
 0x25e   :  { %3073 = vmatpush3.bf16.msra.mxu0 %v3191_v40 }
 0x25f   :  { %3074 = vmatprep.subr.bf16.mxu0 %v3192_v18 }
 0x260   :  { %3099 = vmatpush3.bf16.msra.mxu1 %v3195_v46 }
 0x261   :  { %3100 = vmatprep.subr.bf16.mxu1 %v3196_v38 }
 0x262   :  { %3075 = vmatpush3.bf16.msra.mxu0 %v3193_v49 }
 0x263   :  { %3076 = vmatprep.subr.bf16.mxu0 %v3194_v15 }
 0x264   :  { %3101 = vmatpush3.bf16.msra.mxu1 %v3197_v48 }
 0x266   :  { %v1696_v13 = vpop.f32.mrb[44].mxu1  ;;  %3077 = vmatpush3.bf16.msra.mxu0 %v3195_v46 }
 0x267   :  { %v1698_v60 = vpop.f32.mrb[45].mxu1  ;;  %3078 = vmatprep.subr.bf16.mxu0 %v3196_v38 }
 0x268   :  { %v1700_v57 = vpop.f32.mrb[46].mxu1 }
 0x269   :  { %v1701_v1 = vpop.f32.mrb[47].mxu1  ;;  %v1885_v57 = vstv %s2998_s9 }
 0x26a   :  { %3079 = vmatpush3.bf16.msra.mxu0 %v3197_v48 }
 0x26c   :  { %v1655_v27 = vpop.f32.mrb[44].mxu0 }
 0x26d   :  { %v1656_v41 = vadd.f32 %v1655_v27, %v1614_v2  ;;  %v1657_v63 = vpop.f32.mrb[45].mxu0  ;;  %v3198_v2 = vld [vmem:[%s5316_s5 + $0x68] sm:$0xff]  }
 0x26e   :  { %v1658_v23 = vadd.f32 %v1657_v63, %v1616_v61  ;;  %v1659_v4 = vpop.f32.mrb[46].mxu0  ;;  %v3199_v61 = vld [vmem:[%s5316_s5 + $0x28] sm:$0xff]   ;;  %3102 = vmatprep.subr.bf16.mxu1 %v3198_v2  ;;  %3080 = vmatprep.subr.bf16.mxu0 %v3198_v2  ;;  %s3024_s5 = sld [smem:[#allocation2 + $0x50c]] }
 0x26f   :  { %v1703_v3 = vadd.f32 %v1696_v13, %v1656_v41  ;;  %v1660_v30 = vpop.f32.mrb[47].mxu0  ;;  %3103 = vmatpush3.bf16.msra.mxu1 %v3199_v61  ;;  %3081 = vmatpush3.bf16.msra.mxu0 %v3199_v61  ;;  %v2422_v61 = vstv %s3037_s14 }
 0x270   :  { %v1704_v9 = vadd.f32 %v1698_v60, %v1658_v23  ;;  %3104 = vmatprep.subr.bf16.mxu1 %v3200_v55  ;;  %3082 = vmatprep.subr.bf16.mxu0 %v3200_v55 }
 0x271   :  { %v1707_v16 = vadd.f32 %v1706_v28, %v1703_v3 }
 0x272   :  { %v2425_v26 = vmul.f32 %v1704_v9, %v1525_v59  ;;  %v2427_v17 = vmul.f32 %v1704_v9, %v1528_v47 }
 0x273   :  { %v2424_v0 = vmul.f32 %v1707_v16, %v1528_v47  ;;  %v2428_v5 = vmul.f32 %v1707_v16, %v1525_v59  ;;  %3105 = vmatpush3.bf16.msra.mxu1 %v3201_v31  ;;  %3083 = vmatpush3.bf16.msra.mxu0 %v3201_v31 }
 0x274   :  { %3106 = vmatprep.subr.bf16.mxu1 %v3202_v42  ;;  %3084 = vmatprep.subr.bf16.mxu0 %v3202_v42  ;;  %v2243_v38 = vstv %s3024_s5 }
 0x275   :  { %v5200_v62 = vsub.f32 %v2424_v0, %v2425_v26  ;;  %v5202_v24 = vadd.f32 %v2428_v5, %v2427_v17 }
 0x277   :  { %3107 = vmatpush3.bf16.msra.mxu1 %v3203_v10  ;;  %3085 = vmatpush3.bf16.msra.mxu0 %v3203_v10 }
 0x278   :  { %3114 = vmatprep.subr.bf16.mxu0 %v3204_v45 }
 0x286   :  { %v1834_v33 = vpop.f32.mrb[48].mxu1 }
 0x287   :  { %v1836_v36 = vpop.f32.mrb[49].mxu1 }
 0x288   :  { %v1838_v35 = vpop.f32.mrb[50].mxu1 }
 0x289   :  { %v1839_v19 = vpop.f32.mrb[51].mxu1 }
 0x28c   :  { %v1793_v12 = vpop.f32.mrb[48].mxu0 }
 0x28d   :  { %v1835_v44 = vadd.f32 %v1834_v33, %v1793_v12  ;;  %v1795_v52 = vpop.f32.mrb[49].mxu0 }
 0x28e   :  { %v1837_v8 = vadd.f32 %v1836_v36, %v1795_v52  ;;  %v1797_v11 = vpop.f32.mrb[50].mxu0 }
 0x28f   :  { %v1798_v58 = vpop.f32.mrb[51].mxu0 }
 0x2a6   :  { %v1972_v39 = vpop.f32.mrb[52].mxu1 }
 0x2a7   :  { %v1974_v54 = vpop.f32.mrb[53].mxu1 }
 0x2a8   :  { %v1976_v53 = vpop.f32.mrb[54].mxu1 }
 0x2a9   :  { %v1977_v20 = vpop.f32.mrb[55].mxu1 }
 0x2ac   :  { %v1875_v22 = vpop.f32.mrb[52].mxu0 }
 0x2ad   :  { %v1882_v25 = vadd.f32 %v1875_v22, %v1835_v44  ;;  %v1877_v6 = vpop.f32.mrb[53].mxu0 }
 0x2ae   :  { %v1883_v37 = vadd.f32 %v1877_v6, %v1837_v8  ;;  %v1879_v29 = vpop.f32.mrb[54].mxu0 }
 0x2af   :  { %v1880_v43 = vpop.f32.mrb[55].mxu0  ;;  %v1886_v4 = vadd.f32 %v1885_v57, %v1882_v25 }
 0x2c6   :  { %v2054_v59 = vpop.f32.mrb[56].mxu1 }
 0x2c7   :  { %v2056_v56 = vpop.f32.mrb[57].mxu1 }
 0x2c8   :  { %v2058_v51 = vpop.f32.mrb[58].mxu1 }
 0x2c9   :  { %v2059_v13 = vpop.f32.mrb[59].mxu1 }
 0x2cc   :  { %v2013_v60 = vpop.f32.mrb[56].mxu0 }
 0x2cd   :  { %v2014_v1 = vadd.f32 %v2013_v60, %v1972_v39  ;;  %v2015_v27 = vpop.f32.mrb[57].mxu0 }
 0x2ce   :  { %v2016_v41 = vadd.f32 %v2015_v27, %v1974_v54  ;;  %v2017_v63 = vpop.f32.mrb[58].mxu0 }
 0x2cf   :  { %v2061_v28 = vadd.f32 %v2054_v59, %v2014_v1  ;;  %v2018_v23 = vpop.f32.mrb[59].mxu0 }
 0x2d0   :  { %v2062_v3 = vadd.f32 %v2056_v56, %v2016_v41 }
 0x2d1   :  { %v2065_v30 = vadd.f32 %v2064_v14, %v2061_v28 }
 0x2d2   :  { %v2431_v47 = vmul.f32 %v2062_v3, %v1883_v37  ;;  %v2433_v9 = vmul.f32 %v2062_v3, %v1886_v4 }
 0x2d3   :  { %v2430_v16 = vmul.f32 %v2065_v30, %v1886_v4  ;;  %v2434_v26 = vmul.f32 %v2065_v30, %v1883_v37 }
 0x2d5   :  { %v2432_v17 = vsub.f32 %v2430_v16, %v2431_v47  ;;  %v2435_v0 = vadd.f32 %v2434_v26, %v2433_v9 }
 0x2d7   :  { %v2442_v5 = vmul.f32 %v2432_v17, %v5200_v62  ;;  %v2443_v33 = vmul.f32 %v2435_v0, %v5202_v24  ;;  %v2445_v36 = vmul.f32 %v2435_v0, %v5200_v62  ;;  %v2446_v35 = vmul.f32 %v2432_v17, %v5202_v24 }
 0x2d9   :  { %v2444_v19 = vsub.f32 %v2442_v5, %v2443_v33  ;;  %v2447_v12 = vadd.f32 %v2446_v35, %v2445_v36 }
 0x2e6   :  { %v2192_v44 = vpop.f32.mrb[60].mxu1 }
 0x2e7   :  { %v2194_v52 = vpop.f32.mrb[61].mxu1 }
 0x2e8   :  { %v2196_v8 = vpop.f32.mrb[62].mxu1 }
 0x2e9   :  { %v2197_v11 = vpop.f32.mrb[63].mxu1  ;;  %v3209_v8 = vld [vmem:[%s5317_s6 + $0x10] sm:$0xff]  }
 0x2ea   :  { %v3210_v11 = vld [vmem:[%s5317_s6 + $0x58] sm:$0xff]  }
 0x2ec   :  { %v2151_v58 = vpop.f32.mrb[60].mxu0 }
 0x2ed   :  { %v2193_v32 = vadd.f32 %v2192_v44, %v2151_v58  ;;  %v2153_v7 = vpop.f32.mrb[61].mxu0  ;;  %v3205_v44 = vld [vmem:[%s5317_s6] sm:$0xff]   ;;  %v3211_v58 = vld [vmem:[%s5317_s6 + $0x18] sm:$0xff]  }
 0x2ee   :  { %v2195_v50 = vadd.f32 %v2194_v52, %v2153_v7  ;;  %v2155_v40 = vpop.f32.mrb[62].mxu0  ;;  %v3208_v52 = vld [vmem:[%s5317_s6 + $0x50] sm:$0xff]   ;;  %v3213_v7 = vld [vmem:[%s5317_s6 + $0x20] sm:$0xff]  }
 0x2ef   :  { %v2156_v18 = vpop.f32.mrb[63].mxu0  ;;  %v3215_v40 = vld [vmem:[%s5317_s6 + $0x28] sm:$0xff]  }
 0x2f0   :  { %v3216_v18 = vld [vmem:[%s5317_s6 + $0x70] sm:$0xff]  }
 0x306   :  { %v2330_v39 = vpop.f32.mrb[64].mxu1 }
 0x307   :  { %v2332_v49 = vpop.f32.mrb[65].mxu1 }
 0x308   :  { %v2334_v54 = vpop.f32.mrb[66].mxu1 }
 0x309   :  { %v2335_v53 = vpop.f32.mrb[67].mxu1  ;;  %v3219_v54 = vld [vmem:[%s5317_s6 + $0x38] sm:$0xff]  }
 0x30c   :  { %v2233_v20 = vpop.f32.mrb[64].mxu0 }
 0x30d   :  { %v2240_v62 = vadd.f32 %v2233_v20, %v2193_v32  ;;  %v2235_v22 = vpop.f32.mrb[65].mxu0  ;;  %v3212_v32 = vld [vmem:[%s5317_s6 + $0x60] sm:$0xff]  }
 0x30e   :  { %v2241_v24 = vadd.f32 %v2235_v22, %v2195_v50  ;;  %v2237_v15 = vpop.f32.mrb[66].mxu0  ;;  %v3214_v50 = vld [vmem:[%s5317_s6 + $0x68] sm:$0xff]  }
 0x30f   :  { %v2238_v25 = vpop.f32.mrb[67].mxu0  ;;  %v2244_v45 = vadd.f32 %v2243_v38, %v2240_v62 }
 0x326   :  { %v2412_v6 = vpop.f32.mrb[68].mxu1 }
 0x327   :  { %v2414_v46 = vpop.f32.mrb[69].mxu1 }
 0x328   :  { %v2416_v37 = vpop.f32.mrb[70].mxu1 }
 0x329   :  { %v2417_v29 = vpop.f32.mrb[71].mxu1 }
 0x32c   :  { %v2371_v43 = vpop.f32.mrb[68].mxu0 }
 0x32d   :  { %v2372_v48 = vadd.f32 %v2371_v43, %v2330_v39  ;;  %v2373_v2 = vpop.f32.mrb[69].mxu0  ;;  %v3217_v39 = vld [vmem:[%s5317_s6 + $0x30] sm:$0xff]  }
 0x32e   :  { %v2374_v55 = vadd.f32 %v2373_v2, %v2332_v49  ;;  %v2375_v31 = vpop.f32.mrb[70].mxu0  ;;  %v3218_v49 = vld [vmem:[%s5317_s6 + $0x78] sm:$0xff]  }
 0x32f   :  { %v2419_v42 = vadd.f32 %v2412_v6, %v2372_v48  ;;  %v2376_v10 = vpop.f32.mrb[71].mxu0 }
 0x330   :  { %v2420_v59 = vadd.f32 %v2414_v46, %v2374_v55 }
 0x331   :  { %v2423_v56 = vadd.f32 %v2422_v61, %v2419_v42 }
 0x332   :  { %v2437_v51 = vmul.f32 %v2420_v59, %v2241_v24  ;;  %v2439_v13 = vmul.f32 %v2420_v59, %v2244_v45 }
 0x333   :  { %v2436_v60 = vmul.f32 %v2423_v56, %v2244_v45  ;;  %v2440_v57 = vmul.f32 %v2423_v56, %v2241_v24 }
 0x335   :  { %v2438_v1 = vsub.f32 %v2436_v60, %v2437_v51  ;;  %v2441_v27 = vadd.f32 %v2440_v57, %v2439_v13 }
 0x337   :  { %v2448_v14 = vmul.f32 %v2444_v19, %v2438_v1  ;;  %v2449_v41 = vmul.f32 %v2447_v12, %v2441_v27  ;;  %v2451_v63 = vmul.f32 %v2444_v19, %v2441_v27  ;;  %v2452_v28 = vmul.f32 %v2447_v12, %v2438_v1 }
 0x339   :  { %v2450_v23 = vsub.f32 %v2448_v14, %v2449_v41  ;;  %v2453_v4 = vadd.f32 %v2452_v28, %v2451_v63 }
 0x33b   :  { %v2457_v3 = vmul.f32 %v2450_v23, %v5122_v34  ;;  %v2458_v30 = vmul.f32 %v2453_v4, %v5120_v21  ;;  %v2454_v47 = vmul.f32 %v2450_v23, %v5120_v21  ;;  %v2455_v9 = vmul.f32 %v2453_v4, %v5122_v34  ;;  %v3206_v21 = vld [vmem:[%s5317_s6 + $0x48] sm:$0xff]  }
 0x33c   :  { %v3207_v34 = vld [vmem:[%s5317_s6 + $0x8] sm:$0xff]  }
 0x33d   :  { %v2459_v16 = vsub.f32 %v2457_v3, %v2458_v30  ;;  %v2456_v26 = vadd.f32 %v2455_v9, %v2454_v47 }
 0x33f   :  { %v2525_v17 = vpack.c.bf16 %v2459_v16, %v2459_v16  ;;  %v2524_v0 = vpack.c.bf16 %v2456_v26, %v2456_v26 }
 0x341   :  { %2700 = vmatprep.mubr.bf16.mxu1 %v2525_v17  ;;  %v2527_v5 = vunpack.c.l.bf16 %v2525_v17  ;;  %v2526_v33 = vunpack.c.l.bf16 %v2524_v0 }
 0x342   :  { %2701 = vmatmul.mubr.bf16.vlgmr.msra.gmra.mrb[72].mxu1 %v2524_v0 }
 0x343   :  { %v2529_v36 = vsub.f32 %v2459_v16, %v2527_v5  ;;  %v2528_v35 = vsub.f32 %v2456_v26, %v2526_v33 }
 0x345   :  { %v2531_v19 = vpack.c.bf16 %v2529_v36, %v2529_v36  ;;  %v2530_v12 = vpack.c.bf16 %v2528_v35, %v2528_v35 }
 0x347   :  { %2660 = vmatprep.mubr.bf16.mxu0 %v2531_v19 }
 0x348   :  { %2661 = vmatmul.mubr.bf16.vlgmr.msra.gmra.mrb[72].mxu0 %v2530_v12 }
 0x349   :  { %3115 = vmatpush3.bf16.msra.mxu0 %v3205_v44  ;;  %2836 = vmatprep.mubr.bf16.mxu0 %v2525_v17 }
 0x34a   :  { %3116 = vmatprep.subr.bf16.mxu0 %v3206_v21 }
 0x34d   :  { %3117 = vmatpush3.bf16.msra.mxu0 %v3207_v34 }
 0x34e   :  { %3118 = vmatprep.subr.bf16.mxu0 %v3208_v52 }
 0x351   :  { %3119 = vmatpush3.bf16.msra.mxu0 %v3209_v8 }
 0x352   :  { %3120 = vmatprep.subr.bf16.mxu0 %v3210_v11 }
 0x355   :  { %3121 = vmatpush3.bf16.msra.mxu0 %v3211_v58 }
 0x356   :  { %3122 = vmatprep.subr.bf16.mxu0 %v3212_v32 }
 0x359   :  { %3123 = vmatpush3.bf16.msra.mxu0 %v3213_v7 }
 0x35a   :  { %3124 = vmatprep.subr.bf16.mxu0 %v3214_v50 }
 0x35d   :  { %3125 = vmatpush3.bf16.msra.mxu0 %v3215_v40 }
 0x35e   :  { %3126 = vmatprep.subr.bf16.mxu0 %v3216_v18 }
 0x361   :  { %3127 = vmatpush3.bf16.msra.mxu0 %v3217_v39 }
 0x362   :  { %3128 = vmatprep.subr.bf16.mxu0 %v3218_v49 }
 0x365   :  { %3129 = vmatpush3.bf16.msra.mxu0 %v3219_v54 }
 0x368   :  { %2837 = vmatmul.mubr.bf16.vlgmr.msra.gmra.mrb[76].mxu0 %v2524_v0 }
 0x415   :  { %v3108_v53 = vpop.f32.mrb[72].mxu1 }
 0x416   :  { %v3109_v20 = vpop.f32.mrb[73].mxu1 }
 0x417   :  { %v3110_v62 = vadd.f32 %v3109_v20, %v3108_v53  ;;  %v3111_v22 = vpop.f32.mrb[74].mxu1 }
 0x418   :  { %v3112_v24 = vpop.f32.mrb[75].mxu1 }
 0x41b   :  { %v3086_v15 = vpop.f32.mrb[72].mxu0 }
 0x41c   :  { %v3087_v25 = vpop.f32.mrb[73].mxu0 }
 0x41d   :  { %v3088_v6 = vadd.f32 %v3087_v25, %v3086_v15  ;;  %v3089_v46 = vpop.f32.mrb[74].mxu0 }
 0x41e   :  { %v3090_v37 = vpop.f32.mrb[75].mxu0 }
 0x41f   :  { %v2703_v29 = vadd.f32 %v3110_v62, %v3088_v6 }
 0x43b   :  { %v3130_v43 = vpop.f32.mrb[76].mxu0 }
 0x43c   :  { %v3131_v38 = vpop.f32.mrb[77].mxu0 }
 0x43d   :  { %v3132_v48 = vadd.f32 %v3131_v38, %v3130_v43  ;;  %v3133_v2 = vpop.f32.mrb[78].mxu0 }
 0x43e   :  { %v3134_v61 = vpop.f32.mrb[79].mxu0 }
 0x43f   :  { %v2844_v55 = vadd.f32 %v3132_v48, %v2703_v29 }
 0x441   :  { %2845 = vst [vmem:[%s5318_s7] sm:$0xff] %v2844_v55 }
 0x442   :  { %2850 = vsyncpa [#allocation3], 1 }

</bundles_post_ra>
